<compile_context>
chip_gen: v5e
topology: v5e:2x2
jax: 0.10.0
libtpu: 0.0.40
codegen_flags: <defaults>
</compile_context>

<pallas_src>
from functools import partial

import jax
import jax.numpy as jnp
from jax import lax
from jax.experimental import pallas as pl
from jax.experimental.pallas import tpu as pltpu

LANE = 128            # lane width of a vreg
CHUNK = 8             # sublane chunk processed per inner step (one f32 vreg tall)
MAX_TILE_ROWS = 64    # <=64 sublane rows per grid step (8192 lanes, amortizes ~0.35us)
VMEM_BUDGET = 8 * 1024 * 1024   # conservative per-step budget, << v7x 32 MiB scoped


def _round_up(a, m):
    return -(-a // m) * m


def _plan_tiles(hw, batch, cmax):
    """Pick (s_tile, n_tiles, s_padded, split) for the (B, C, S, 128) layout."""
    s_total = -(-hw // LANE)
    split = batch == 1                      # v7x megacore: need a parallel axis >= 2
    row_bytes = 2 * cmax * LANE * 4         # one sublane row of input + output (f32)
    vmem_rows = VMEM_BUDGET // (2 * row_bytes)      # pipeline double-buffers
    cap = min(MAX_TILE_ROWS, max(16, (vmem_rows // 16) * 16))
    if split:
        s_tile = min(cap, _round_up(max(1, -(-s_total // 2)), 16))
        n_tiles = max(2, -(-s_total // s_tile))
        n_tiles += n_tiles % 2              # even -> split cleanly across 2 halves
    else:
        if s_total <= cap:
            s_tile, n_tiles = s_total, 1
        else:
            s_tile = cap
            n_tiles = -(-s_total // s_tile)
    return s_tile, n_tiles, s_tile * n_tiles, split


# ----------------------------------------------------------------------------
# Kernel factory: one fused pass = (prev BN affine [+ReLU]) -> channel mix
#                 -> store activation -> accumulate next-BN batch statistics
# ----------------------------------------------------------------------------
def _make_kernel(*, cin, cout, mix, pre, relu, bias, stats, s_tile, hw,
                 split, tiles_per_par, masked, out_dtype):
    if s_tile % CHUNK == 0:
        chunk, n_chunks = CHUNK, s_tile // CHUNK
    else:                                   # tiny spatial: single sub-8-row chunk
        chunk, n_chunks = s_tile, 1

    def kernel(x_ref, *refs):
        i = 0
        ab_ref = None
        if pre:
            ab_ref = refs[i]; i += 1        # (2, cin) folded BN scale/bias in SMEM
        w_ref = refs[i]; i += 1             # (cout, cin) mix weights in SMEM
        cb_ref = None
        if bias:
            cb_ref = refs[i]; i += 1        # (cout,) conv bias in SMEM
        if stats:
            y_ref, s_ref, q_ref = refs[i], refs[i + 1], refs[i + 2]
        else:
            y_ref = refs[i]

        # hoist all scalar (SMEM) parameter reads out of the compute loops
        if pre:
            sc = [ab_ref[0, c] for c in range(cin)]
            bi = [ab_ref[1, c] for c in range(cin)]
        wv = [[w_ref[t, c] for c in range(cin)] for t in range(cout)]
        cbv = [cb_ref[t] for t in range(cout)] if bias else None

        if stats:
            @pl.when(pl.program_id(1) == 0)
            def _():
                s_ref[...] = jnp.zeros_like(s_ref)
                q_ref[...] = jnp.zeros_like(q_ref)
            s_parts = [jnp.zeros((1, LANE), jnp.float32) for _ in range(cout)]
            q_parts = [jnp.zeros((1, LANE), jnp.float32) for _ in range(cout)]
            if masked:
                if split:
                    blk = pl.program_id(0) * tiles_per_par + pl.program_id(1)
                else:
                    blk = pl.program_id(1)
                s_off = blk * s_tile

        for ck in range(n_chunks):
            lo = ck * chunk
            # previous stage's BN affine (+ReLU) applied per input channel;
            # each h[c] is a register-resident (chunk, 128) f32 slab.
            h = []
            for c in range(cin):
                v = x_ref[c, lo:lo + chunk, :].astype(jnp.float32)
                if pre:
                    v = v * sc[c] + bi[c]
                    if relu:
                        v = jnp.maximum(v, 0.0)
                h.append(v)

            if stats and masked:
                row = lax.broadcasted_iota(jnp.int32, (chunk, LANE), 0)
                ln = lax.broadcasted_iota(jnp.int32, (chunk, LANE), 1)
                flat = (s_off + lo + row) * LANE + ln
                msk = (flat < hw).astype(jnp.float32)

            for t in range(cout):
                if mix == "tropical":
                    acc = h[0] + wv[t][0]
                    for c in range(1, cin):
                        acc = jnp.maximum(acc, h[c] + wv[t][c])
                else:                        # 1x1 conv (linear mix)
                    acc = h[0] * wv[t][0]
                    for c in range(1, cin):
                        acc = acc + h[c] * wv[t][c]
                    if bias:
                        acc = acc + cbv[t]
                # one lane-dense store per output slab
                y_ref[t, lo:lo + chunk, :] = acc.astype(out_dtype)
                if stats:
                    a = acc * msk if masked else acc
                    s_parts[t] = s_parts[t] + jnp.sum(a, axis=0, keepdims=True)
                    q_parts[t] = q_parts[t] + jnp.sum(a * acc, axis=0, keepdims=True)

        if stats:
            s_ref[...] += jnp.concatenate(s_parts, axis=0)
            q_ref[...] += jnp.concatenate(q_parts, axis=0)

    return kernel


# ----------------------------------------------------------------------------
# Pallas wrapper for one fused pass
# ----------------------------------------------------------------------------
def _fused_pass(x4, *, w, ab=None, cb=None, mix, relu, stats, cout, plan, hw,
                out_dtype):
    batch, cin, s_padded, _ = x4.shape
    s_tile, n_tiles, _, split = plan
    n_par = 2 if split else batch
    tiles_per_par = n_tiles // 2 if split else n_tiles
    masked = s_padded * LANE > hw

    if split:
        act_idx = lambda p, t: (0, 0, p * tiles_per_par + t, 0)
    else:
        act_idx = lambda p, t: (p, 0, t, 0)
    stat_idx = lambda p, t: (p, 0, 0)

    smem = pl.BlockSpec(memory_space=pltpu.MemorySpace.SMEM)
    in_arrays = [x4]
    in_specs = [pl.BlockSpec((None, cin, s_tile, LANE), act_idx)]
    if ab is not None:
        in_arrays.append(ab); in_specs.append(smem)
    in_arrays.append(w); in_specs.append(smem)
    if cb is not None:
        in_arrays.append(cb); in_specs.append(smem)

    y_shape = jax.ShapeDtypeStruct((batch, cout, s_padded, LANE), out_dtype)
    y_spec = pl.BlockSpec((None, cout, s_tile, LANE), act_idx)
    if stats:
        out_shape = (y_shape,
                     jax.ShapeDtypeStruct((n_par, cout, LANE), jnp.float32),
                     jax.ShapeDtypeStruct((n_par, cout, LANE), jnp.float32))
        out_specs = (y_spec,
                     pl.BlockSpec((None, cout, LANE), stat_idx),
                     pl.BlockSpec((None, cout, LANE), stat_idx))
        dims = ("parallel", "arbitrary")     # stats accumulate over the tile axis
    else:
        out_shape = y_shape
        out_specs = y_spec
        dims = ("parallel", "parallel")

    kernel = _make_kernel(cin=cin, cout=cout, mix=mix, pre=ab is not None,
                          relu=relu, bias=cb is not None, stats=stats,
                          s_tile=s_tile, hw=hw, split=split,
                          tiles_per_par=tiles_per_par, masked=masked,
                          out_dtype=out_dtype)

    return pl.pallas_call(
        kernel,
        out_shape=out_shape,
        grid=(n_par, tiles_per_par),
        in_specs=in_specs,
        out_specs=out_specs,
        compiler_params=pltpu.CompilerParams(dimension_semantics=dims),
    )(*in_arrays)


# ----------------------------------------------------------------------------
# Glue: fold batch statistics into a per-channel affine (tiny, stays in JAX)
# ----------------------------------------------------------------------------
def _bn_scale_bias(stat_sum, stat_sq, n, gamma, beta, eps=1e-5):
    total = jnp.sum(stat_sum, axis=(0, 2))     # (C,)
    total_sq = jnp.sum(stat_sq, axis=(0, 2))   # (C,)
    mean = total / n
    var = jnp.maximum(total_sq / n - mean * mean, 0.0)   # biased var (train mode)
    scale = gamma / jnp.sqrt(var + eps)
    bias = beta - mean * scale
    return jnp.stack([scale, bias], axis=0)    # (2, C) — single SMEM param array


# ----------------------------------------------------------------------------
# Full forward pass
# ----------------------------------------------------------------------------
@partial(jax.jit, static_argnames=("act_dtype",))
def fis_autoencoder_forward(x, w1, g1, b1, w2, g2, b2, wc1, cb1, g3, b3, wc2, cb2,
                            act_dtype=jnp.bfloat16):
    batch, cin, h, w = x.shape
    hw = h * w
    n = batch * hw
    c1, c2 = w1.shape[0], w2.shape[0]
    cd1, cfin = wc1.shape[0], wc2.shape[0]
    cb1f, cb2f = cb1.reshape(-1), cb2.reshape(-1)

    cmax = max(cin, c1, c2, cd1, cfin)
    plan = _plan_tiles(hw, batch, cmax)
    s_tile, n_tiles, s_padded, split = plan

    # free reshape NCHW -> (B, C, HW), pad flat spatial to s_padded * 128
    x3 = x.reshape(batch, cin, hw)
    pad = s_padded * LANE - hw
    if pad:
        x3 = jnp.pad(x3, ((0, 0), (0, 0), (0, pad)))
    x4 = x3.reshape(batch, cin, s_padded, LANE)

    # encoder: FIS1 (+ BN1 batch stats)
    y1, s1, q1 = _fused_pass(x4, w=w1, mix="tropical", relu=False, stats=True,
                             cout=c1, plan=plan, hw=hw, out_dtype=act_dtype)
    ab1 = _bn_scale_bias(s1, q1, n, g1, b1)

    # BN1 affine + ReLU + FIS2 (+ BN2 batch stats)
    y2, s2, q2 = _fused_pass(y1, w=w2, ab=ab1, mix="tropical", relu=True,
                             stats=True, cout=c2, plan=plan, hw=hw,
                             out_dtype=act_dtype)
    ab2 = _bn_scale_bias(s2, q2, n, g2, b2)

    # decoder: BN2 affine (encoder output, no ReLU) + Conv1x1 (+ BN3 batch stats)
    y3, s3, q3 = _fused_pass(y2, w=wc1, ab=ab2, cb=cb1f, mix="linear",
                             relu=False, stats=True, cout=cd1, plan=plan,
                             hw=hw, out_dtype=act_dtype)
    ab3 = _bn_scale_bias(s3, q3, n, g3, b3)

    # BN3 affine + ReLU + final Conv1x1 (f32 output)
    y4 = _fused_pass(y3, w=wc2, ab=ab3, cb=cb2f, mix="linear", relu=True,
                     stats=False, cout=cfin, plan=plan, hw=hw,
                     out_dtype=jnp.float32)

    out = y4.reshape(batch, cfin, s_padded * LANE)[:, :, :hw]
    return out.reshape(batch, cfin, h, w)


# ----------------------------------------------------------------------------
# Pure-JAX reference (independent formulation) for validation
# ----------------------------------------------------------------------------
def _ref_tropical(x_cn, w):
    return jnp.max(w[:, :, None] + x_cn[None, :, :], axis=1)


def _ref_bn(y_cn, gamma, beta, eps=1e-5):
    mean = jnp.mean(y_cn, axis=1, keepdims=True)
    var = jnp.mean((y_cn - mean) ** 2, axis=1, keepdims=True)
    return (y_cn - mean) / jnp.sqrt(var + eps) * gamma[:, None] + beta[:, None]


def fis_autoencoder_reference(x, w1, g1, b1, w2, g2, b2, wc1, cb1, g3, b3,
                              wc2, cb2):
    batch, cin, h, w = x.shape
    n = batch * h * w
    x_cn = jnp.transpose(x, (1, 0, 2, 3)).reshape(cin, n)
    y1 = _ref_tropical(x_cn, w1)
    h1 = jnp.maximum(_ref_bn(y1, g1, b1), 0.0)
    y2 = _ref_tropical(h1, w2)
    z = _ref_bn(y2, g2, b2)                          # encoder output
    c1 = wc1 @ z + cb1.reshape(-1, 1)
    h2 = jnp.maximum(_ref_bn(c1, g3, b3), 0.0)
    out_cn = wc2 @ h2 + cb2.reshape(-1, 1)
    cfin = wc2.shape[0]
    return out_cn.reshape(cfin, batch, h, w).transpose(1, 0, 2, 3)


# ----------------------------------------------------------------------------
if __name__ == "__main__":
    B, Cin, H, W = 2, 4, 16, 16
    latent_dim, num_nodes = 4, 3
    C1, C2 = 2 * latent_dim, latent_dim              # encoder widths: 8, 4

    key = jax.random.PRNGKey(0)
    k = jax.random.split(key, 7)

    # FISLayer params: (num_trees, num_nodes, in_channels), ParamInit.NORMAL;
    # max-plus semantics fold the node max into an effective (trees, in) weight.
    w1 = jnp.max(jax.random.normal(k[0], (C1, num_nodes, Cin), jnp.float32), axis=1)
    w2 = jnp.max(jax.random.normal(k[1], (C2, num_nodes, C1), jnp.float32), axis=1)

    # BatchNorm2d fresh init (training-mode batch statistics): gamma=1, beta=0.
    g1 = jnp.ones((C1,), jnp.float32); b1 = jnp.zeros((C1,), jnp.float32)
    g2 = jnp.ones((C2,), jnp.float32); b2 = jnp.zeros((C2,), jnp.float32)
    g3 = jnp.ones((C1,), jnp.float32); b3 = jnp.zeros((C1,), jnp.float32)

    # Decoder 1x1 convolutions: weight (out, in), bias (out,).
    wc1 = 0.5 * jax.random.normal(k[2], (C1, C2), jnp.float32)
    cb1 = 0.1 * jax.random.normal(k[3], (C1,), jnp.float32)
    wc2 = 0.5 * jax.random.normal(k[4], (Cin, C1), jnp.float32)
    cb2 = 0.1 * jax.random.normal(k[5], (Cin,), jnp.float32)

    x = jax.random.normal(k[6], (B, Cin, H, W), jnp.float32)   # NCHW like PyTorch

    args = (x, w1, g1, b1, w2, g2, b2, wc1, cb1, g3, b3, wc2, cb2)
    ref = jax.block_until_ready(fis_autoencoder_reference(*args))

    # 1) f32 intermediates: exact-semantics check
    out_f32 = jax.block_until_ready(
        fis_autoencoder_forward(*args, act_dtype=jnp.float32))
    assert out_f32.shape == (B, Cin, H, W), out_f32.shape
    err_f32 = float(jnp.max(jnp.abs(out_f32 - ref)))
    if not jnp.allclose(out_f32, ref, atol=1e-4, rtol=1e-4):
        raise SystemExit(f"f32 mismatch: max abs err = {err_f32}")

    # 2) bf16 intermediates (perf mode): generous sanity bound on the drift
    out_bf = jax.block_until_ready(
        fis_autoencoder_forward(*args, act_dtype=jnp.bfloat16))
    err_bf = float(jnp.max(jnp.abs(out_bf - ref)))
    if not (err_bf < 0.25):
        raise SystemExit(f"bf16 mismatch: max abs err = {err_bf}")

    # 3) batch=1: exercises the v7x megacore spatial split + padded-tail masking
    args1 = (x[:1],) + args[1:]
    ref1 = jax.block_until_ready(fis_autoencoder_reference(*args1))
    out1 = jax.block_until_ready(
        fis_autoencoder_forward(*args1, act_dtype=jnp.float32))
    err1 = float(jnp.max(jnp.abs(out1 - ref1)))
    if not jnp.allclose(out1, ref1, atol=1e-4, rtol=1e-4):
        raise SystemExit(f"batch=1 mismatch: max abs err = {err1}")

    print("KERNEL_OK")
</pallas_src>

<mosaic_0001>
module attributes {stable_mosaic.version = 11 : i64} {
  func.func @kernel(%arg0: i32, %arg1: i32, %arg2: memref<1x4x2x128xf32, #tpu.memory_space<vmem>>, %arg3: memref<8x4xf32, #tpu.memory_space<smem>>, %arg4: memref<1x8x2x128xf32, #tpu.memory_space<vmem>>, %arg5: memref<1x8x128xf32, #tpu.memory_space<vmem>>, %arg6: memref<1x8x128xf32, #tpu.memory_space<vmem>>) attributes {dimension_semantics = [#tpu.dimension_semantics<parallel>, #tpu.dimension_semantics<arbitrary>], iteration_bounds = array<i64: 2, 1>, scalar_prefetch = 0 : i64, scratch_operands = 0 : i64, tpu.core_type = #tpu.core_type<tc>, window_params = [{transform_indices = @transform_0, window_bounds = array<i64: 1, 4, 2, 128>}, {transform_indices = @transform_1, window_bounds = array<i64: 8, 4>}, {transform_indices = @transform_2, window_bounds = array<i64: 1, 8, 2, 128>}, {transform_indices = @transform_3, window_bounds = array<i64: 1, 8, 128>}, {transform_indices = @transform_4, window_bounds = array<i64: 1, 8, 128>}]} {
    %c0 = arith.constant 0 : index
    %c0_0 = arith.constant 0 : index
    %0 = memref.load %arg3[%c0, %c0_0] : memref<8x4xf32, #tpu.memory_space<smem>>
    %c0_1 = arith.constant 0 : index
    %c1 = arith.constant 1 : index
    %1 = memref.load %arg3[%c0_1, %c1] : memref<8x4xf32, #tpu.memory_space<smem>>
    %c0_2 = arith.constant 0 : index
    %c2 = arith.constant 2 : index
    %2 = memref.load %arg3[%c0_2, %c2] : memref<8x4xf32, #tpu.memory_space<smem>>
    %c0_3 = arith.constant 0 : index
    %c3 = arith.constant 3 : index
    %3 = memref.load %arg3[%c0_3, %c3] : memref<8x4xf32, #tpu.memory_space<smem>>
    %c1_4 = arith.constant 1 : index
    %c0_5 = arith.constant 0 : index
    %4 = memref.load %arg3[%c1_4, %c0_5] : memref<8x4xf32, #tpu.memory_space<smem>>
    %c1_6 = arith.constant 1 : index
    %c1_7 = arith.constant 1 : index
    %5 = memref.load %arg3[%c1_6, %c1_7] : memref<8x4xf32, #tpu.memory_space<smem>>
    %c1_8 = arith.constant 1 : index
    %c2_9 = arith.constant 2 : index
    %6 = memref.load %arg3[%c1_8, %c2_9] : memref<8x4xf32, #tpu.memory_space<smem>>
    %c1_10 = arith.constant 1 : index
    %c3_11 = arith.constant 3 : index
    %7 = memref.load %arg3[%c1_10, %c3_11] : memref<8x4xf32, #tpu.memory_space<smem>>
    %c2_12 = arith.constant 2 : index
    %c0_13 = arith.constant 0 : index
    %8 = memref.load %arg3[%c2_12, %c0_13] : memref<8x4xf32, #tpu.memory_space<smem>>
    %c2_14 = arith.constant 2 : index
    %c1_15 = arith.constant 1 : index
    %9 = memref.load %arg3[%c2_14, %c1_15] : memref<8x4xf32, #tpu.memory_space<smem>>
    %c2_16 = arith.constant 2 : index
    %c2_17 = arith.constant 2 : index
    %10 = memref.load %arg3[%c2_16, %c2_17] : memref<8x4xf32, #tpu.memory_space<smem>>
    %c2_18 = arith.constant 2 : index
    %c3_19 = arith.constant 3 : index
    %11 = memref.load %arg3[%c2_18, %c3_19] : memref<8x4xf32, #tpu.memory_space<smem>>
    %c3_20 = arith.constant 3 : index
    %c0_21 = arith.constant 0 : index
    %12 = memref.load %arg3[%c3_20, %c0_21] : memref<8x4xf32, #tpu.memory_space<smem>>
    %c3_22 = arith.constant 3 : index
    %c1_23 = arith.constant 1 : index
    %13 = memref.load %arg3[%c3_22, %c1_23] : memref<8x4xf32, #tpu.memory_space<smem>>
    %c3_24 = arith.constant 3 : index
    %c2_25 = arith.constant 2 : index
    %14 = memref.load %arg3[%c3_24, %c2_25] : memref<8x4xf32, #tpu.memory_space<smem>>
    %c3_26 = arith.constant 3 : index
    %c3_27 = arith.constant 3 : index
    %15 = memref.load %arg3[%c3_26, %c3_27] : memref<8x4xf32, #tpu.memory_space<smem>>
    %c4 = arith.constant 4 : index
    %c0_28 = arith.constant 0 : index
    %16 = memref.load %arg3[%c4, %c0_28] : memref<8x4xf32, #tpu.memory_space<smem>>
    %c4_29 = arith.constant 4 : index
    %c1_30 = arith.constant 1 : index
    %17 = memref.load %arg3[%c4_29, %c1_30] : memref<8x4xf32, #tpu.memory_space<smem>>
    %c4_31 = arith.constant 4 : index
    %c2_32 = arith.constant 2 : index
    %18 = memref.load %arg3[%c4_31, %c2_32] : memref<8x4xf32, #tpu.memory_space<smem>>
    %c4_33 = arith.constant 4 : index
    %c3_34 = arith.constant 3 : index
    %19 = memref.load %arg3[%c4_33, %c3_34] : memref<8x4xf32, #tpu.memory_space<smem>>
    %c5 = arith.constant 5 : index
    %c0_35 = arith.constant 0 : index
    %20 = memref.load %arg3[%c5, %c0_35] : memref<8x4xf32, #tpu.memory_space<smem>>
    %c5_36 = arith.constant 5 : index
    %c1_37 = arith.constant 1 : index
    %21 = memref.load %arg3[%c5_36, %c1_37] : memref<8x4xf32, #tpu.memory_space<smem>>
    %c5_38 = arith.constant 5 : index
    %c2_39 = arith.constant 2 : index
    %22 = memref.load %arg3[%c5_38, %c2_39] : memref<8x4xf32, #tpu.memory_space<smem>>
    %c5_40 = arith.constant 5 : index
    %c3_41 = arith.constant 3 : index
    %23 = memref.load %arg3[%c5_40, %c3_41] : memref<8x4xf32, #tpu.memory_space<smem>>
    %c6 = arith.constant 6 : index
    %c0_42 = arith.constant 0 : index
    %24 = memref.load %arg3[%c6, %c0_42] : memref<8x4xf32, #tpu.memory_space<smem>>
    %c6_43 = arith.constant 6 : index
    %c1_44 = arith.constant 1 : index
    %25 = memref.load %arg3[%c6_43, %c1_44] : memref<8x4xf32, #tpu.memory_space<smem>>
    %c6_45 = arith.constant 6 : index
    %c2_46 = arith.constant 2 : index
    %26 = memref.load %arg3[%c6_45, %c2_46] : memref<8x4xf32, #tpu.memory_space<smem>>
    %c6_47 = arith.constant 6 : index
    %c3_48 = arith.constant 3 : index
    %27 = memref.load %arg3[%c6_47, %c3_48] : memref<8x4xf32, #tpu.memory_space<smem>>
    %c7 = arith.constant 7 : index
    %c0_49 = arith.constant 0 : index
    %28 = memref.load %arg3[%c7, %c0_49] : memref<8x4xf32, #tpu.memory_space<smem>>
    %c7_50 = arith.constant 7 : index
    %c1_51 = arith.constant 1 : index
    %29 = memref.load %arg3[%c7_50, %c1_51] : memref<8x4xf32, #tpu.memory_space<smem>>
    %c7_52 = arith.constant 7 : index
    %c2_53 = arith.constant 2 : index
    %30 = memref.load %arg3[%c7_52, %c2_53] : memref<8x4xf32, #tpu.memory_space<smem>>
    %c7_54 = arith.constant 7 : index
    %c3_55 = arith.constant 3 : index
    %31 = memref.load %arg3[%c7_54, %c3_55] : memref<8x4xf32, #tpu.memory_space<smem>>
    %c0_i32 = arith.constant 0 : i32
    %32 = arith.cmpi eq, %arg1, %c0_i32 : i32
    %33 = arith.extui %32 : i1 to i32
    %c0_i32_56 = arith.constant 0 : i32
    %34 = arith.cmpi ne, %33, %c0_i32_56 : i32
    scf.if %34 {
      %cst_148 = arith.constant 0.000000e+00 : f32
      %241 = vector.broadcast %cst_148 : f32 to vector<8x128xf32>
      %c0_149 = arith.constant 0 : index
      %c0_150 = arith.constant 0 : index
      %c0_151 = arith.constant 0 : index
      %242 = vector.load %arg5[%c0_149, %c0_150, %c0_151] : memref<1x8x128xf32, #tpu.memory_space<vmem>>, vector<1x8x128xf32>
      %243 = vector.shape_cast %242 : vector<1x8x128xf32> to vector<8x128xf32>
      %244 = vector.shape_cast %241 : vector<8x128xf32> to vector<1x8x128xf32>
      tpu.vector_store %arg5[%c0_149, %c0_150, %c0_151], %244 {strides = array<i32>} : memref<1x8x128xf32, #tpu.memory_space<vmem>>, vector<1x8x128xf32>,
      %cst_152 = arith.constant 0.000000e+00 : f32
      %245 = vector.broadcast %cst_152 : f32 to vector<8x128xf32>
      %c0_153 = arith.constant 0 : index
      %c0_154 = arith.constant 0 : index
      %c0_155 = arith.constant 0 : index
      %246 = vector.load %arg6[%c0_153, %c0_154, %c0_155] : memref<1x8x128xf32, #tpu.memory_space<vmem>>, vector<1x8x128xf32>
      %247 = vector.shape_cast %246 : vector<1x8x128xf32> to vector<8x128xf32>
      %248 = vector.shape_cast %245 : vector<8x128xf32> to vector<1x8x128xf32>
      tpu.vector_store %arg6[%c0_153, %c0_154, %c0_155], %248 {strides = array<i32>} : memref<1x8x128xf32, #tpu.memory_space<vmem>>, vector<1x8x128xf32>,
    } else {
    }
    %cst = arith.constant 0.000000e+00 : f32
    %35 = vector.broadcast %cst : f32 to vector<1x128xf32>
    %cst_57 = arith.constant 0.000000e+00 : f32
    %36 = vector.broadcast %cst_57 : f32 to vector<1x128xf32>
    %cst_58 = arith.constant 0.000000e+00 : f32
    %37 = vector.broadcast %cst_58 : f32 to vector<1x128xf32>
    %cst_59 = arith.constant 0.000000e+00 : f32
    %38 = vector.broadcast %cst_59 : f32 to vector<1x128xf32>
    %cst_60 = arith.constant 0.000000e+00 : f32
    %39 = vector.broadcast %cst_60 : f32 to vector<1x128xf32>
    %cst_61 = arith.constant 0.000000e+00 : f32
    %40 = vector.broadcast %cst_61 : f32 to vector<1x128xf32>
    %cst_62 = arith.constant 0.000000e+00 : f32
    %41 = vector.broadcast %cst_62 : f32 to vector<1x128xf32>
    %cst_63 = arith.constant 0.000000e+00 : f32
    %42 = vector.broadcast %cst_63 : f32 to vector<1x128xf32>
    %cst_64 = arith.constant 0.000000e+00 : f32
    %43 = vector.broadcast %cst_64 : f32 to vector<1x128xf32>
    %cst_65 = arith.constant 0.000000e+00 : f32
    %44 = vector.broadcast %cst_65 : f32 to vector<1x128xf32>
    %cst_66 = arith.constant 0.000000e+00 : f32
    %45 = vector.broadcast %cst_66 : f32 to vector<1x128xf32>
    %cst_67 = arith.constant 0.000000e+00 : f32
    %46 = vector.broadcast %cst_67 : f32 to vector<1x128xf32>
    %cst_68 = arith.constant 0.000000e+00 : f32
    %47 = vector.broadcast %cst_68 : f32 to vector<1x128xf32>
    %cst_69 = arith.constant 0.000000e+00 : f32
    %48 = vector.broadcast %cst_69 : f32 to vector<1x128xf32>
    %cst_70 = arith.constant 0.000000e+00 : f32
    %49 = vector.broadcast %cst_70 : f32 to vector<1x128xf32>
    %cst_71 = arith.constant 0.000000e+00 : f32
    %50 = vector.broadcast %cst_71 : f32 to vector<1x128xf32>
    %c0_72 = arith.constant 0 : index
    %c0_73 = arith.constant 0 : index
    %c0_74 = arith.constant 0 : index
    %c0_75 = arith.constant 0 : index
    %51 = vector.load %arg2[%c0_72, %c0_73, %c0_74, %c0_75] : memref<1x4x2x128xf32, #tpu.memory_space<vmem>>, vector<1x1x2x128xf32>
    %52 = vector.shape_cast %51 : vector<1x1x2x128xf32> to vector<2x128xf32>
    %c0_76 = arith.constant 0 : index
    %c1_77 = arith.constant 1 : index
    %c0_78 = arith.constant 0 : index
    %c0_79 = arith.constant 0 : index
    %53 = vector.load %arg2[%c0_76, %c1_77, %c0_78, %c0_79] : memref<1x4x2x128xf32, #tpu.memory_space<vmem>>, vector<1x1x2x128xf32>
    %54 = vector.shape_cast %53 : vector<1x1x2x128xf32> to vector<2x128xf32>
    %c0_80 = arith.constant 0 : index
    %c2_81 = arith.constant 2 : index
    %c0_82 = arith.constant 0 : index
    %c0_83 = arith.constant 0 : index
    %55 = vector.load %arg2[%c0_80, %c2_81, %c0_82, %c0_83] : memref<1x4x2x128xf32, #tpu.memory_space<vmem>>, vector<1x1x2x128xf32>
    %56 = vector.shape_cast %55 : vector<1x1x2x128xf32> to vector<2x128xf32>
    %c0_84 = arith.constant 0 : index
    %c3_85 = arith.constant 3 : index
    %c0_86 = arith.constant 0 : index
    %c0_87 = arith.constant 0 : index
    %57 = vector.load %arg2[%c0_84, %c3_85, %c0_86, %c0_87] : memref<1x4x2x128xf32, #tpu.memory_space<vmem>>, vector<1x1x2x128xf32>
    %58 = vector.shape_cast %57 : vector<1x1x2x128xf32> to vector<2x128xf32>
    %59 = vector.broadcast %0 : f32 to vector<2x128xf32>
    %60 = arith.addf %52, %59 : vector<2x128xf32>
    %61 = vector.broadcast %1 : f32 to vector<2x128xf32>
    %62 = arith.addf %54, %61 : vector<2x128xf32>
    %63 = arith.maximumf %60, %62 : vector<2x128xf32>
    %64 = vector.broadcast %2 : f32 to vector<2x128xf32>
    %65 = arith.addf %56, %64 : vector<2x128xf32>
    %66 = arith.maximumf %63, %65 : vector<2x128xf32>
    %67 = vector.broadcast %3 : f32 to vector<2x128xf32>
    %68 = arith.addf %58, %67 : vector<2x128xf32>
    %69 = arith.maximumf %66, %68 : vector<2x128xf32>
    %c0_88 = arith.constant 0 : index
    %c0_89 = arith.constant 0 : index
    %c0_90 = arith.constant 0 : index
    %c0_91 = arith.constant 0 : index
    %70 = vector.load %arg4[%c0_88, %c0_89, %c0_90, %c0_91] : memref<1x8x2x128xf32, #tpu.memory_space<vmem>>, vector<1x1x2x128xf32>
    %71 = vector.shape_cast %70 : vector<1x1x2x128xf32> to vector<2x128xf32>
    %72 = vector.shape_cast %69 : vector<2x128xf32> to vector<1x1x2x128xf32>
    tpu.vector_store %arg4[%c0_88, %c0_89, %c0_90, %c0_91], %72 {strides = array<i32>} : memref<1x8x2x128xf32, #tpu.memory_space<vmem>>, vector<1x1x2x128xf32>,
    %cst_92 = arith.constant dense<0.000000e+00> : vector<128xf32>
    %73 = vector.multi_reduction <add>, %69, %cst_92 [0] : vector<2x128xf32> to vector<128xf32>
    %74 = vector.shape_cast %73 : vector<128xf32> to vector<1x128xf32>
    %75 = arith.addf %35, %74 : vector<1x128xf32>
    %76 = arith.mulf %69, %69 : vector<2x128xf32>
    %cst_93 = arith.constant dense<0.000000e+00> : vector<128xf32>
    %77 = vector.multi_reduction <add>, %76, %cst_93 [0] : vector<2x128xf32> to vector<128xf32>
    %78 = vector.shape_cast %77 : vector<128xf32> to vector<1x128xf32>
    %79 = arith.addf %43, %78 : vector<1x128xf32>
    %80 = vector.broadcast %4 : f32 to vector<2x128xf32>
    %81 = arith.addf %52, %80 : vector<2x128xf32>
    %82 = vector.broadcast %5 : f32 to vector<2x128xf32>
    %83 = arith.addf %54, %82 : vector<2x128xf32>
    %84 = arith.maximumf %81, %83 : vector<2x128xf32>
    %85 = vector.broadcast %6 : f32 to vector<2x128xf32>
    %86 = arith.addf %56, %85 : vector<2x128xf32>
    %87 = arith.maximumf %84, %86 : vector<2x128xf32>
    %88 = vector.broadcast %7 : f32 to vector<2x128xf32>
    %89 = arith.addf %58, %88 : vector<2x128xf32>
    %90 = arith.maximumf %87, %89 : vector<2x128xf32>
    %c0_94 = arith.constant 0 : index
    %c1_95 = arith.constant 1 : index
    %c0_96 = arith.constant 0 : index
    %c0_97 = arith.constant 0 : index
    %91 = vector.load %arg4[%c0_94, %c1_95, %c0_96, %c0_97] : memref<1x8x2x128xf32, #tpu.memory_space<vmem>>, vector<1x1x2x128xf32>
    %92 = vector.shape_cast %91 : vector<1x1x2x128xf32> to vector<2x128xf32>
    %93 = vector.shape_cast %90 : vector<2x128xf32> to vector<1x1x2x128xf32>
    tpu.vector_store %arg4[%c0_94, %c1_95, %c0_96, %c0_97], %93 {strides = array<i32>} : memref<1x8x2x128xf32, #tpu.memory_space<vmem>>, vector<1x1x2x128xf32>,
    %cst_98 = arith.constant dense<0.000000e+00> : vector<128xf32>
    %94 = vector.multi_reduction <add>, %90, %cst_98 [0] : vector<2x128xf32> to vector<128xf32>
    %95 = vector.shape_cast %94 : vector<128xf32> to vector<1x128xf32>
    %96 = arith.addf %36, %95 : vector<1x128xf32>
    %97 = arith.mulf %90, %90 : vector<2x128xf32>
    %cst_99 = arith.constant dense<0.000000e+00> : vector<128xf32>
    %98 = vector.multi_reduction <add>, %97, %cst_99 [0] : vector<2x128xf32> to vector<128xf32>
    %99 = vector.shape_cast %98 : vector<128xf32> to vector<1x128xf32>
    %100 = arith.addf %44, %99 : vector<1x128xf32>
    %101 = vector.broadcast %8 : f32 to vector<2x128xf32>
    %102 = arith.addf %52, %101 : vector<2x128xf32>
    %103 = vector.broadcast %9 : f32 to vector<2x128xf32>
    %104 = arith.addf %54, %103 : vector<2x128xf32>
    %105 = arith.maximumf %102, %104 : vector<2x128xf32>
    %106 = vector.broadcast %10 : f32 to vector<2x128xf32>
    %107 = arith.addf %56, %106 : vector<2x128xf32>
    %108 = arith.maximumf %105, %107 : vector<2x128xf32>
    %109 = vector.broadcast %11 : f32 to vector<2x128xf32>
    %110 = arith.addf %58, %109 : vector<2x128xf32>
    %111 = arith.maximumf %108, %110 : vector<2x128xf32>
    %c0_100 = arith.constant 0 : index
    %c2_101 = arith.constant 2 : index
    %c0_102 = arith.constant 0 : index
    %c0_103 = arith.constant 0 : index
    %112 = vector.load %arg4[%c0_100, %c2_101, %c0_102, %c0_103] : memref<1x8x2x128xf32, #tpu.memory_space<vmem>>, vector<1x1x2x128xf32>
    %113 = vector.shape_cast %112 : vector<1x1x2x128xf32> to vector<2x128xf32>
    %114 = vector.shape_cast %111 : vector<2x128xf32> to vector<1x1x2x128xf32>
    tpu.vector_store %arg4[%c0_100, %c2_101, %c0_102, %c0_103], %114 {strides = array<i32>} : memref<1x8x2x128xf32, #tpu.memory_space<vmem>>, vector<1x1x2x128xf32>,
    %cst_104 = arith.constant dense<0.000000e+00> : vector<128xf32>
    %115 = vector.multi_reduction <add>, %111, %cst_104 [0] : vector<2x128xf32> to vector<128xf32>
    %116 = vector.shape_cast %115 : vector<128xf32> to vector<1x128xf32>
    %117 = arith.addf %37, %116 : vector<1x128xf32>
    %118 = arith.mulf %111, %111 : vector<2x128xf32>
    %cst_105 = arith.constant dense<0.000000e+00> : vector<128xf32>
    %119 = vector.multi_reduction <add>, %118, %cst_105 [0] : vector<2x128xf32> to vector<128xf32>
    %120 = vector.shape_cast %119 : vector<128xf32> to vector<1x128xf32>
    %121 = arith.addf %45, %120 : vector<1x128xf32>
    %122 = vector.broadcast %12 : f32 to vector<2x128xf32>
    %123 = arith.addf %52, %122 : vector<2x128xf32>
    %124 = vector.broadcast %13 : f32 to vector<2x128xf32>
    %125 = arith.addf %54, %124 : vector<2x128xf32>
    %126 = arith.maximumf %123, %125 : vector<2x128xf32>
    %127 = vector.broadcast %14 : f32 to vector<2x128xf32>
    %128 = arith.addf %56, %127 : vector<2x128xf32>
    %129 = arith.maximumf %126, %128 : vector<2x128xf32>
    %130 = vector.broadcast %15 : f32 to vector<2x128xf32>
    %131 = arith.addf %58, %130 : vector<2x128xf32>
    %132 = arith.maximumf %129, %131 : vector<2x128xf32>
    %c0_106 = arith.constant 0 : index
    %c3_107 = arith.constant 3 : index
    %c0_108 = arith.constant 0 : index
    %c0_109 = arith.constant 0 : index
    %133 = vector.load %arg4[%c0_106, %c3_107, %c0_108, %c0_109] : memref<1x8x2x128xf32, #tpu.memory_space<vmem>>, vector<1x1x2x128xf32>
    %134 = vector.shape_cast %133 : vector<1x1x2x128xf32> to vector<2x128xf32>
    %135 = vector.shape_cast %132 : vector<2x128xf32> to vector<1x1x2x128xf32>
    tpu.vector_store %arg4[%c0_106, %c3_107, %c0_108, %c0_109], %135 {strides = array<i32>} : memref<1x8x2x128xf32, #tpu.memory_space<vmem>>, vector<1x1x2x128xf32>,
    %cst_110 = arith.constant dense<0.000000e+00> : vector<128xf32>
    %136 = vector.multi_reduction <add>, %132, %cst_110 [0] : vector<2x128xf32> to vector<128xf32>
    %137 = vector.shape_cast %136 : vector<128xf32> to vector<1x128xf32>
    %138 = arith.addf %38, %137 : vector<1x128xf32>
    %139 = arith.mulf %132, %132 : vector<2x128xf32>
    %cst_111 = arith.constant dense<0.000000e+00> : vector<128xf32>
    %140 = vector.multi_reduction <add>, %139, %cst_111 [0] : vector<2x128xf32> to vector<128xf32>
    %141 = vector.shape_cast %140 : vector<128xf32> to vector<1x128xf32>
    %142 = arith.addf %46, %141 : vector<1x128xf32>
    %143 = vector.broadcast %16 : f32 to vector<2x128xf32>
    %144 = arith.addf %52, %143 : vector<2x128xf32>
    %145 = vector.broadcast %17 : f32 to vector<2x128xf32>
    %146 = arith.addf %54, %145 : vector<2x128xf32>
    %147 = arith.maximumf %144, %146 : vector<2x128xf32>
    %148 = vector.broadcast %18 : f32 to vector<2x128xf32>
    %149 = arith.addf %56, %148 : vector<2x128xf32>
    %150 = arith.maximumf %147, %149 : vector<2x128xf32>
    %151 = vector.broadcast %19 : f32 to vector<2x128xf32>
    %152 = arith.addf %58, %151 : vector<2x128xf32>
    %153 = arith.maximumf %150, %152 : vector<2x128xf32>
    %c0_112 = arith.constant 0 : index
    %c4_113 = arith.constant 4 : index
    %c0_114 = arith.constant 0 : index
    %c0_115 = arith.constant 0 : index
    %154 = vector.load %arg4[%c0_112, %c4_113, %c0_114, %c0_115] : memref<1x8x2x128xf32, #tpu.memory_space<vmem>>, vector<1x1x2x128xf32>
    %155 = vector.shape_cast %154 : vector<1x1x2x128xf32> to vector<2x128xf32>
    %156 = vector.shape_cast %153 : vector<2x128xf32> to vector<1x1x2x128xf32>
    tpu.vector_store %arg4[%c0_112, %c4_113, %c0_114, %c0_115], %156 {strides = array<i32>} : memref<1x8x2x128xf32, #tpu.memory_space<vmem>>, vector<1x1x2x128xf32>,
    %cst_116 = arith.constant dense<0.000000e+00> : vector<128xf32>
    %157 = vector.multi_reduction <add>, %153, %cst_116 [0] : vector<2x128xf32> to vector<128xf32>
    %158 = vector.shape_cast %157 : vector<128xf32> to vector<1x128xf32>
    %159 = arith.addf %39, %158 : vector<1x128xf32>
    %160 = arith.mulf %153, %153 : vector<2x128xf32>
    %cst_117 = arith.constant dense<0.000000e+00> : vector<128xf32>
    %161 = vector.multi_reduction <add>, %160, %cst_117 [0] : vector<2x128xf32> to vector<128xf32>
    %162 = vector.shape_cast %161 : vector<128xf32> to vector<1x128xf32>
    %163 = arith.addf %47, %162 : vector<1x128xf32>
    %164 = vector.broadcast %20 : f32 to vector<2x128xf32>
    %165 = arith.addf %52, %164 : vector<2x128xf32>
    %166 = vector.broadcast %21 : f32 to vector<2x128xf32>
    %167 = arith.addf %54, %166 : vector<2x128xf32>
    %168 = arith.maximumf %165, %167 : vector<2x128xf32>
    %169 = vector.broadcast %22 : f32 to vector<2x128xf32>
    %170 = arith.addf %56, %169 : vector<2x128xf32>
    %171 = arith.maximumf %168, %170 : vector<2x128xf32>
    %172 = vector.broadcast %23 : f32 to vector<2x128xf32>
    %173 = arith.addf %58, %172 : vector<2x128xf32>
    %174 = arith.maximumf %171, %173 : vector<2x128xf32>
    %c0_118 = arith.constant 0 : index
    %c5_119 = arith.constant 5 : index
    %c0_120 = arith.constant 0 : index
    %c0_121 = arith.constant 0 : index
    %175 = vector.load %arg4[%c0_118, %c5_119, %c0_120, %c0_121] : memref<1x8x2x128xf32, #tpu.memory_space<vmem>>, vector<1x1x2x128xf32>
    %176 = vector.shape_cast %175 : vector<1x1x2x128xf32> to vector<2x128xf32>
    %177 = vector.shape_cast %174 : vector<2x128xf32> to vector<1x1x2x128xf32>
    tpu.vector_store %arg4[%c0_118, %c5_119, %c0_120, %c0_121], %177 {strides = array<i32>} : memref<1x8x2x128xf32, #tpu.memory_space<vmem>>, vector<1x1x2x128xf32>,
    %cst_122 = arith.constant dense<0.000000e+00> : vector<128xf32>
    %178 = vector.multi_reduction <add>, %174, %cst_122 [0] : vector<2x128xf32> to vector<128xf32>
    %179 = vector.shape_cast %178 : vector<128xf32> to vector<1x128xf32>
    %180 = arith.addf %40, %179 : vector<1x128xf32>
    %181 = arith.mulf %174, %174 : vector<2x128xf32>
    %cst_123 = arith.constant dense<0.000000e+00> : vector<128xf32>
    %182 = vector.multi_reduction <add>, %181, %cst_123 [0] : vector<2x128xf32> to vector<128xf32>
    %183 = vector.shape_cast %182 : vector<128xf32> to vector<1x128xf32>
    %184 = arith.addf %48, %183 : vector<1x128xf32>
    %185 = vector.broadcast %24 : f32 to vector<2x128xf32>
    %186 = arith.addf %52, %185 : vector<2x128xf32>
    %187 = vector.broadcast %25 : f32 to vector<2x128xf32>
    %188 = arith.addf %54, %187 : vector<2x128xf32>
    %189 = arith.maximumf %186, %188 : vector<2x128xf32>
    %190 = vector.broadcast %26 : f32 to vector<2x128xf32>
    %191 = arith.addf %56, %190 : vector<2x128xf32>
    %192 = arith.maximumf %189, %191 : vector<2x128xf32>
    %193 = vector.broadcast %27 : f32 to vector<2x128xf32>
    %194 = arith.addf %58, %193 : vector<2x128xf32>
    %195 = arith.maximumf %192, %194 : vector<2x128xf32>
    %c0_124 = arith.constant 0 : index
    %c6_125 = arith.constant 6 : index
    %c0_126 = arith.constant 0 : index
    %c0_127 = arith.constant 0 : index
    %196 = vector.load %arg4[%c0_124, %c6_125, %c0_126, %c0_127] : memref<1x8x2x128xf32, #tpu.memory_space<vmem>>, vector<1x1x2x128xf32>
    %197 = vector.shape_cast %196 : vector<1x1x2x128xf32> to vector<2x128xf32>
    %198 = vector.shape_cast %195 : vector<2x128xf32> to vector<1x1x2x128xf32>
    tpu.vector_store %arg4[%c0_124, %c6_125, %c0_126, %c0_127], %198 {strides = array<i32>} : memref<1x8x2x128xf32, #tpu.memory_space<vmem>>, vector<1x1x2x128xf32>,
    %cst_128 = arith.constant dense<0.000000e+00> : vector<128xf32>
    %199 = vector.multi_reduction <add>, %195, %cst_128 [0] : vector<2x128xf32> to vector<128xf32>
    %200 = vector.shape_cast %199 : vector<128xf32> to vector<1x128xf32>
    %201 = arith.addf %41, %200 : vector<1x128xf32>
    %202 = arith.mulf %195, %195 : vector<2x128xf32>
    %cst_129 = arith.constant dense<0.000000e+00> : vector<128xf32>
    %203 = vector.multi_reduction <add>, %202, %cst_129 [0] : vector<2x128xf32> to vector<128xf32>
    %204 = vector.shape_cast %203 : vector<128xf32> to vector<1x128xf32>
    %205 = arith.addf %49, %204 : vector<1x128xf32>
    %206 = vector.broadcast %28 : f32 to vector<2x128xf32>
    %207 = arith.addf %52, %206 : vector<2x128xf32>
    %208 = vector.broadcast %29 : f32 to vector<2x128xf32>
    %209 = arith.addf %54, %208 : vector<2x128xf32>
    %210 = arith.maximumf %207, %209 : vector<2x128xf32>
    %211 = vector.broadcast %30 : f32 to vector<2x128xf32>
    %212 = arith.addf %56, %211 : vector<2x128xf32>
    %213 = arith.maximumf %210, %212 : vector<2x128xf32>
    %214 = vector.broadcast %31 : f32 to vector<2x128xf32>
    %215 = arith.addf %58, %214 : vector<2x128xf32>
    %216 = arith.maximumf %213, %215 : vector<2x128xf32>
    %c0_130 = arith.constant 0 : index
    %c7_131 = arith.constant 7 : index
    %c0_132 = arith.constant 0 : index
    %c0_133 = arith.constant 0 : index
    %217 = vector.load %arg4[%c0_130, %c7_131, %c0_132, %c0_133] : memref<1x8x2x128xf32, #tpu.memory_space<vmem>>, vector<1x1x2x128xf32>
    %218 = vector.shape_cast %217 : vector<1x1x2x128xf32> to vector<2x128xf32>
    %219 = vector.shape_cast %216 : vector<2x128xf32> to vector<1x1x2x128xf32>
    tpu.vector_store %arg4[%c0_130, %c7_131, %c0_132, %c0_133], %219 {strides = array<i32>} : memref<1x8x2x128xf32, #tpu.memory_space<vmem>>, vector<1x1x2x128xf32>,
    %cst_134 = arith.constant dense<0.000000e+00> : vector<128xf32>
    %220 = vector.multi_reduction <add>, %216, %cst_134 [0] : vector<2x128xf32> to vector<128xf32>
    %221 = vector.shape_cast %220 : vector<128xf32> to vector<1x128xf32>
    %222 = arith.addf %42, %221 : vector<1x128xf32>
    %223 = arith.mulf %216, %216 : vector<2x128xf32>
    %cst_135 = arith.constant dense<0.000000e+00> : vector<128xf32>
    %224 = vector.multi_reduction <add>, %223, %cst_135 [0] : vector<2x128xf32> to vector<128xf32>
    %225 = vector.shape_cast %224 : vector<128xf32> to vector<1x128xf32>
    %226 = arith.addf %50, %225 : vector<1x128xf32>
    %c0_136 = arith.constant 0 : index
    %c0_137 = arith.constant 0 : index
    %c0_138 = arith.constant 0 : index
    %227 = vector.load %arg5[%c0_136, %c0_137, %c0_138] : memref<1x8x128xf32, #tpu.memory_space<vmem>>, vector<1x8x128xf32>
    %228 = vector.shape_cast %227 : vector<1x8x128xf32> to vector<8x128xf32>
    %229 = tpu.concatenate %75, %96, %117, %138, %159, %180, %201, %222 in 0 : vector<1x128xf32>, vector<1x128xf32>, vector<1x128xf32>, vector<1x128xf32>, vector<1x128xf32>, vector<1x128xf32>, vector<1x128xf32>, vector<1x128xf32> -> vector<8x128xf32>
    %230 = arith.addf %228, %229 : vector<8x128xf32>
    %c0_139 = arith.constant 0 : index
    %c0_140 = arith.constant 0 : index
    %c0_141 = arith.constant 0 : index
    %231 = vector.load %arg5[%c0_139, %c0_140, %c0_141] : memref<1x8x128xf32, #tpu.memory_space<vmem>>, vector<1x8x128xf32>
    %232 = vector.shape_cast %231 : vector<1x8x128xf32> to vector<8x128xf32>
    %233 = vector.shape_cast %230 : vector<8x128xf32> to vector<1x8x128xf32>
    tpu.vector_store %arg5[%c0_139, %c0_140, %c0_141], %233 {strides = array<i32>} : memref<1x8x128xf32, #tpu.memory_space<vmem>>, vector<1x8x128xf32>,
    %c0_142 = arith.constant 0 : index
    %c0_143 = arith.constant 0 : index
    %c0_144 = arith.constant 0 : index
    %234 = vector.load %arg6[%c0_142, %c0_143, %c0_144] : memref<1x8x128xf32, #tpu.memory_space<vmem>>, vector<1x8x128xf32>
    %235 = vector.shape_cast %234 : vector<1x8x128xf32> to vector<8x128xf32>
    %236 = tpu.concatenate %79, %100, %121, %142, %163, %184, %205, %226 in 0 : vector<1x128xf32>, vector<1x128xf32>, vector<1x128xf32>, vector<1x128xf32>, vector<1x128xf32>, vector<1x128xf32>, vector<1x128xf32>, vector<1x128xf32> -> vector<8x128xf32>
    %237 = arith.addf %235, %236 : vector<8x128xf32>
    %c0_145 = arith.constant 0 : index
    %c0_146 = arith.constant 0 : index
    %c0_147 = arith.constant 0 : index
    %238 = vector.load %arg6[%c0_145, %c0_146, %c0_147] : memref<1x8x128xf32, #tpu.memory_space<vmem>>, vector<1x8x128xf32>
    %239 = vector.shape_cast %238 : vector<1x8x128xf32> to vector<8x128xf32>
    %240 = vector.shape_cast %237 : vector<8x128xf32> to vector<1x8x128xf32>
    tpu.vector_store %arg6[%c0_145, %c0_146, %c0_147], %240 {strides = array<i32>} : memref<1x8x128xf32, #tpu.memory_space<vmem>>, vector<1x8x128xf32>,
    return
  }
  func.func @transform_0(%arg0: i32, %arg1: i32) -> (i32, i32, i32, i32) {
    %c0_i32 = arith.constant 0 : i32
    %c0_i32_0 = arith.constant 0 : i32
    %c0_i32_1 = arith.constant 0 : i32
    return %arg0, %c0_i32, %arg1, %c0_i32_0 : i32, i32, i32, i32
  }
  func.func @transform_1(%arg0: i32, %arg1: i32) -> (i32, i32) {
    %c0_i32 = arith.constant 0 : i32
    %c0_i32_0 = arith.constant 0 : i32
    %c0_i32_1 = arith.constant 0 : i32
    return %c0_i32, %c0_i32_0 : i32, i32
  }
  func.func @transform_2(%arg0: i32, %arg1: i32) -> (i32, i32, i32, i32) {
    %c0_i32 = arith.constant 0 : i32
    %c0_i32_0 = arith.constant 0 : i32
    %c0_i32_1 = arith.constant 0 : i32
    return %arg0, %c0_i32, %arg1, %c0_i32_0 : i32, i32, i32, i32
  }
  func.func @transform_3(%arg0: i32, %arg1: i32) -> (i32, i32, i32) {
    %c0_i32 = arith.constant 0 : i32
    %c0_i32_0 = arith.constant 0 : i32
    %c0_i32_1 = arith.constant 0 : i32
    return %arg0, %c0_i32, %c0_i32_0 : i32, i32, i32
  }
  func.func @transform_4(%arg0: i32, %arg1: i32) -> (i32, i32, i32) {
    %c0_i32 = arith.constant 0 : i32
    %c0_i32_0 = arith.constant 0 : i32
    %c0_i32_1 = arith.constant 0 : i32
    return %arg0, %c0_i32, %c0_i32_0 : i32, i32, i32
  }
}

module attributes {stable_mosaic.version = 11 : i64} {
  func.func @kernel(%arg0: i32, %arg1: i32, %arg2: memref<1x8x2x128xf32, #tpu.memory_space<vmem>>, %arg3: memref<2x8xf32, #tpu.memory_space<smem>>, %arg4: memref<4x8xf32, #tpu.memory_space<smem>>, %arg5: memref<1x4x2x128xf32, #tpu.memory_space<vmem>>, %arg6: memref<1x4x128xf32, #tpu.memory_space<vmem>>, %arg7: memref<1x4x128xf32, #tpu.memory_space<vmem>>) attributes {dimension_semantics = [#tpu.dimension_semantics<parallel>, #tpu.dimension_semantics<arbitrary>], iteration_bounds = array<i64: 2, 1>, scalar_prefetch = 0 : i64, scratch_operands = 0 : i64, tpu.core_type = #tpu.core_type<tc>, window_params = [{transform_indices = @transform_0, window_bounds = array<i64: 1, 8, 2, 128>}, {transform_indices = @transform_1, window_bounds = array<i64: 2, 8>}, {transform_indices = @transform_2, window_bounds = array<i64: 4, 8>}, {transform_indices = @transform_3, window_bounds = array<i64: 1, 4, 2, 128>}, {transform_indices = @transform_4, window_bounds = array<i64: 1, 4, 128>}, {transform_indices = @transform_5, window_bounds = array<i64: 1, 4, 128>}]} {
    %c0 = arith.constant 0 : index
    %c0_0 = arith.constant 0 : index
    %0 = memref.load %arg3[%c0, %c0_0] : memref<2x8xf32, #tpu.memory_space<smem>>
    %c0_1 = arith.constant 0 : index
    %c1 = arith.constant 1 : index
    %1 = memref.load %arg3[%c0_1, %c1] : memref<2x8xf32, #tpu.memory_space<smem>>
    %c0_2 = arith.constant 0 : index
    %c2 = arith.constant 2 : index
    %2 = memref.load %arg3[%c0_2, %c2] : memref<2x8xf32, #tpu.memory_space<smem>>
    %c0_3 = arith.constant 0 : index
    %c3 = arith.constant 3 : index
    %3 = memref.load %arg3[%c0_3, %c3] : memref<2x8xf32, #tpu.memory_space<smem>>
    %c0_4 = arith.constant 0 : index
    %c4 = arith.constant 4 : index
    %4 = memref.load %arg3[%c0_4, %c4] : memref<2x8xf32, #tpu.memory_space<smem>>
    %c0_5 = arith.constant 0 : index
    %c5 = arith.constant 5 : index
    %5 = memref.load %arg3[%c0_5, %c5] : memref<2x8xf32, #tpu.memory_space<smem>>
    %c0_6 = arith.constant 0 : index
    %c6 = arith.constant 6 : index
    %6 = memref.load %arg3[%c0_6, %c6] : memref<2x8xf32, #tpu.memory_space<smem>>
    %c0_7 = arith.constant 0 : index
    %c7 = arith.constant 7 : index
    %7 = memref.load %arg3[%c0_7, %c7] : memref<2x8xf32, #tpu.memory_space<smem>>
    %c1_8 = arith.constant 1 : index
    %c0_9 = arith.constant 0 : index
    %8 = memref.load %arg3[%c1_8, %c0_9] : memref<2x8xf32, #tpu.memory_space<smem>>
    %c1_10 = arith.constant 1 : index
    %c1_11 = arith.constant 1 : index
    %9 = memref.load %arg3[%c1_10, %c1_11] : memref<2x8xf32, #tpu.memory_space<smem>>
    %c1_12 = arith.constant 1 : index
    %c2_13 = arith.constant 2 : index
    %10 = memref.load %arg3[%c1_12, %c2_13] : memref<2x8xf32, #tpu.memory_space<smem>>
    %c1_14 = arith.constant 1 : index
    %c3_15 = arith.constant 3 : index
    %11 = memref.load %arg3[%c1_14, %c3_15] : memref<2x8xf32, #tpu.memory_space<smem>>
    %c1_16 = arith.constant 1 : index
    %c4_17 = arith.constant 4 : index
    %12 = memref.load %arg3[%c1_16, %c4_17] : memref<2x8xf32, #tpu.memory_space<smem>>
    %c1_18 = arith.constant 1 : index
    %c5_19 = arith.constant 5 : index
    %13 = memref.load %arg3[%c1_18, %c5_19] : memref<2x8xf32, #tpu.memory_space<smem>>
    %c1_20 = arith.constant 1 : index
    %c6_21 = arith.constant 6 : index
    %14 = memref.load %arg3[%c1_20, %c6_21] : memref<2x8xf32, #tpu.memory_space<smem>>
    %c1_22 = arith.constant 1 : index
    %c7_23 = arith.constant 7 : index
    %15 = memref.load %arg3[%c1_22, %c7_23] : memref<2x8xf32, #tpu.memory_space<smem>>
    %c0_24 = arith.constant 0 : index
    %c0_25 = arith.constant 0 : index
    %16 = memref.load %arg4[%c0_24, %c0_25] : memref<4x8xf32, #tpu.memory_space<smem>>
    %c0_26 = arith.constant 0 : index
    %c1_27 = arith.constant 1 : index
    %17 = memref.load %arg4[%c0_26, %c1_27] : memref<4x8xf32, #tpu.memory_space<smem>>
    %c0_28 = arith.constant 0 : index
    %c2_29 = arith.constant 2 : index
    %18 = memref.load %arg4[%c0_28, %c2_29] : memref<4x8xf32, #tpu.memory_space<smem>>
    %c0_30 = arith.constant 0 : index
    %c3_31 = arith.constant 3 : index
    %19 = memref.load %arg4[%c0_30, %c3_31] : memref<4x8xf32, #tpu.memory_space<smem>>
    %c0_32 = arith.constant 0 : index
    %c4_33 = arith.constant 4 : index
    %20 = memref.load %arg4[%c0_32, %c4_33] : memref<4x8xf32, #tpu.memory_space<smem>>
    %c0_34 = arith.constant 0 : index
    %c5_35 = arith.constant 5 : index
    %21 = memref.load %arg4[%c0_34, %c5_35] : memref<4x8xf32, #tpu.memory_space<smem>>
    %c0_36 = arith.constant 0 : index
    %c6_37 = arith.constant 6 : index
    %22 = memref.load %arg4[%c0_36, %c6_37] : memref<4x8xf32, #tpu.memory_space<smem>>
    %c0_38 = arith.constant 0 : index
    %c7_39 = arith.constant 7 : index
    %23 = memref.load %arg4[%c0_38, %c7_39] : memref<4x8xf32, #tpu.memory_space<smem>>
    %c1_40 = arith.constant 1 : index
    %c0_41 = arith.constant 0 : index
    %24 = memref.load %arg4[%c1_40, %c0_41] : memref<4x8xf32, #tpu.memory_space<smem>>
    %c1_42 = arith.constant 1 : index
    %c1_43 = arith.constant 1 : index
    %25 = memref.load %arg4[%c1_42, %c1_43] : memref<4x8xf32, #tpu.memory_space<smem>>
    %c1_44 = arith.constant 1 : index
    %c2_45 = arith.constant 2 : index
    %26 = memref.load %arg4[%c1_44, %c2_45] : memref<4x8xf32, #tpu.memory_space<smem>>
    %c1_46 = arith.constant 1 : index
    %c3_47 = arith.constant 3 : index
    %27 = memref.load %arg4[%c1_46, %c3_47] : memref<4x8xf32, #tpu.memory_space<smem>>
    %c1_48 = arith.constant 1 : index
    %c4_49 = arith.constant 4 : index
    %28 = memref.load %arg4[%c1_48, %c4_49] : memref<4x8xf32, #tpu.memory_space<smem>>
    %c1_50 = arith.constant 1 : index
    %c5_51 = arith.constant 5 : index
    %29 = memref.load %arg4[%c1_50, %c5_51] : memref<4x8xf32, #tpu.memory_space<smem>>
    %c1_52 = arith.constant 1 : index
    %c6_53 = arith.constant 6 : index
    %30 = memref.load %arg4[%c1_52, %c6_53] : memref<4x8xf32, #tpu.memory_space<smem>>
    %c1_54 = arith.constant 1 : index
    %c7_55 = arith.constant 7 : index
    %31 = memref.load %arg4[%c1_54, %c7_55] : memref<4x8xf32, #tpu.memory_space<smem>>
    %c2_56 = arith.constant 2 : index
    %c0_57 = arith.constant 0 : index
    %32 = memref.load %arg4[%c2_56, %c0_57] : memref<4x8xf32, #tpu.memory_space<smem>>
    %c2_58 = arith.constant 2 : index
    %c1_59 = arith.constant 1 : index
    %33 = memref.load %arg4[%c2_58, %c1_59] : memref<4x8xf32, #tpu.memory_space<smem>>
    %c2_60 = arith.constant 2 : index
    %c2_61 = arith.constant 2 : index
    %34 = memref.load %arg4[%c2_60, %c2_61] : memref<4x8xf32, #tpu.memory_space<smem>>
    %c2_62 = arith.constant 2 : index
    %c3_63 = arith.constant 3 : index
    %35 = memref.load %arg4[%c2_62, %c3_63] : memref<4x8xf32, #tpu.memory_space<smem>>
    %c2_64 = arith.constant 2 : index
    %c4_65 = arith.constant 4 : index
    %36 = memref.load %arg4[%c2_64, %c4_65] : memref<4x8xf32, #tpu.memory_space<smem>>
    %c2_66 = arith.constant 2 : index
    %c5_67 = arith.constant 5 : index
    %37 = memref.load %arg4[%c2_66, %c5_67] : memref<4x8xf32, #tpu.memory_space<smem>>
    %c2_68 = arith.constant 2 : index
    %c6_69 = arith.constant 6 : index
    %38 = memref.load %arg4[%c2_68, %c6_69] : memref<4x8xf32, #tpu.memory_space<smem>>
    %c2_70 = arith.constant 2 : index
    %c7_71 = arith.constant 7 : index
    %39 = memref.load %arg4[%c2_70, %c7_71] : memref<4x8xf32, #tpu.memory_space<smem>>
    %c3_72 = arith.constant 3 : index
    %c0_73 = arith.constant 0 : index
    %40 = memref.load %arg4[%c3_72, %c0_73] : memref<4x8xf32, #tpu.memory_space<smem>>
    %c3_74 = arith.constant 3 : index
    %c1_75 = arith.constant 1 : index
    %41 = memref.load %arg4[%c3_74, %c1_75] : memref<4x8xf32, #tpu.memory_space<smem>>
    %c3_76 = arith.constant 3 : index
    %c2_77 = arith.constant 2 : index
    %42 = memref.load %arg4[%c3_76, %c2_77] : memref<4x8xf32, #tpu.memory_space<smem>>
    %c3_78 = arith.constant 3 : index
    %c3_79 = arith.constant 3 : index
    %43 = memref.load %arg4[%c3_78, %c3_79] : memref<4x8xf32, #tpu.memory_space<smem>>
    %c3_80 = arith.constant 3 : index
    %c4_81 = arith.constant 4 : index
    %44 = memref.load %arg4[%c3_80, %c4_81] : memref<4x8xf32, #tpu.memory_space<smem>>
    %c3_82 = arith.constant 3 : index
    %c5_83 = arith.constant 5 : index
    %45 = memref.load %arg4[%c3_82, %c5_83] : memref<4x8xf32, #tpu.memory_space<smem>>
    %c3_84 = arith.constant 3 : index
    %c6_85 = arith.constant 6 : index
    %46 = memref.load %arg4[%c3_84, %c6_85] : memref<4x8xf32, #tpu.memory_space<smem>>
    %c3_86 = arith.constant 3 : index
    %c7_87 = arith.constant 7 : index
    %47 = memref.load %arg4[%c3_86, %c7_87] : memref<4x8xf32, #tpu.memory_space<smem>>
    %c0_i32 = arith.constant 0 : i32
    %48 = arith.cmpi eq, %arg1, %c0_i32 : i32
    %49 = arith.extui %48 : i1 to i32
    %c0_i32_88 = arith.constant 0 : i32
    %50 = arith.cmpi ne, %49, %c0_i32_88 : i32
    scf.if %50 {
      %cst_172 = arith.constant 0.000000e+00 : f32
      %269 = vector.broadcast %cst_172 : f32 to vector<4x128xf32>
      %c0_173 = arith.constant 0 : index
      %c0_174 = arith.constant 0 : index
      %c0_175 = arith.constant 0 : index
      %270 = vector.load %arg6[%c0_173, %c0_174, %c0_175] : memref<1x4x128xf32, #tpu.memory_space<vmem>>, vector<1x4x128xf32>
      %271 = vector.shape_cast %270 : vector<1x4x128xf32> to vector<4x128xf32>
      %272 = vector.shape_cast %269 : vector<4x128xf32> to vector<1x4x128xf32>
      tpu.vector_store %arg6[%c0_173, %c0_174, %c0_175], %272 {strides = array<i32>} : memref<1x4x128xf32, #tpu.memory_space<vmem>>, vector<1x4x128xf32>,
      %cst_176 = arith.constant 0.000000e+00 : f32
      %273 = vector.broadcast %cst_176 : f32 to vector<4x128xf32>
      %c0_177 = arith.constant 0 : index
      %c0_178 = arith.constant 0 : index
      %c0_179 = arith.constant 0 : index
      %274 = vector.load %arg7[%c0_177, %c0_178, %c0_179] : memref<1x4x128xf32, #tpu.memory_space<vmem>>, vector<1x4x128xf32>
      %275 = vector.shape_cast %274 : vector<1x4x128xf32> to vector<4x128xf32>
      %276 = vector.shape_cast %273 : vector<4x128xf32> to vector<1x4x128xf32>
      tpu.vector_store %arg7[%c0_177, %c0_178, %c0_179], %276 {strides = array<i32>} : memref<1x4x128xf32, #tpu.memory_space<vmem>>, vector<1x4x128xf32>,
    } else {
    }
    %cst = arith.constant 0.000000e+00 : f32
    %51 = vector.broadcast %cst : f32 to vector<1x128xf32>
    %cst_89 = arith.constant 0.000000e+00 : f32
    %52 = vector.broadcast %cst_89 : f32 to vector<1x128xf32>
    %cst_90 = arith.constant 0.000000e+00 : f32
    %53 = vector.broadcast %cst_90 : f32 to vector<1x128xf32>
    %cst_91 = arith.constant 0.000000e+00 : f32
    %54 = vector.broadcast %cst_91 : f32 to vector<1x128xf32>
    %cst_92 = arith.constant 0.000000e+00 : f32
    %55 = vector.broadcast %cst_92 : f32 to vector<1x128xf32>
    %cst_93 = arith.constant 0.000000e+00 : f32
    %56 = vector.broadcast %cst_93 : f32 to vector<1x128xf32>
    %cst_94 = arith.constant 0.000000e+00 : f32
    %57 = vector.broadcast %cst_94 : f32 to vector<1x128xf32>
    %cst_95 = arith.constant 0.000000e+00 : f32
    %58 = vector.broadcast %cst_95 : f32 to vector<1x128xf32>
    %c0_96 = arith.constant 0 : index
    %c0_97 = arith.constant 0 : index
    %c0_98 = arith.constant 0 : index
    %c0_99 = arith.constant 0 : index
    %59 = vector.load %arg2[%c0_96, %c0_97, %c0_98, %c0_99] : memref<1x8x2x128xf32, #tpu.memory_space<vmem>>, vector<1x1x2x128xf32>
    %60 = vector.shape_cast %59 : vector<1x1x2x128xf32> to vector<2x128xf32>
    %61 = vector.broadcast %0 : f32 to vector<2x128xf32>
    %62 = arith.mulf %60, %61 : vector<2x128xf32>
    %63 = vector.broadcast %8 : f32 to vector<2x128xf32>
    %64 = arith.addf %62, %63 : vector<2x128xf32>
    %cst_100 = arith.constant 0.000000e+00 : f32
    %65 = vector.broadcast %cst_100 : f32 to vector<2x128xf32>
    %66 = arith.maximumf %64, %65 : vector<2x128xf32>
    %c0_101 = arith.constant 0 : index
    %c1_102 = arith.constant 1 : index
    %c0_103 = arith.constant 0 : index
    %c0_104 = arith.constant 0 : index
    %67 = vector.load %arg2[%c0_101, %c1_102, %c0_103, %c0_104] : memref<1x8x2x128xf32, #tpu.memory_space<vmem>>, vector<1x1x2x128xf32>
    %68 = vector.shape_cast %67 : vector<1x1x2x128xf32> to vector<2x128xf32>
    %69 = vector.broadcast %1 : f32 to vector<2x128xf32>
    %70 = arith.mulf %68, %69 : vector<2x128xf32>
    %71 = vector.broadcast %9 : f32 to vector<2x128xf32>
    %72 = arith.addf %70, %71 : vector<2x128xf32>
    %cst_105 = arith.constant 0.000000e+00 : f32
    %73 = vector.broadcast %cst_105 : f32 to vector<2x128xf32>
    %74 = arith.maximumf %72, %73 : vector<2x128xf32>
    %c0_106 = arith.constant 0 : index
    %c2_107 = arith.constant 2 : index
    %c0_108 = arith.constant 0 : index
    %c0_109 = arith.constant 0 : index
    %75 = vector.load %arg2[%c0_106, %c2_107, %c0_108, %c0_109] : memref<1x8x2x128xf32, #tpu.memory_space<vmem>>, vector<1x1x2x128xf32>
    %76 = vector.shape_cast %75 : vector<1x1x2x128xf32> to vector<2x128xf32>
    %77 = vector.broadcast %2 : f32 to vector<2x128xf32>
    %78 = arith.mulf %76, %77 : vector<2x128xf32>
    %79 = vector.broadcast %10 : f32 to vector<2x128xf32>
    %80 = arith.addf %78, %79 : vector<2x128xf32>
    %cst_110 = arith.constant 0.000000e+00 : f32
    %81 = vector.broadcast %cst_110 : f32 to vector<2x128xf32>
    %82 = arith.maximumf %80, %81 : vector<2x128xf32>
    %c0_111 = arith.constant 0 : index
    %c3_112 = arith.constant 3 : index
    %c0_113 = arith.constant 0 : index
    %c0_114 = arith.constant 0 : index
    %83 = vector.load %arg2[%c0_111, %c3_112, %c0_113, %c0_114] : memref<1x8x2x128xf32, #tpu.memory_space<vmem>>, vector<1x1x2x128xf32>
    %84 = vector.shape_cast %83 : vector<1x1x2x128xf32> to vector<2x128xf32>
    %85 = vector.broadcast %3 : f32 to vector<2x128xf32>
    %86 = arith.mulf %84, %85 : vector<2x128xf32>
    %87 = vector.broadcast %11 : f32 to vector<2x128xf32>
    %88 = arith.addf %86, %87 : vector<2x128xf32>
    %cst_115 = arith.constant 0.000000e+00 : f32
    %89 = vector.broadcast %cst_115 : f32 to vector<2x128xf32>
    %90 = arith.maximumf %88, %89 : vector<2x128xf32>
    %c0_116 = arith.constant 0 : index
    %c4_117 = arith.constant 4 : index
    %c0_118 = arith.constant 0 : index
    %c0_119 = arith.constant 0 : index
    %91 = vector.load %arg2[%c0_116, %c4_117, %c0_118, %c0_119] : memref<1x8x2x128xf32, #tpu.memory_space<vmem>>, vector<1x1x2x128xf32>
    %92 = vector.shape_cast %91 : vector<1x1x2x128xf32> to vector<2x128xf32>
    %93 = vector.broadcast %4 : f32 to vector<2x128xf32>
    %94 = arith.mulf %92, %93 : vector<2x128xf32>
    %95 = vector.broadcast %12 : f32 to vector<2x128xf32>
    %96 = arith.addf %94, %95 : vector<2x128xf32>
    %cst_120 = arith.constant 0.000000e+00 : f32
    %97 = vector.broadcast %cst_120 : f32 to vector<2x128xf32>
    %98 = arith.maximumf %96, %97 : vector<2x128xf32>
    %c0_121 = arith.constant 0 : index
    %c5_122 = arith.constant 5 : index
    %c0_123 = arith.constant 0 : index
    %c0_124 = arith.constant 0 : index
    %99 = vector.load %arg2[%c0_121, %c5_122, %c0_123, %c0_124] : memref<1x8x2x128xf32, #tpu.memory_space<vmem>>, vector<1x1x2x128xf32>
    %100 = vector.shape_cast %99 : vector<1x1x2x128xf32> to vector<2x128xf32>
    %101 = vector.broadcast %5 : f32 to vector<2x128xf32>
    %102 = arith.mulf %100, %101 : vector<2x128xf32>
    %103 = vector.broadcast %13 : f32 to vector<2x128xf32>
    %104 = arith.addf %102, %103 : vector<2x128xf32>
    %cst_125 = arith.constant 0.000000e+00 : f32
    %105 = vector.broadcast %cst_125 : f32 to vector<2x128xf32>
    %106 = arith.maximumf %104, %105 : vector<2x128xf32>
    %c0_126 = arith.constant 0 : index
    %c6_127 = arith.constant 6 : index
    %c0_128 = arith.constant 0 : index
    %c0_129 = arith.constant 0 : index
    %107 = vector.load %arg2[%c0_126, %c6_127, %c0_128, %c0_129] : memref<1x8x2x128xf32, #tpu.memory_space<vmem>>, vector<1x1x2x128xf32>
    %108 = vector.shape_cast %107 : vector<1x1x2x128xf32> to vector<2x128xf32>
    %109 = vector.broadcast %6 : f32 to vector<2x128xf32>
    %110 = arith.mulf %108, %109 : vector<2x128xf32>
    %111 = vector.broadcast %14 : f32 to vector<2x128xf32>
    %112 = arith.addf %110, %111 : vector<2x128xf32>
    %cst_130 = arith.constant 0.000000e+00 : f32
    %113 = vector.broadcast %cst_130 : f32 to vector<2x128xf32>
    %114 = arith.maximumf %112, %113 : vector<2x128xf32>
    %c0_131 = arith.constant 0 : index
    %c7_132 = arith.constant 7 : index
    %c0_133 = arith.constant 0 : index
    %c0_134 = arith.constant 0 : index
    %115 = vector.load %arg2[%c0_131, %c7_132, %c0_133, %c0_134] : memref<1x8x2x128xf32, #tpu.memory_space<vmem>>, vector<1x1x2x128xf32>
    %116 = vector.shape_cast %115 : vector<1x1x2x128xf32> to vector<2x128xf32>
    %117 = vector.broadcast %7 : f32 to vector<2x128xf32>
    %118 = arith.mulf %116, %117 : vector<2x128xf32>
    %119 = vector.broadcast %15 : f32 to vector<2x128xf32>
    %120 = arith.addf %118, %119 : vector<2x128xf32>
    %cst_135 = arith.constant 0.000000e+00 : f32
    %121 = vector.broadcast %cst_135 : f32 to vector<2x128xf32>
    %122 = arith.maximumf %120, %121 : vector<2x128xf32>
    %123 = vector.broadcast %16 : f32 to vector<2x128xf32>
    %124 = arith.addf %66, %123 : vector<2x128xf32>
    %125 = vector.broadcast %17 : f32 to vector<2x128xf32>
    %126 = arith.addf %74, %125 : vector<2x128xf32>
    %127 = arith.maximumf %124, %126 : vector<2x128xf32>
    %128 = vector.broadcast %18 : f32 to vector<2x128xf32>
    %129 = arith.addf %82, %128 : vector<2x128xf32>
    %130 = arith.maximumf %127, %129 : vector<2x128xf32>
    %131 = vector.broadcast %19 : f32 to vector<2x128xf32>
    %132 = arith.addf %90, %131 : vector<2x128xf32>
    %133 = arith.maximumf %130, %132 : vector<2x128xf32>
    %134 = vector.broadcast %20 : f32 to vector<2x128xf32>
    %135 = arith.addf %98, %134 : vector<2x128xf32>
    %136 = arith.maximumf %133, %135 : vector<2x128xf32>
    %137 = vector.broadcast %21 : f32 to vector<2x128xf32>
    %138 = arith.addf %106, %137 : vector<2x128xf32>
    %139 = arith.maximumf %136, %138 : vector<2x128xf32>
    %140 = vector.broadcast %22 : f32 to vector<2x128xf32>
    %141 = arith.addf %114, %140 : vector<2x128xf32>
    %142 = arith.maximumf %139, %141 : vector<2x128xf32>
    %143 = vector.broadcast %23 : f32 to vector<2x128xf32>
    %144 = arith.addf %122, %143 : vector<2x128xf32>
    %145 = arith.maximumf %142, %144 : vector<2x128xf32>
    %c0_136 = arith.constant 0 : index
    %c0_137 = arith.constant 0 : index
    %c0_138 = arith.constant 0 : index
    %c0_139 = arith.constant 0 : index
    %146 = vector.load %arg5[%c0_136, %c0_137, %c0_138, %c0_139] : memref<1x4x2x128xf32, #tpu.memory_space<vmem>>, vector<1x1x2x128xf32>
    %147 = vector.shape_cast %146 : vector<1x1x2x128xf32> to vector<2x128xf32>
    %148 = vector.shape_cast %145 : vector<2x128xf32> to vector<1x1x2x128xf32>
    tpu.vector_store %arg5[%c0_136, %c0_137, %c0_138, %c0_139], %148 {strides = array<i32>} : memref<1x4x2x128xf32, #tpu.memory_space<vmem>>, vector<1x1x2x128xf32>,
    %cst_140 = arith.constant dense<0.000000e+00> : vector<128xf32>
    %149 = vector.multi_reduction <add>, %145, %cst_140 [0] : vector<2x128xf32> to vector<128xf32>
    %150 = vector.shape_cast %149 : vector<128xf32> to vector<1x128xf32>
    %151 = arith.addf %51, %150 : vector<1x128xf32>
    %152 = arith.mulf %145, %145 : vector<2x128xf32>
    %cst_141 = arith.constant dense<0.000000e+00> : vector<128xf32>
    %153 = vector.multi_reduction <add>, %152, %cst_141 [0] : vector<2x128xf32> to vector<128xf32>
    %154 = vector.shape_cast %153 : vector<128xf32> to vector<1x128xf32>
    %155 = arith.addf %55, %154 : vector<1x128xf32>
    %156 = vector.broadcast %24 : f32 to vector<2x128xf32>
    %157 = arith.addf %66, %156 : vector<2x128xf32>
    %158 = vector.broadcast %25 : f32 to vector<2x128xf32>
    %159 = arith.addf %74, %158 : vector<2x128xf32>
    %160 = arith.maximumf %157, %159 : vector<2x128xf32>
    %161 = vector.broadcast %26 : f32 to vector<2x128xf32>
    %162 = arith.addf %82, %161 : vector<2x128xf32>
    %163 = arith.maximumf %160, %162 : vector<2x128xf32>
    %164 = vector.broadcast %27 : f32 to vector<2x128xf32>
    %165 = arith.addf %90, %164 : vector<2x128xf32>
    %166 = arith.maximumf %163, %165 : vector<2x128xf32>
    %167 = vector.broadcast %28 : f32 to vector<2x128xf32>
    %168 = arith.addf %98, %167 : vector<2x128xf32>
    %169 = arith.maximumf %166, %168 : vector<2x128xf32>
    %170 = vector.broadcast %29 : f32 to vector<2x128xf32>
    %171 = arith.addf %106, %170 : vector<2x128xf32>
    %172 = arith.maximumf %169, %171 : vector<2x128xf32>
    %173 = vector.broadcast %30 : f32 to vector<2x128xf32>
    %174 = arith.addf %114, %173 : vector<2x128xf32>
    %175 = arith.maximumf %172, %174 : vector<2x128xf32>
    %176 = vector.broadcast %31 : f32 to vector<2x128xf32>
    %177 = arith.addf %122, %176 : vector<2x128xf32>
    %178 = arith.maximumf %175, %177 : vector<2x128xf32>
    %c0_142 = arith.constant 0 : index
    %c1_143 = arith.constant 1 : index
    %c0_144 = arith.constant 0 : index
    %c0_145 = arith.constant 0 : index
    %179 = vector.load %arg5[%c0_142, %c1_143, %c0_144, %c0_145] : memref<1x4x2x128xf32, #tpu.memory_space<vmem>>, vector<1x1x2x128xf32>
    %180 = vector.shape_cast %179 : vector<1x1x2x128xf32> to vector<2x128xf32>
    %181 = vector.shape_cast %178 : vector<2x128xf32> to vector<1x1x2x128xf32>
    tpu.vector_store %arg5[%c0_142, %c1_143, %c0_144, %c0_145], %181 {strides = array<i32>} : memref<1x4x2x128xf32, #tpu.memory_space<vmem>>, vector<1x1x2x128xf32>,
    %cst_146 = arith.constant dense<0.000000e+00> : vector<128xf32>
    %182 = vector.multi_reduction <add>, %178, %cst_146 [0] : vector<2x128xf32> to vector<128xf32>
    %183 = vector.shape_cast %182 : vector<128xf32> to vector<1x128xf32>
    %184 = arith.addf %52, %183 : vector<1x128xf32>
    %185 = arith.mulf %178, %178 : vector<2x128xf32>
    %cst_147 = arith.constant dense<0.000000e+00> : vector<128xf32>
    %186 = vector.multi_reduction <add>, %185, %cst_147 [0] : vector<2x128xf32> to vector<128xf32>
    %187 = vector.shape_cast %186 : vector<128xf32> to vector<1x128xf32>
    %188 = arith.addf %56, %187 : vector<1x128xf32>
    %189 = vector.broadcast %32 : f32 to vector<2x128xf32>
    %190 = arith.addf %66, %189 : vector<2x128xf32>
    %191 = vector.broadcast %33 : f32 to vector<2x128xf32>
    %192 = arith.addf %74, %191 : vector<2x128xf32>
    %193 = arith.maximumf %190, %192 : vector<2x128xf32>
    %194 = vector.broadcast %34 : f32 to vector<2x128xf32>
    %195 = arith.addf %82, %194 : vector<2x128xf32>
    %196 = arith.maximumf %193, %195 : vector<2x128xf32>
    %197 = vector.broadcast %35 : f32 to vector<2x128xf32>
    %198 = arith.addf %90, %197 : vector<2x128xf32>
    %199 = arith.maximumf %196, %198 : vector<2x128xf32>
    %200 = vector.broadcast %36 : f32 to vector<2x128xf32>
    %201 = arith.addf %98, %200 : vector<2x128xf32>
    %202 = arith.maximumf %199, %201 : vector<2x128xf32>
    %203 = vector.broadcast %37 : f32 to vector<2x128xf32>
    %204 = arith.addf %106, %203 : vector<2x128xf32>
    %205 = arith.maximumf %202, %204 : vector<2x128xf32>
    %206 = vector.broadcast %38 : f32 to vector<2x128xf32>
    %207 = arith.addf %114, %206 : vector<2x128xf32>
    %208 = arith.maximumf %205, %207 : vector<2x128xf32>
    %209 = vector.broadcast %39 : f32 to vector<2x128xf32>
    %210 = arith.addf %122, %209 : vector<2x128xf32>
    %211 = arith.maximumf %208, %210 : vector<2x128xf32>
    %c0_148 = arith.constant 0 : index
    %c2_149 = arith.constant 2 : index
    %c0_150 = arith.constant 0 : index
    %c0_151 = arith.constant 0 : index
    %212 = vector.load %arg5[%c0_148, %c2_149, %c0_150, %c0_151] : memref<1x4x2x128xf32, #tpu.memory_space<vmem>>, vector<1x1x2x128xf32>
    %213 = vector.shape_cast %212 : vector<1x1x2x128xf32> to vector<2x128xf32>
    %214 = vector.shape_cast %211 : vector<2x128xf32> to vector<1x1x2x128xf32>
    tpu.vector_store %arg5[%c0_148, %c2_149, %c0_150, %c0_151], %214 {strides = array<i32>} : memref<1x4x2x128xf32, #tpu.memory_space<vmem>>, vector<1x1x2x128xf32>,
    %cst_152 = arith.constant dense<0.000000e+00> : vector<128xf32>
    %215 = vector.multi_reduction <add>, %211, %cst_152 [0] : vector<2x128xf32> to vector<128xf32>
    %216 = vector.shape_cast %215 : vector<128xf32> to vector<1x128xf32>
    %217 = arith.addf %53, %216 : vector<1x128xf32>
    %218 = arith.mulf %211, %211 : vector<2x128xf32>
    %cst_153 = arith.constant dense<0.000000e+00> : vector<128xf32>
    %219 = vector.multi_reduction <add>, %218, %cst_153 [0] : vector<2x128xf32> to vector<128xf32>
    %220 = vector.shape_cast %219 : vector<128xf32> to vector<1x128xf32>
    %221 = arith.addf %57, %220 : vector<1x128xf32>
    %222 = vector.broadcast %40 : f32 to vector<2x128xf32>
    %223 = arith.addf %66, %222 : vector<2x128xf32>
    %224 = vector.broadcast %41 : f32 to vector<2x128xf32>
    %225 = arith.addf %74, %224 : vector<2x128xf32>
    %226 = arith.maximumf %223, %225 : vector<2x128xf32>
    %227 = vector.broadcast %42 : f32 to vector<2x128xf32>
    %228 = arith.addf %82, %227 : vector<2x128xf32>
    %229 = arith.maximumf %226, %228 : vector<2x128xf32>
    %230 = vector.broadcast %43 : f32 to vector<2x128xf32>
    %231 = arith.addf %90, %230 : vector<2x128xf32>
    %232 = arith.maximumf %229, %231 : vector<2x128xf32>
    %233 = vector.broadcast %44 : f32 to vector<2x128xf32>
    %234 = arith.addf %98, %233 : vector<2x128xf32>
    %235 = arith.maximumf %232, %234 : vector<2x128xf32>
    %236 = vector.broadcast %45 : f32 to vector<2x128xf32>
    %237 = arith.addf %106, %236 : vector<2x128xf32>
    %238 = arith.maximumf %235, %237 : vector<2x128xf32>
    %239 = vector.broadcast %46 : f32 to vector<2x128xf32>
    %240 = arith.addf %114, %239 : vector<2x128xf32>
    %241 = arith.maximumf %238, %240 : vector<2x128xf32>
    %242 = vector.broadcast %47 : f32 to vector<2x128xf32>
    %243 = arith.addf %122, %242 : vector<2x128xf32>
    %244 = arith.maximumf %241, %243 : vector<2x128xf32>
    %c0_154 = arith.constant 0 : index
    %c3_155 = arith.constant 3 : index
    %c0_156 = arith.constant 0 : index
    %c0_157 = arith.constant 0 : index
    %245 = vector.load %arg5[%c0_154, %c3_155, %c0_156, %c0_157] : memref<1x4x2x128xf32, #tpu.memory_space<vmem>>, vector<1x1x2x128xf32>
    %246 = vector.shape_cast %245 : vector<1x1x2x128xf32> to vector<2x128xf32>
    %247 = vector.shape_cast %244 : vector<2x128xf32> to vector<1x1x2x128xf32>
    tpu.vector_store %arg5[%c0_154, %c3_155, %c0_156, %c0_157], %247 {strides = array<i32>} : memref<1x4x2x128xf32, #tpu.memory_space<vmem>>, vector<1x1x2x128xf32>,
    %cst_158 = arith.constant dense<0.000000e+00> : vector<128xf32>
    %248 = vector.multi_reduction <add>, %244, %cst_158 [0] : vector<2x128xf32> to vector<128xf32>
    %249 = vector.shape_cast %248 : vector<128xf32> to vector<1x128xf32>
    %250 = arith.addf %54, %249 : vector<1x128xf32>
    %251 = arith.mulf %244, %244 : vector<2x128xf32>
    %cst_159 = arith.constant dense<0.000000e+00> : vector<128xf32>
    %252 = vector.multi_reduction <add>, %251, %cst_159 [0] : vector<2x128xf32> to vector<128xf32>
    %253 = vector.shape_cast %252 : vector<128xf32> to vector<1x128xf32>
    %254 = arith.addf %58, %253 : vector<1x128xf32>
    %c0_160 = arith.constant 0 : index
    %c0_161 = arith.constant 0 : index
    %c0_162 = arith.constant 0 : index
    %255 = vector.load %arg6[%c0_160, %c0_161, %c0_162] : memref<1x4x128xf32, #tpu.memory_space<vmem>>, vector<1x4x128xf32>
    %256 = vector.shape_cast %255 : vector<1x4x128xf32> to vector<4x128xf32>
    %257 = tpu.concatenate %151, %184, %217, %250 in 0 : vector<1x128xf32>, vector<1x128xf32>, vector<1x128xf32>, vector<1x128xf32> -> vector<4x128xf32>
    %258 = arith.addf %256, %257 : vector<4x128xf32>
    %c0_163 = arith.constant 0 : index
    %c0_164 = arith.constant 0 : index
    %c0_165 = arith.constant 0 : index
    %259 = vector.load %arg6[%c0_163, %c0_164, %c0_165] : memref<1x4x128xf32, #tpu.memory_space<vmem>>, vector<1x4x128xf32>
    %260 = vector.shape_cast %259 : vector<1x4x128xf32> to vector<4x128xf32>
    %261 = vector.shape_cast %258 : vector<4x128xf32> to vector<1x4x128xf32>
    tpu.vector_store %arg6[%c0_163, %c0_164, %c0_165], %261 {strides = array<i32>} : memref<1x4x128xf32, #tpu.memory_space<vmem>>, vector<1x4x128xf32>,
    %c0_166 = arith.constant 0 : index
    %c0_167 = arith.constant 0 : index
    %c0_168 = arith.constant 0 : index
    %262 = vector.load %arg7[%c0_166, %c0_167, %c0_168] : memref<1x4x128xf32, #tpu.memory_space<vmem>>, vector<1x4x128xf32>
    %263 = vector.shape_cast %262 : vector<1x4x128xf32> to vector<4x128xf32>
    %264 = tpu.concatenate %155, %188, %221, %254 in 0 : vector<1x128xf32>, vector<1x128xf32>, vector<1x128xf32>, vector<1x128xf32> -> vector<4x128xf32>
    %265 = arith.addf %263, %264 : vector<4x128xf32>
    %c0_169 = arith.constant 0 : index
    %c0_170 = arith.constant 0 : index
    %c0_171 = arith.constant 0 : index
    %266 = vector.load %arg7[%c0_169, %c0_170, %c0_171] : memref<1x4x128xf32, #tpu.memory_space<vmem>>, vector<1x4x128xf32>
    %267 = vector.shape_cast %266 : vector<1x4x128xf32> to vector<4x128xf32>
    %268 = vector.shape_cast %265 : vector<4x128xf32> to vector<1x4x128xf32>
    tpu.vector_store %arg7[%c0_169, %c0_170, %c0_171], %268 {strides = array<i32>} : memref<1x4x128xf32, #tpu.memory_space<vmem>>, vector<1x4x128xf32>,
    return
  }
  func.func @transform_0(%arg0: i32, %arg1: i32) -> (i32, i32, i32, i32) {
    %c0_i32 = arith.constant 0 : i32
    %c0_i32_0 = arith.constant 0 : i32
    %c0_i32_1 = arith.constant 0 : i32
    return %arg0, %c0_i32, %arg1, %c0_i32_0 : i32, i32, i32, i32
  }
  func.func @transform_1(%arg0: i32, %arg1: i32) -> (i32, i32) {
    %c0_i32 = arith.constant 0 : i32
    %c0_i32_0 = arith.constant 0 : i32
    %c0_i32_1 = arith.constant 0 : i32
    return %c0_i32, %c0_i32_0 : i32, i32
  }
  func.func @transform_2(%arg0: i32, %arg1: i32) -> (i32, i32) {
    %c0_i32 = arith.constant 0 : i32
    %c0_i32_0 = arith.constant 0 : i32
    %c0_i32_1 = arith.constant 0 : i32
    return %c0_i32, %c0_i32_0 : i32, i32
  }
  func.func @transform_3(%arg0: i32, %arg1: i32) -> (i32, i32, i32, i32) {
    %c0_i32 = arith.constant 0 : i32
    %c0_i32_0 = arith.constant 0 : i32
    %c0_i32_1 = arith.constant 0 : i32
    return %arg0, %c0_i32, %arg1, %c0_i32_0 : i32, i32, i32, i32
  }
  func.func @transform_4(%arg0: i32, %arg1: i32) -> (i32, i32, i32) {
    %c0_i32 = arith.constant 0 : i32
    %c0_i32_0 = arith.constant 0 : i32
    %c0_i32_1 = arith.constant 0 : i32
    return %arg0, %c0_i32, %c0_i32_0 : i32, i32, i32
  }
  func.func @transform_5(%arg0: i32, %arg1: i32) -> (i32, i32, i32) {
    %c0_i32 = arith.constant 0 : i32
    %c0_i32_0 = arith.constant 0 : i32
    %c0_i32_1 = arith.constant 0 : i32
    return %arg0, %c0_i32, %c0_i32_0 : i32, i32, i32
  }
}

module attributes {stable_mosaic.version = 11 : i64} {
  func.func @kernel(%arg0: i32, %arg1: i32, %arg2: memref<1x8x2x128xf32, #tpu.memory_space<vmem>>, %arg3: memref<2x8xf32, #tpu.memory_space<smem>>, %arg4: memref<4x8xf32, #tpu.memory_space<smem>>, %arg5: memref<4xf32, #tpu.memory_space<smem>>, %arg6: memref<1x4x2x128xf32, #tpu.memory_space<vmem>>) attributes {dimension_semantics = [#tpu.dimension_semantics<parallel>, #tpu.dimension_semantics<parallel>], iteration_bounds = array<i64: 2, 1>, scalar_prefetch = 0 : i64, scratch_operands = 0 : i64, tpu.core_type = #tpu.core_type<tc>, window_params = [{transform_indices = @transform_0, window_bounds = array<i64: 1, 8, 2, 128>}, {transform_indices = @transform_1, window_bounds = array<i64: 2, 8>}, {transform_indices = @transform_2, window_bounds = array<i64: 4, 8>}, {transform_indices = @transform_3, window_bounds = array<i64: 4>}, {transform_indices = @transform_4, window_bounds = array<i64: 1, 4, 2, 128>}]} {
    %c0 = arith.constant 0 : index
    %c0_0 = arith.constant 0 : index
    %0 = memref.load %arg3[%c0, %c0_0] : memref<2x8xf32, #tpu.memory_space<smem>>
    %c0_1 = arith.constant 0 : index
    %c1 = arith.constant 1 : index
    %1 = memref.load %arg3[%c0_1, %c1] : memref<2x8xf32, #tpu.memory_space<smem>>
    %c0_2 = arith.constant 0 : index
    %c2 = arith.constant 2 : index
    %2 = memref.load %arg3[%c0_2, %c2] : memref<2x8xf32, #tpu.memory_space<smem>>
    %c0_3 = arith.constant 0 : index
    %c3 = arith.constant 3 : index
    %3 = memref.load %arg3[%c0_3, %c3] : memref<2x8xf32, #tpu.memory_space<smem>>
    %c0_4 = arith.constant 0 : index
    %c4 = arith.constant 4 : index
    %4 = memref.load %arg3[%c0_4, %c4] : memref<2x8xf32, #tpu.memory_space<smem>>
    %c0_5 = arith.constant 0 : index
    %c5 = arith.constant 5 : index
    %5 = memref.load %arg3[%c0_5, %c5] : memref<2x8xf32, #tpu.memory_space<smem>>
    %c0_6 = arith.constant 0 : index
    %c6 = arith.constant 6 : index
    %6 = memref.load %arg3[%c0_6, %c6] : memref<2x8xf32, #tpu.memory_space<smem>>
    %c0_7 = arith.constant 0 : index
    %c7 = arith.constant 7 : index
    %7 = memref.load %arg3[%c0_7, %c7] : memref<2x8xf32, #tpu.memory_space<smem>>
    %c1_8 = arith.constant 1 : index
    %c0_9 = arith.constant 0 : index
    %8 = memref.load %arg3[%c1_8, %c0_9] : memref<2x8xf32, #tpu.memory_space<smem>>
    %c1_10 = arith.constant 1 : index
    %c1_11 = arith.constant 1 : index
    %9 = memref.load %arg3[%c1_10, %c1_11] : memref<2x8xf32, #tpu.memory_space<smem>>
    %c1_12 = arith.constant 1 : index
    %c2_13 = arith.constant 2 : index
    %10 = memref.load %arg3[%c1_12, %c2_13] : memref<2x8xf32, #tpu.memory_space<smem>>
    %c1_14 = arith.constant 1 : index
    %c3_15 = arith.constant 3 : index
    %11 = memref.load %arg3[%c1_14, %c3_15] : memref<2x8xf32, #tpu.memory_space<smem>>
    %c1_16 = arith.constant 1 : index
    %c4_17 = arith.constant 4 : index
    %12 = memref.load %arg3[%c1_16, %c4_17] : memref<2x8xf32, #tpu.memory_space<smem>>
    %c1_18 = arith.constant 1 : index
    %c5_19 = arith.constant 5 : index
    %13 = memref.load %arg3[%c1_18, %c5_19] : memref<2x8xf32, #tpu.memory_space<smem>>
    %c1_20 = arith.constant 1 : index
    %c6_21 = arith.constant 6 : index
    %14 = memref.load %arg3[%c1_20, %c6_21] : memref<2x8xf32, #tpu.memory_space<smem>>
    %c1_22 = arith.constant 1 : index
    %c7_23 = arith.constant 7 : index
    %15 = memref.load %arg3[%c1_22, %c7_23] : memref<2x8xf32, #tpu.memory_space<smem>>
    %c0_24 = arith.constant 0 : index
    %c0_25 = arith.constant 0 : index
    %16 = memref.load %arg4[%c0_24, %c0_25] : memref<4x8xf32, #tpu.memory_space<smem>>
    %c0_26 = arith.constant 0 : index
    %c1_27 = arith.constant 1 : index
    %17 = memref.load %arg4[%c0_26, %c1_27] : memref<4x8xf32, #tpu.memory_space<smem>>
    %c0_28 = arith.constant 0 : index
    %c2_29 = arith.constant 2 : index
    %18 = memref.load %arg4[%c0_28, %c2_29] : memref<4x8xf32, #tpu.memory_space<smem>>
    %c0_30 = arith.constant 0 : index
    %c3_31 = arith.constant 3 : index
    %19 = memref.load %arg4[%c0_30, %c3_31] : memref<4x8xf32, #tpu.memory_space<smem>>
    %c0_32 = arith.constant 0 : index
    %c4_33 = arith.constant 4 : index
    %20 = memref.load %arg4[%c0_32, %c4_33] : memref<4x8xf32, #tpu.memory_space<smem>>
    %c0_34 = arith.constant 0 : index
    %c5_35 = arith.constant 5 : index
    %21 = memref.load %arg4[%c0_34, %c5_35] : memref<4x8xf32, #tpu.memory_space<smem>>
    %c0_36 = arith.constant 0 : index
    %c6_37 = arith.constant 6 : index
    %22 = memref.load %arg4[%c0_36, %c6_37] : memref<4x8xf32, #tpu.memory_space<smem>>
    %c0_38 = arith.constant 0 : index
    %c7_39 = arith.constant 7 : index
    %23 = memref.load %arg4[%c0_38, %c7_39] : memref<4x8xf32, #tpu.memory_space<smem>>
    %c1_40 = arith.constant 1 : index
    %c0_41 = arith.constant 0 : index
    %24 = memref.load %arg4[%c1_40, %c0_41] : memref<4x8xf32, #tpu.memory_space<smem>>
    %c1_42 = arith.constant 1 : index
    %c1_43 = arith.constant 1 : index
    %25 = memref.load %arg4[%c1_42, %c1_43] : memref<4x8xf32, #tpu.memory_space<smem>>
    %c1_44 = arith.constant 1 : index
    %c2_45 = arith.constant 2 : index
    %26 = memref.load %arg4[%c1_44, %c2_45] : memref<4x8xf32, #tpu.memory_space<smem>>
    %c1_46 = arith.constant 1 : index
    %c3_47 = arith.constant 3 : index
    %27 = memref.load %arg4[%c1_46, %c3_47] : memref<4x8xf32, #tpu.memory_space<smem>>
    %c1_48 = arith.constant 1 : index
    %c4_49 = arith.constant 4 : index
    %28 = memref.load %arg4[%c1_48, %c4_49] : memref<4x8xf32, #tpu.memory_space<smem>>
    %c1_50 = arith.constant 1 : index
    %c5_51 = arith.constant 5 : index
    %29 = memref.load %arg4[%c1_50, %c5_51] : memref<4x8xf32, #tpu.memory_space<smem>>
    %c1_52 = arith.constant 1 : index
    %c6_53 = arith.constant 6 : index
    %30 = memref.load %arg4[%c1_52, %c6_53] : memref<4x8xf32, #tpu.memory_space<smem>>
    %c1_54 = arith.constant 1 : index
    %c7_55 = arith.constant 7 : index
    %31 = memref.load %arg4[%c1_54, %c7_55] : memref<4x8xf32, #tpu.memory_space<smem>>
    %c2_56 = arith.constant 2 : index
    %c0_57 = arith.constant 0 : index
    %32 = memref.load %arg4[%c2_56, %c0_57] : memref<4x8xf32, #tpu.memory_space<smem>>
    %c2_58 = arith.constant 2 : index
    %c1_59 = arith.constant 1 : index
    %33 = memref.load %arg4[%c2_58, %c1_59] : memref<4x8xf32, #tpu.memory_space<smem>>
    %c2_60 = arith.constant 2 : index
    %c2_61 = arith.constant 2 : index
    %34 = memref.load %arg4[%c2_60, %c2_61] : memref<4x8xf32, #tpu.memory_space<smem>>
    %c2_62 = arith.constant 2 : index
    %c3_63 = arith.constant 3 : index
    %35 = memref.load %arg4[%c2_62, %c3_63] : memref<4x8xf32, #tpu.memory_space<smem>>
    %c2_64 = arith.constant 2 : index
    %c4_65 = arith.constant 4 : index
    %36 = memref.load %arg4[%c2_64, %c4_65] : memref<4x8xf32, #tpu.memory_space<smem>>
    %c2_66 = arith.constant 2 : index
    %c5_67 = arith.constant 5 : index
    %37 = memref.load %arg4[%c2_66, %c5_67] : memref<4x8xf32, #tpu.memory_space<smem>>
    %c2_68 = arith.constant 2 : index
    %c6_69 = arith.constant 6 : index
    %38 = memref.load %arg4[%c2_68, %c6_69] : memref<4x8xf32, #tpu.memory_space<smem>>
    %c2_70 = arith.constant 2 : index
    %c7_71 = arith.constant 7 : index
    %39 = memref.load %arg4[%c2_70, %c7_71] : memref<4x8xf32, #tpu.memory_space<smem>>
    %c3_72 = arith.constant 3 : index
    %c0_73 = arith.constant 0 : index
    %40 = memref.load %arg4[%c3_72, %c0_73] : memref<4x8xf32, #tpu.memory_space<smem>>
    %c3_74 = arith.constant 3 : index
    %c1_75 = arith.constant 1 : index
    %41 = memref.load %arg4[%c3_74, %c1_75] : memref<4x8xf32, #tpu.memory_space<smem>>
    %c3_76 = arith.constant 3 : index
    %c2_77 = arith.constant 2 : index
    %42 = memref.load %arg4[%c3_76, %c2_77] : memref<4x8xf32, #tpu.memory_space<smem>>
    %c3_78 = arith.constant 3 : index
    %c3_79 = arith.constant 3 : index
    %43 = memref.load %arg4[%c3_78, %c3_79] : memref<4x8xf32, #tpu.memory_space<smem>>
    %c3_80 = arith.constant 3 : index
    %c4_81 = arith.constant 4 : index
    %44 = memref.load %arg4[%c3_80, %c4_81] : memref<4x8xf32, #tpu.memory_space<smem>>
    %c3_82 = arith.constant 3 : index
    %c5_83 = arith.constant 5 : index
    %45 = memref.load %arg4[%c3_82, %c5_83] : memref<4x8xf32, #tpu.memory_space<smem>>
    %c3_84 = arith.constant 3 : index
    %c6_85 = arith.constant 6 : index
    %46 = memref.load %arg4[%c3_84, %c6_85] : memref<4x8xf32, #tpu.memory_space<smem>>
    %c3_86 = arith.constant 3 : index
    %c7_87 = arith.constant 7 : index
    %47 = memref.load %arg4[%c3_86, %c7_87] : memref<4x8xf32, #tpu.memory_space<smem>>
    %c0_88 = arith.constant 0 : index
    %48 = memref.load %arg5[%c0_88] : memref<4xf32, #tpu.memory_space<smem>>
    %c1_89 = arith.constant 1 : index
    %49 = memref.load %arg5[%c1_89] : memref<4xf32, #tpu.memory_space<smem>>
    %c2_90 = arith.constant 2 : index
    %50 = memref.load %arg5[%c2_90] : memref<4xf32, #tpu.memory_space<smem>>
    %c3_91 = arith.constant 3 : index
    %51 = memref.load %arg5[%c3_91] : memref<4xf32, #tpu.memory_space<smem>>
    %c0_92 = arith.constant 0 : index
    %c0_93 = arith.constant 0 : index
    %c0_94 = arith.constant 0 : index
    %c0_95 = arith.constant 0 : index
    %52 = vector.load %arg2[%c0_92, %c0_93, %c0_94, %c0_95] : memref<1x8x2x128xf32, #tpu.memory_space<vmem>>, vector<1x1x2x128xf32>
    %53 = vector.shape_cast %52 : vector<1x1x2x128xf32> to vector<2x128xf32>
    %54 = vector.broadcast %0 : f32 to vector<2x128xf32>
    %55 = arith.mulf %53, %54 : vector<2x128xf32>
    %56 = vector.broadcast %8 : f32 to vector<2x128xf32>
    %57 = arith.addf %55, %56 : vector<2x128xf32>
    %cst = arith.constant 0.000000e+00 : f32
    %58 = vector.broadcast %cst : f32 to vector<2x128xf32>
    %59 = arith.maximumf %57, %58 : vector<2x128xf32>
    %c0_96 = arith.constant 0 : index
    %c1_97 = arith.constant 1 : index
    %c0_98 = arith.constant 0 : index
    %c0_99 = arith.constant 0 : index
    %60 = vector.load %arg2[%c0_96, %c1_97, %c0_98, %c0_99] : memref<1x8x2x128xf32, #tpu.memory_space<vmem>>, vector<1x1x2x128xf32>
    %61 = vector.shape_cast %60 : vector<1x1x2x128xf32> to vector<2x128xf32>
    %62 = vector.broadcast %1 : f32 to vector<2x128xf32>
    %63 = arith.mulf %61, %62 : vector<2x128xf32>
    %64 = vector.broadcast %9 : f32 to vector<2x128xf32>
    %65 = arith.addf %63, %64 : vector<2x128xf32>
    %cst_100 = arith.constant 0.000000e+00 : f32
    %66 = vector.broadcast %cst_100 : f32 to vector<2x128xf32>
    %67 = arith.maximumf %65, %66 : vector<2x128xf32>
    %c0_101 = arith.constant 0 : index
    %c2_102 = arith.constant 2 : index
    %c0_103 = arith.constant 0 : index
    %c0_104 = arith.constant 0 : index
    %68 = vector.load %arg2[%c0_101, %c2_102, %c0_103, %c0_104] : memref<1x8x2x128xf32, #tpu.memory_space<vmem>>, vector<1x1x2x128xf32>
    %69 = vector.shape_cast %68 : vector<1x1x2x128xf32> to vector<2x128xf32>
    %70 = vector.broadcast %2 : f32 to vector<2x128xf32>
    %71 = arith.mulf %69, %70 : vector<2x128xf32>
    %72 = vector.broadcast %10 : f32 to vector<2x128xf32>
    %73 = arith.addf %71, %72 : vector<2x128xf32>
    %cst_105 = arith.constant 0.000000e+00 : f32
    %74 = vector.broadcast %cst_105 : f32 to vector<2x128xf32>
    %75 = arith.maximumf %73, %74 : vector<2x128xf32>
    %c0_106 = arith.constant 0 : index
    %c3_107 = arith.constant 3 : index
    %c0_108 = arith.constant 0 : index
    %c0_109 = arith.constant 0 : index
    %76 = vector.load %arg2[%c0_106, %c3_107, %c0_108, %c0_109] : memref<1x8x2x128xf32, #tpu.memory_space<vmem>>, vector<1x1x2x128xf32>
    %77 = vector.shape_cast %76 : vector<1x1x2x128xf32> to vector<2x128xf32>
    %78 = vector.broadcast %3 : f32 to vector<2x128xf32>
    %79 = arith.mulf %77, %78 : vector<2x128xf32>
    %80 = vector.broadcast %11 : f32 to vector<2x128xf32>
    %81 = arith.addf %79, %80 : vector<2x128xf32>
    %cst_110 = arith.constant 0.000000e+00 : f32
    %82 = vector.broadcast %cst_110 : f32 to vector<2x128xf32>
    %83 = arith.maximumf %81, %82 : vector<2x128xf32>
    %c0_111 = arith.constant 0 : index
    %c4_112 = arith.constant 4 : index
    %c0_113 = arith.constant 0 : index
    %c0_114 = arith.constant 0 : index
    %84 = vector.load %arg2[%c0_111, %c4_112, %c0_113, %c0_114] : memref<1x8x2x128xf32, #tpu.memory_space<vmem>>, vector<1x1x2x128xf32>
    %85 = vector.shape_cast %84 : vector<1x1x2x128xf32> to vector<2x128xf32>
    %86 = vector.broadcast %4 : f32 to vector<2x128xf32>
    %87 = arith.mulf %85, %86 : vector<2x128xf32>
    %88 = vector.broadcast %12 : f32 to vector<2x128xf32>
    %89 = arith.addf %87, %88 : vector<2x128xf32>
    %cst_115 = arith.constant 0.000000e+00 : f32
    %90 = vector.broadcast %cst_115 : f32 to vector<2x128xf32>
    %91 = arith.maximumf %89, %90 : vector<2x128xf32>
    %c0_116 = arith.constant 0 : index
    %c5_117 = arith.constant 5 : index
    %c0_118 = arith.constant 0 : index
    %c0_119 = arith.constant 0 : index
    %92 = vector.load %arg2[%c0_116, %c5_117, %c0_118, %c0_119] : memref<1x8x2x128xf32, #tpu.memory_space<vmem>>, vector<1x1x2x128xf32>
    %93 = vector.shape_cast %92 : vector<1x1x2x128xf32> to vector<2x128xf32>
    %94 = vector.broadcast %5 : f32 to vector<2x128xf32>
    %95 = arith.mulf %93, %94 : vector<2x128xf32>
    %96 = vector.broadcast %13 : f32 to vector<2x128xf32>
    %97 = arith.addf %95, %96 : vector<2x128xf32>
    %cst_120 = arith.constant 0.000000e+00 : f32
    %98 = vector.broadcast %cst_120 : f32 to vector<2x128xf32>
    %99 = arith.maximumf %97, %98 : vector<2x128xf32>
    %c0_121 = arith.constant 0 : index
    %c6_122 = arith.constant 6 : index
    %c0_123 = arith.constant 0 : index
    %c0_124 = arith.constant 0 : index
    %100 = vector.load %arg2[%c0_121, %c6_122, %c0_123, %c0_124] : memref<1x8x2x128xf32, #tpu.memory_space<vmem>>, vector<1x1x2x128xf32>
    %101 = vector.shape_cast %100 : vector<1x1x2x128xf32> to vector<2x128xf32>
    %102 = vector.broadcast %6 : f32 to vector<2x128xf32>
    %103 = arith.mulf %101, %102 : vector<2x128xf32>
    %104 = vector.broadcast %14 : f32 to vector<2x128xf32>
    %105 = arith.addf %103, %104 : vector<2x128xf32>
    %cst_125 = arith.constant 0.000000e+00 : f32
    %106 = vector.broadcast %cst_125 : f32 to vector<2x128xf32>
    %107 = arith.maximumf %105, %106 : vector<2x128xf32>
    %c0_126 = arith.constant 0 : index
    %c7_127 = arith.constant 7 : index
    %c0_128 = arith.constant 0 : index
    %c0_129 = arith.constant 0 : index
    %108 = vector.load %arg2[%c0_126, %c7_127, %c0_128, %c0_129] : memref<1x8x2x128xf32, #tpu.memory_space<vmem>>, vector<1x1x2x128xf32>
    %109 = vector.shape_cast %108 : vector<1x1x2x128xf32> to vector<2x128xf32>
    %110 = vector.broadcast %7 : f32 to vector<2x128xf32>
    %111 = arith.mulf %109, %110 : vector<2x128xf32>
    %112 = vector.broadcast %15 : f32 to vector<2x128xf32>
    %113 = arith.addf %111, %112 : vector<2x128xf32>
    %cst_130 = arith.constant 0.000000e+00 : f32
    %114 = vector.broadcast %cst_130 : f32 to vector<2x128xf32>
    %115 = arith.maximumf %113, %114 : vector<2x128xf32>
    %116 = vector.broadcast %16 : f32 to vector<2x128xf32>
    %117 = arith.mulf %59, %116 : vector<2x128xf32>
    %118 = vector.broadcast %17 : f32 to vector<2x128xf32>
    %119 = arith.mulf %67, %118 : vector<2x128xf32>
    %120 = arith.addf %117, %119 : vector<2x128xf32>
    %121 = vector.broadcast %18 : f32 to vector<2x128xf32>
    %122 = arith.mulf %75, %121 : vector<2x128xf32>
    %123 = arith.addf %120, %122 : vector<2x128xf32>
    %124 = vector.broadcast %19 : f32 to vector<2x128xf32>
    %125 = arith.mulf %83, %124 : vector<2x128xf32>
    %126 = arith.addf %123, %125 : vector<2x128xf32>
    %127 = vector.broadcast %20 : f32 to vector<2x128xf32>
    %128 = arith.mulf %91, %127 : vector<2x128xf32>
    %129 = arith.addf %126, %128 : vector<2x128xf32>
    %130 = vector.broadcast %21 : f32 to vector<2x128xf32>
    %131 = arith.mulf %99, %130 : vector<2x128xf32>
    %132 = arith.addf %129, %131 : vector<2x128xf32>
    %133 = vector.broadcast %22 : f32 to vector<2x128xf32>
    %134 = arith.mulf %107, %133 : vector<2x128xf32>
    %135 = arith.addf %132, %134 : vector<2x128xf32>
    %136 = vector.broadcast %23 : f32 to vector<2x128xf32>
    %137 = arith.mulf %115, %136 : vector<2x128xf32>
    %138 = arith.addf %135, %137 : vector<2x128xf32>
    %139 = vector.broadcast %48 : f32 to vector<2x128xf32>
    %140 = arith.addf %138, %139 : vector<2x128xf32>
    %c0_131 = arith.constant 0 : index
    %c0_132 = arith.constant 0 : index
    %c0_133 = arith.constant 0 : index
    %c0_134 = arith.constant 0 : index
    %141 = vector.load %arg6[%c0_131, %c0_132, %c0_133, %c0_134] : memref<1x4x2x128xf32, #tpu.memory_space<vmem>>, vector<1x1x2x128xf32>
    %142 = vector.shape_cast %141 : vector<1x1x2x128xf32> to vector<2x128xf32>
    %143 = vector.shape_cast %140 : vector<2x128xf32> to vector<1x1x2x128xf32>
    tpu.vector_store %arg6[%c0_131, %c0_132, %c0_133, %c0_134], %143 {strides = array<i32>} : memref<1x4x2x128xf32, #tpu.memory_space<vmem>>, vector<1x1x2x128xf32>,
    %144 = vector.broadcast %24 : f32 to vector<2x128xf32>
    %145 = arith.mulf %59, %144 : vector<2x128xf32>
    %146 = vector.broadcast %25 : f32 to vector<2x128xf32>
    %147 = arith.mulf %67, %146 : vector<2x128xf32>
    %148 = arith.addf %145, %147 : vector<2x128xf32>
    %149 = vector.broadcast %26 : f32 to vector<2x128xf32>
    %150 = arith.mulf %75, %149 : vector<2x128xf32>
    %151 = arith.addf %148, %150 : vector<2x128xf32>
    %152 = vector.broadcast %27 : f32 to vector<2x128xf32>
    %153 = arith.mulf %83, %152 : vector<2x128xf32>
    %154 = arith.addf %151, %153 : vector<2x128xf32>
    %155 = vector.broadcast %28 : f32 to vector<2x128xf32>
    %156 = arith.mulf %91, %155 : vector<2x128xf32>
    %157 = arith.addf %154, %156 : vector<2x128xf32>
    %158 = vector.broadcast %29 : f32 to vector<2x128xf32>
    %159 = arith.mulf %99, %158 : vector<2x128xf32>
    %160 = arith.addf %157, %159 : vector<2x128xf32>
    %161 = vector.broadcast %30 : f32 to vector<2x128xf32>
    %162 = arith.mulf %107, %161 : vector<2x128xf32>
    %163 = arith.addf %160, %162 : vector<2x128xf32>
    %164 = vector.broadcast %31 : f32 to vector<2x128xf32>
    %165 = arith.mulf %115, %164 : vector<2x128xf32>
    %166 = arith.addf %163, %165 : vector<2x128xf32>
    %167 = vector.broadcast %49 : f32 to vector<2x128xf32>
    %168 = arith.addf %166, %167 : vector<2x128xf32>
    %c0_135 = arith.constant 0 : index
    %c1_136 = arith.constant 1 : index
    %c0_137 = arith.constant 0 : index
    %c0_138 = arith.constant 0 : index
    %169 = vector.load %arg6[%c0_135, %c1_136, %c0_137, %c0_138] : memref<1x4x2x128xf32, #tpu.memory_space<vmem>>, vector<1x1x2x128xf32>
    %170 = vector.shape_cast %169 : vector<1x1x2x128xf32> to vector<2x128xf32>
    %171 = vector.shape_cast %168 : vector<2x128xf32> to vector<1x1x2x128xf32>
    tpu.vector_store %arg6[%c0_135, %c1_136, %c0_137, %c0_138], %171 {strides = array<i32>} : memref<1x4x2x128xf32, #tpu.memory_space<vmem>>, vector<1x1x2x128xf32>,
    %172 = vector.broadcast %32 : f32 to vector<2x128xf32>
    %173 = arith.mulf %59, %172 : vector<2x128xf32>
    %174 = vector.broadcast %33 : f32 to vector<2x128xf32>
    %175 = arith.mulf %67, %174 : vector<2x128xf32>
    %176 = arith.addf %173, %175 : vector<2x128xf32>
    %177 = vector.broadcast %34 : f32 to vector<2x128xf32>
    %178 = arith.mulf %75, %177 : vector<2x128xf32>
    %179 = arith.addf %176, %178 : vector<2x128xf32>
    %180 = vector.broadcast %35 : f32 to vector<2x128xf32>
    %181 = arith.mulf %83, %180 : vector<2x128xf32>
    %182 = arith.addf %179, %181 : vector<2x128xf32>
    %183 = vector.broadcast %36 : f32 to vector<2x128xf32>
    %184 = arith.mulf %91, %183 : vector<2x128xf32>
    %185 = arith.addf %182, %184 : vector<2x128xf32>
    %186 = vector.broadcast %37 : f32 to vector<2x128xf32>
    %187 = arith.mulf %99, %186 : vector<2x128xf32>
    %188 = arith.addf %185, %187 : vector<2x128xf32>
    %189 = vector.broadcast %38 : f32 to vector<2x128xf32>
    %190 = arith.mulf %107, %189 : vector<2x128xf32>
    %191 = arith.addf %188, %190 : vector<2x128xf32>
    %192 = vector.broadcast %39 : f32 to vector<2x128xf32>
    %193 = arith.mulf %115, %192 : vector<2x128xf32>
    %194 = arith.addf %191, %193 : vector<2x128xf32>
    %195 = vector.broadcast %50 : f32 to vector<2x128xf32>
    %196 = arith.addf %194, %195 : vector<2x128xf32>
    %c0_139 = arith.constant 0 : index
    %c2_140 = arith.constant 2 : index
    %c0_141 = arith.constant 0 : index
    %c0_142 = arith.constant 0 : index
    %197 = vector.load %arg6[%c0_139, %c2_140, %c0_141, %c0_142] : memref<1x4x2x128xf32, #tpu.memory_space<vmem>>, vector<1x1x2x128xf32>
    %198 = vector.shape_cast %197 : vector<1x1x2x128xf32> to vector<2x128xf32>
    %199 = vector.shape_cast %196 : vector<2x128xf32> to vector<1x1x2x128xf32>
    tpu.vector_store %arg6[%c0_139, %c2_140, %c0_141, %c0_142], %199 {strides = array<i32>} : memref<1x4x2x128xf32, #tpu.memory_space<vmem>>, vector<1x1x2x128xf32>,
    %200 = vector.broadcast %40 : f32 to vector<2x128xf32>
    %201 = arith.mulf %59, %200 : vector<2x128xf32>
    %202 = vector.broadcast %41 : f32 to vector<2x128xf32>
    %203 = arith.mulf %67, %202 : vector<2x128xf32>
    %204 = arith.addf %201, %203 : vector<2x128xf32>
    %205 = vector.broadcast %42 : f32 to vector<2x128xf32>
    %206 = arith.mulf %75, %205 : vector<2x128xf32>
    %207 = arith.addf %204, %206 : vector<2x128xf32>
    %208 = vector.broadcast %43 : f32 to vector<2x128xf32>
    %209 = arith.mulf %83, %208 : vector<2x128xf32>
    %210 = arith.addf %207, %209 : vector<2x128xf32>
    %211 = vector.broadcast %44 : f32 to vector<2x128xf32>
    %212 = arith.mulf %91, %211 : vector<2x128xf32>
    %213 = arith.addf %210, %212 : vector<2x128xf32>
    %214 = vector.broadcast %45 : f32 to vector<2x128xf32>
    %215 = arith.mulf %99, %214 : vector<2x128xf32>
    %216 = arith.addf %213, %215 : vector<2x128xf32>
    %217 = vector.broadcast %46 : f32 to vector<2x128xf32>
    %218 = arith.mulf %107, %217 : vector<2x128xf32>
    %219 = arith.addf %216, %218 : vector<2x128xf32>
    %220 = vector.broadcast %47 : f32 to vector<2x128xf32>
    %221 = arith.mulf %115, %220 : vector<2x128xf32>
    %222 = arith.addf %219, %221 : vector<2x128xf32>
    %223 = vector.broadcast %51 : f32 to vector<2x128xf32>
    %224 = arith.addf %222, %223 : vector<2x128xf32>
    %c0_143 = arith.constant 0 : index
    %c3_144 = arith.constant 3 : index
    %c0_145 = arith.constant 0 : index
    %c0_146 = arith.constant 0 : index
    %225 = vector.load %arg6[%c0_143, %c3_144, %c0_145, %c0_146] : memref<1x4x2x128xf32, #tpu.memory_space<vmem>>, vector<1x1x2x128xf32>
    %226 = vector.shape_cast %225 : vector<1x1x2x128xf32> to vector<2x128xf32>
    %227 = vector.shape_cast %224 : vector<2x128xf32> to vector<1x1x2x128xf32>
    tpu.vector_store %arg6[%c0_143, %c3_144, %c0_145, %c0_146], %227 {strides = array<i32>} : memref<1x4x2x128xf32, #tpu.memory_space<vmem>>, vector<1x1x2x128xf32>,
    return
  }
  func.func @transform_0(%arg0: i32, %arg1: i32) -> (i32, i32, i32, i32) {
    %c0_i32 = arith.constant 0 : i32
    %c0_i32_0 = arith.constant 0 : i32
    %c0_i32_1 = arith.constant 0 : i32
    return %arg0, %c0_i32, %arg1, %c0_i32_0 : i32, i32, i32, i32
  }
  func.func @transform_1(%arg0: i32, %arg1: i32) -> (i32, i32) {
    %c0_i32 = arith.constant 0 : i32
    %c0_i32_0 = arith.constant 0 : i32
    %c0_i32_1 = arith.constant 0 : i32
    return %c0_i32, %c0_i32_0 : i32, i32
  }
  func.func @transform_2(%arg0: i32, %arg1: i32) -> (i32, i32) {
    %c0_i32 = arith.constant 0 : i32
    %c0_i32_0 = arith.constant 0 : i32
    %c0_i32_1 = arith.constant 0 : i32
    return %c0_i32, %c0_i32_0 : i32, i32
  }
  func.func @transform_3(%arg0: i32, %arg1: i32) -> i32 {
    %c0_i32 = arith.constant 0 : i32
    %c0_i32_0 = arith.constant 0 : i32
    return %c0_i32 : i32
  }
  func.func @transform_4(%arg0: i32, %arg1: i32) -> (i32, i32, i32, i32) {
    %c0_i32 = arith.constant 0 : i32
    %c0_i32_0 = arith.constant 0 : i32
    %c0_i32_1 = arith.constant 0 : i32
    return %arg0, %c0_i32, %arg1, %c0_i32_0 : i32, i32, i32, i32
  }
}

module attributes {stable_mosaic.version = 11 : i64} {
  func.func @kernel(%arg0: i32, %arg1: i32, %arg2: memref<1x4x2x128xf32, #tpu.memory_space<vmem>>, %arg3: memref<2x4xf32, #tpu.memory_space<smem>>, %arg4: memref<8x4xf32, #tpu.memory_space<smem>>, %arg5: memref<8xf32, #tpu.memory_space<smem>>, %arg6: memref<1x8x2x128xf32, #tpu.memory_space<vmem>>, %arg7: memref<1x8x128xf32, #tpu.memory_space<vmem>>, %arg8: memref<1x8x128xf32, #tpu.memory_space<vmem>>) attributes {dimension_semantics = [#tpu.dimension_semantics<parallel>, #tpu.dimension_semantics<arbitrary>], iteration_bounds = array<i64: 2, 1>, scalar_prefetch = 0 : i64, scratch_operands = 0 : i64, tpu.core_type = #tpu.core_type<tc>, window_params = [{transform_indices = @transform_0, window_bounds = array<i64: 1, 4, 2, 128>}, {transform_indices = @transform_1, window_bounds = array<i64: 2, 4>}, {transform_indices = @transform_2, window_bounds = array<i64: 8, 4>}, {transform_indices = @transform_3, window_bounds = array<i64: 8>}, {transform_indices = @transform_4, window_bounds = array<i64: 1, 8, 2, 128>}, {transform_indices = @transform_5, window_bounds = array<i64: 1, 8, 128>}, {transform_indices = @transform_6, window_bounds = array<i64: 1, 8, 128>}]} {
    %c0 = arith.constant 0 : index
    %c0_0 = arith.constant 0 : index
    %0 = memref.load %arg3[%c0, %c0_0] : memref<2x4xf32, #tpu.memory_space<smem>>
    %c0_1 = arith.constant 0 : index
    %c1 = arith.constant 1 : index
    %1 = memref.load %arg3[%c0_1, %c1] : memref<2x4xf32, #tpu.memory_space<smem>>
    %c0_2 = arith.constant 0 : index
    %c2 = arith.constant 2 : index
    %2 = memref.load %arg3[%c0_2, %c2] : memref<2x4xf32, #tpu.memory_space<smem>>
    %c0_3 = arith.constant 0 : index
    %c3 = arith.constant 3 : index
    %3 = memref.load %arg3[%c0_3, %c3] : memref<2x4xf32, #tpu.memory_space<smem>>
    %c1_4 = arith.constant 1 : index
    %c0_5 = arith.constant 0 : index
    %4 = memref.load %arg3[%c1_4, %c0_5] : memref<2x4xf32, #tpu.memory_space<smem>>
    %c1_6 = arith.constant 1 : index
    %c1_7 = arith.constant 1 : index
    %5 = memref.load %arg3[%c1_6, %c1_7] : memref<2x4xf32, #tpu.memory_space<smem>>
    %c1_8 = arith.constant 1 : index
    %c2_9 = arith.constant 2 : index
    %6 = memref.load %arg3[%c1_8, %c2_9] : memref<2x4xf32, #tpu.memory_space<smem>>
    %c1_10 = arith.constant 1 : index
    %c3_11 = arith.constant 3 : index
    %7 = memref.load %arg3[%c1_10, %c3_11] : memref<2x4xf32, #tpu.memory_space<smem>>
    %c0_12 = arith.constant 0 : index
    %c0_13 = arith.constant 0 : index
    %8 = memref.load %arg4[%c0_12, %c0_13] : memref<8x4xf32, #tpu.memory_space<smem>>
    %c0_14 = arith.constant 0 : index
    %c1_15 = arith.constant 1 : index
    %9 = memref.load %arg4[%c0_14, %c1_15] : memref<8x4xf32, #tpu.memory_space<smem>>
    %c0_16 = arith.constant 0 : index
    %c2_17 = arith.constant 2 : index
    %10 = memref.load %arg4[%c0_16, %c2_17] : memref<8x4xf32, #tpu.memory_space<smem>>
    %c0_18 = arith.constant 0 : index
    %c3_19 = arith.constant 3 : index
    %11 = memref.load %arg4[%c0_18, %c3_19] : memref<8x4xf32, #tpu.memory_space<smem>>
    %c1_20 = arith.constant 1 : index
    %c0_21 = arith.constant 0 : index
    %12 = memref.load %arg4[%c1_20, %c0_21] : memref<8x4xf32, #tpu.memory_space<smem>>
    %c1_22 = arith.constant 1 : index
    %c1_23 = arith.constant 1 : index
    %13 = memref.load %arg4[%c1_22, %c1_23] : memref<8x4xf32, #tpu.memory_space<smem>>
    %c1_24 = arith.constant 1 : index
    %c2_25 = arith.constant 2 : index
    %14 = memref.load %arg4[%c1_24, %c2_25] : memref<8x4xf32, #tpu.memory_space<smem>>
    %c1_26 = arith.constant 1 : index
    %c3_27 = arith.constant 3 : index
    %15 = memref.load %arg4[%c1_26, %c3_27] : memref<8x4xf32, #tpu.memory_space<smem>>
    %c2_28 = arith.constant 2 : index
    %c0_29 = arith.constant 0 : index
    %16 = memref.load %arg4[%c2_28, %c0_29] : memref<8x4xf32, #tpu.memory_space<smem>>
    %c2_30 = arith.constant 2 : index
    %c1_31 = arith.constant 1 : index
    %17 = memref.load %arg4[%c2_30, %c1_31] : memref<8x4xf32, #tpu.memory_space<smem>>
    %c2_32 = arith.constant 2 : index
    %c2_33 = arith.constant 2 : index
    %18 = memref.load %arg4[%c2_32, %c2_33] : memref<8x4xf32, #tpu.memory_space<smem>>
    %c2_34 = arith.constant 2 : index
    %c3_35 = arith.constant 3 : index
    %19 = memref.load %arg4[%c2_34, %c3_35] : memref<8x4xf32, #tpu.memory_space<smem>>
    %c3_36 = arith.constant 3 : index
    %c0_37 = arith.constant 0 : index
    %20 = memref.load %arg4[%c3_36, %c0_37] : memref<8x4xf32, #tpu.memory_space<smem>>
    %c3_38 = arith.constant 3 : index
    %c1_39 = arith.constant 1 : index
    %21 = memref.load %arg4[%c3_38, %c1_39] : memref<8x4xf32, #tpu.memory_space<smem>>
    %c3_40 = arith.constant 3 : index
    %c2_41 = arith.constant 2 : index
    %22 = memref.load %arg4[%c3_40, %c2_41] : memref<8x4xf32, #tpu.memory_space<smem>>
    %c3_42 = arith.constant 3 : index
    %c3_43 = arith.constant 3 : index
    %23 = memref.load %arg4[%c3_42, %c3_43] : memref<8x4xf32, #tpu.memory_space<smem>>
    %c4 = arith.constant 4 : index
    %c0_44 = arith.constant 0 : index
    %24 = memref.load %arg4[%c4, %c0_44] : memref<8x4xf32, #tpu.memory_space<smem>>
    %c4_45 = arith.constant 4 : index
    %c1_46 = arith.constant 1 : index
    %25 = memref.load %arg4[%c4_45, %c1_46] : memref<8x4xf32, #tpu.memory_space<smem>>
    %c4_47 = arith.constant 4 : index
    %c2_48 = arith.constant 2 : index
    %26 = memref.load %arg4[%c4_47, %c2_48] : memref<8x4xf32, #tpu.memory_space<smem>>
    %c4_49 = arith.constant 4 : index
    %c3_50 = arith.constant 3 : index
    %27 = memref.load %arg4[%c4_49, %c3_50] : memref<8x4xf32, #tpu.memory_space<smem>>
    %c5 = arith.constant 5 : index
    %c0_51 = arith.constant 0 : index
    %28 = memref.load %arg4[%c5, %c0_51] : memref<8x4xf32, #tpu.memory_space<smem>>
    %c5_52 = arith.constant 5 : index
    %c1_53 = arith.constant 1 : index
    %29 = memref.load %arg4[%c5_52, %c1_53] : memref<8x4xf32, #tpu.memory_space<smem>>
    %c5_54 = arith.constant 5 : index
    %c2_55 = arith.constant 2 : index
    %30 = memref.load %arg4[%c5_54, %c2_55] : memref<8x4xf32, #tpu.memory_space<smem>>
    %c5_56 = arith.constant 5 : index
    %c3_57 = arith.constant 3 : index
    %31 = memref.load %arg4[%c5_56, %c3_57] : memref<8x4xf32, #tpu.memory_space<smem>>
    %c6 = arith.constant 6 : index
    %c0_58 = arith.constant 0 : index
    %32 = memref.load %arg4[%c6, %c0_58] : memref<8x4xf32, #tpu.memory_space<smem>>
    %c6_59 = arith.constant 6 : index
    %c1_60 = arith.constant 1 : index
    %33 = memref.load %arg4[%c6_59, %c1_60] : memref<8x4xf32, #tpu.memory_space<smem>>
    %c6_61 = arith.constant 6 : index
    %c2_62 = arith.constant 2 : index
    %34 = memref.load %arg4[%c6_61, %c2_62] : memref<8x4xf32, #tpu.memory_space<smem>>
    %c6_63 = arith.constant 6 : index
    %c3_64 = arith.constant 3 : index
    %35 = memref.load %arg4[%c6_63, %c3_64] : memref<8x4xf32, #tpu.memory_space<smem>>
    %c7 = arith.constant 7 : index
    %c0_65 = arith.constant 0 : index
    %36 = memref.load %arg4[%c7, %c0_65] : memref<8x4xf32, #tpu.memory_space<smem>>
    %c7_66 = arith.constant 7 : index
    %c1_67 = arith.constant 1 : index
    %37 = memref.load %arg4[%c7_66, %c1_67] : memref<8x4xf32, #tpu.memory_space<smem>>
    %c7_68 = arith.constant 7 : index
    %c2_69 = arith.constant 2 : index
    %38 = memref.load %arg4[%c7_68, %c2_69] : memref<8x4xf32, #tpu.memory_space<smem>>
    %c7_70 = arith.constant 7 : index
    %c3_71 = arith.constant 3 : index
    %39 = memref.load %arg4[%c7_70, %c3_71] : memref<8x4xf32, #tpu.memory_space<smem>>
    %c0_72 = arith.constant 0 : index
    %40 = memref.load %arg5[%c0_72] : memref<8xf32, #tpu.memory_space<smem>>
    %c1_73 = arith.constant 1 : index
    %41 = memref.load %arg5[%c1_73] : memref<8xf32, #tpu.memory_space<smem>>
    %c2_74 = arith.constant 2 : index
    %42 = memref.load %arg5[%c2_74] : memref<8xf32, #tpu.memory_space<smem>>
    %c3_75 = arith.constant 3 : index
    %43 = memref.load %arg5[%c3_75] : memref<8xf32, #tpu.memory_space<smem>>
    %c4_76 = arith.constant 4 : index
    %44 = memref.load %arg5[%c4_76] : memref<8xf32, #tpu.memory_space<smem>>
    %c5_77 = arith.constant 5 : index
    %45 = memref.load %arg5[%c5_77] : memref<8xf32, #tpu.memory_space<smem>>
    %c6_78 = arith.constant 6 : index
    %46 = memref.load %arg5[%c6_78] : memref<8xf32, #tpu.memory_space<smem>>
    %c7_79 = arith.constant 7 : index
    %47 = memref.load %arg5[%c7_79] : memref<8xf32, #tpu.memory_space<smem>>
    %c0_i32 = arith.constant 0 : i32
    %48 = arith.cmpi eq, %arg1, %c0_i32 : i32
    %49 = arith.extui %48 : i1 to i32
    %c0_i32_80 = arith.constant 0 : i32
    %50 = arith.cmpi ne, %49, %c0_i32_80 : i32
    scf.if %50 {
      %cst_172 = arith.constant 0.000000e+00 : f32
      %289 = vector.broadcast %cst_172 : f32 to vector<8x128xf32>
      %c0_173 = arith.constant 0 : index
      %c0_174 = arith.constant 0 : index
      %c0_175 = arith.constant 0 : index
      %290 = vector.load %arg7[%c0_173, %c0_174, %c0_175] : memref<1x8x128xf32, #tpu.memory_space<vmem>>, vector<1x8x128xf32>
      %291 = vector.shape_cast %290 : vector<1x8x128xf32> to vector<8x128xf32>
      %292 = vector.shape_cast %289 : vector<8x128xf32> to vector<1x8x128xf32>
      tpu.vector_store %arg7[%c0_173, %c0_174, %c0_175], %292 {strides = array<i32>} : memref<1x8x128xf32, #tpu.memory_space<vmem>>, vector<1x8x128xf32>,
      %cst_176 = arith.constant 0.000000e+00 : f32
      %293 = vector.broadcast %cst_176 : f32 to vector<8x128xf32>
      %c0_177 = arith.constant 0 : index
      %c0_178 = arith.constant 0 : index
      %c0_179 = arith.constant 0 : index
      %294 = vector.load %arg8[%c0_177, %c0_178, %c0_179] : memref<1x8x128xf32, #tpu.memory_space<vmem>>, vector<1x8x128xf32>
      %295 = vector.shape_cast %294 : vector<1x8x128xf32> to vector<8x128xf32>
      %296 = vector.shape_cast %293 : vector<8x128xf32> to vector<1x8x128xf32>
      tpu.vector_store %arg8[%c0_177, %c0_178, %c0_179], %296 {strides = array<i32>} : memref<1x8x128xf32, #tpu.memory_space<vmem>>, vector<1x8x128xf32>,
    } else {
    }
    %cst = arith.constant 0.000000e+00 : f32
    %51 = vector.broadcast %cst : f32 to vector<1x128xf32>
    %cst_81 = arith.constant 0.000000e+00 : f32
    %52 = vector.broadcast %cst_81 : f32 to vector<1x128xf32>
    %cst_82 = arith.constant 0.000000e+00 : f32
    %53 = vector.broadcast %cst_82 : f32 to vector<1x128xf32>
    %cst_83 = arith.constant 0.000000e+00 : f32
    %54 = vector.broadcast %cst_83 : f32 to vector<1x128xf32>
    %cst_84 = arith.constant 0.000000e+00 : f32
    %55 = vector.broadcast %cst_84 : f32 to vector<1x128xf32>
    %cst_85 = arith.constant 0.000000e+00 : f32
    %56 = vector.broadcast %cst_85 : f32 to vector<1x128xf32>
    %cst_86 = arith.constant 0.000000e+00 : f32
    %57 = vector.broadcast %cst_86 : f32 to vector<1x128xf32>
    %cst_87 = arith.constant 0.000000e+00 : f32
    %58 = vector.broadcast %cst_87 : f32 to vector<1x128xf32>
    %cst_88 = arith.constant 0.000000e+00 : f32
    %59 = vector.broadcast %cst_88 : f32 to vector<1x128xf32>
    %cst_89 = arith.constant 0.000000e+00 : f32
    %60 = vector.broadcast %cst_89 : f32 to vector<1x128xf32>
    %cst_90 = arith.constant 0.000000e+00 : f32
    %61 = vector.broadcast %cst_90 : f32 to vector<1x128xf32>
    %cst_91 = arith.constant 0.000000e+00 : f32
    %62 = vector.broadcast %cst_91 : f32 to vector<1x128xf32>
    %cst_92 = arith.constant 0.000000e+00 : f32
    %63 = vector.broadcast %cst_92 : f32 to vector<1x128xf32>
    %cst_93 = arith.constant 0.000000e+00 : f32
    %64 = vector.broadcast %cst_93 : f32 to vector<1x128xf32>
    %cst_94 = arith.constant 0.000000e+00 : f32
    %65 = vector.broadcast %cst_94 : f32 to vector<1x128xf32>
    %cst_95 = arith.constant 0.000000e+00 : f32
    %66 = vector.broadcast %cst_95 : f32 to vector<1x128xf32>
    %c0_96 = arith.constant 0 : index
    %c0_97 = arith.constant 0 : index
    %c0_98 = arith.constant 0 : index
    %c0_99 = arith.constant 0 : index
    %67 = vector.load %arg2[%c0_96, %c0_97, %c0_98, %c0_99] : memref<1x4x2x128xf32, #tpu.memory_space<vmem>>, vector<1x1x2x128xf32>
    %68 = vector.shape_cast %67 : vector<1x1x2x128xf32> to vector<2x128xf32>
    %69 = vector.broadcast %0 : f32 to vector<2x128xf32>
    %70 = arith.mulf %68, %69 : vector<2x128xf32>
    %71 = vector.broadcast %4 : f32 to vector<2x128xf32>
    %72 = arith.addf %70, %71 : vector<2x128xf32>
    %c0_100 = arith.constant 0 : index
    %c1_101 = arith.constant 1 : index
    %c0_102 = arith.constant 0 : index
    %c0_103 = arith.constant 0 : index
    %73 = vector.load %arg2[%c0_100, %c1_101, %c0_102, %c0_103] : memref<1x4x2x128xf32, #tpu.memory_space<vmem>>, vector<1x1x2x128xf32>
    %74 = vector.shape_cast %73 : vector<1x1x2x128xf32> to vector<2x128xf32>
    %75 = vector.broadcast %1 : f32 to vector<2x128xf32>
    %76 = arith.mulf %74, %75 : vector<2x128xf32>
    %77 = vector.broadcast %5 : f32 to vector<2x128xf32>
    %78 = arith.addf %76, %77 : vector<2x128xf32>
    %c0_104 = arith.constant 0 : index
    %c2_105 = arith.constant 2 : index
    %c0_106 = arith.constant 0 : index
    %c0_107 = arith.constant 0 : index
    %79 = vector.load %arg2[%c0_104, %c2_105, %c0_106, %c0_107] : memref<1x4x2x128xf32, #tpu.memory_space<vmem>>, vector<1x1x2x128xf32>
    %80 = vector.shape_cast %79 : vector<1x1x2x128xf32> to vector<2x128xf32>
    %81 = vector.broadcast %2 : f32 to vector<2x128xf32>
    %82 = arith.mulf %80, %81 : vector<2x128xf32>
    %83 = vector.broadcast %6 : f32 to vector<2x128xf32>
    %84 = arith.addf %82, %83 : vector<2x128xf32>
    %c0_108 = arith.constant 0 : index
    %c3_109 = arith.constant 3 : index
    %c0_110 = arith.constant 0 : index
    %c0_111 = arith.constant 0 : index
    %85 = vector.load %arg2[%c0_108, %c3_109, %c0_110, %c0_111] : memref<1x4x2x128xf32, #tpu.memory_space<vmem>>, vector<1x1x2x128xf32>
    %86 = vector.shape_cast %85 : vector<1x1x2x128xf32> to vector<2x128xf32>
    %87 = vector.broadcast %3 : f32 to vector<2x128xf32>
    %88 = arith.mulf %86, %87 : vector<2x128xf32>
    %89 = vector.broadcast %7 : f32 to vector<2x128xf32>
    %90 = arith.addf %88, %89 : vector<2x128xf32>
    %91 = vector.broadcast %8 : f32 to vector<2x128xf32>
    %92 = arith.mulf %72, %91 : vector<2x128xf32>
    %93 = vector.broadcast %9 : f32 to vector<2x128xf32>
    %94 = arith.mulf %78, %93 : vector<2x128xf32>
    %95 = arith.addf %92, %94 : vector<2x128xf32>
    %96 = vector.broadcast %10 : f32 to vector<2x128xf32>
    %97 = arith.mulf %84, %96 : vector<2x128xf32>
    %98 = arith.addf %95, %97 : vector<2x128xf32>
    %99 = vector.broadcast %11 : f32 to vector<2x128xf32>
    %100 = arith.mulf %90, %99 : vector<2x128xf32>
    %101 = arith.addf %98, %100 : vector<2x128xf32>
    %102 = vector.broadcast %40 : f32 to vector<2x128xf32>
    %103 = arith.addf %101, %102 : vector<2x128xf32>
    %c0_112 = arith.constant 0 : index
    %c0_113 = arith.constant 0 : index
    %c0_114 = arith.constant 0 : index
    %c0_115 = arith.constant 0 : index
    %104 = vector.load %arg6[%c0_112, %c0_113, %c0_114, %c0_115] : memref<1x8x2x128xf32, #tpu.memory_space<vmem>>, vector<1x1x2x128xf32>
    %105 = vector.shape_cast %104 : vector<1x1x2x128xf32> to vector<2x128xf32>
    %106 = vector.shape_cast %103 : vector<2x128xf32> to vector<1x1x2x128xf32>
    tpu.vector_store %arg6[%c0_112, %c0_113, %c0_114, %c0_115], %106 {strides = array<i32>} : memref<1x8x2x128xf32, #tpu.memory_space<vmem>>, vector<1x1x2x128xf32>,
    %cst_116 = arith.constant dense<0.000000e+00> : vector<128xf32>
    %107 = vector.multi_reduction <add>, %103, %cst_116 [0] : vector<2x128xf32> to vector<128xf32>
    %108 = vector.shape_cast %107 : vector<128xf32> to vector<1x128xf32>
    %109 = arith.addf %51, %108 : vector<1x128xf32>
    %110 = arith.mulf %103, %103 : vector<2x128xf32>
    %cst_117 = arith.constant dense<0.000000e+00> : vector<128xf32>
    %111 = vector.multi_reduction <add>, %110, %cst_117 [0] : vector<2x128xf32> to vector<128xf32>
    %112 = vector.shape_cast %111 : vector<128xf32> to vector<1x128xf32>
    %113 = arith.addf %59, %112 : vector<1x128xf32>
    %114 = vector.broadcast %12 : f32 to vector<2x128xf32>
    %115 = arith.mulf %72, %114 : vector<2x128xf32>
    %116 = vector.broadcast %13 : f32 to vector<2x128xf32>
    %117 = arith.mulf %78, %116 : vector<2x128xf32>
    %118 = arith.addf %115, %117 : vector<2x128xf32>
    %119 = vector.broadcast %14 : f32 to vector<2x128xf32>
    %120 = arith.mulf %84, %119 : vector<2x128xf32>
    %121 = arith.addf %118, %120 : vector<2x128xf32>
    %122 = vector.broadcast %15 : f32 to vector<2x128xf32>
    %123 = arith.mulf %90, %122 : vector<2x128xf32>
    %124 = arith.addf %121, %123 : vector<2x128xf32>
    %125 = vector.broadcast %41 : f32 to vector<2x128xf32>
    %126 = arith.addf %124, %125 : vector<2x128xf32>
    %c0_118 = arith.constant 0 : index
    %c1_119 = arith.constant 1 : index
    %c0_120 = arith.constant 0 : index
    %c0_121 = arith.constant 0 : index
    %127 = vector.load %arg6[%c0_118, %c1_119, %c0_120, %c0_121] : memref<1x8x2x128xf32, #tpu.memory_space<vmem>>, vector<1x1x2x128xf32>
    %128 = vector.shape_cast %127 : vector<1x1x2x128xf32> to vector<2x128xf32>
    %129 = vector.shape_cast %126 : vector<2x128xf32> to vector<1x1x2x128xf32>
    tpu.vector_store %arg6[%c0_118, %c1_119, %c0_120, %c0_121], %129 {strides = array<i32>} : memref<1x8x2x128xf32, #tpu.memory_space<vmem>>, vector<1x1x2x128xf32>,
    %cst_122 = arith.constant dense<0.000000e+00> : vector<128xf32>
    %130 = vector.multi_reduction <add>, %126, %cst_122 [0] : vector<2x128xf32> to vector<128xf32>
    %131 = vector.shape_cast %130 : vector<128xf32> to vector<1x128xf32>
    %132 = arith.addf %52, %131 : vector<1x128xf32>
    %133 = arith.mulf %126, %126 : vector<2x128xf32>
    %cst_123 = arith.constant dense<0.000000e+00> : vector<128xf32>
    %134 = vector.multi_reduction <add>, %133, %cst_123 [0] : vector<2x128xf32> to vector<128xf32>
    %135 = vector.shape_cast %134 : vector<128xf32> to vector<1x128xf32>
    %136 = arith.addf %60, %135 : vector<1x128xf32>
    %137 = vector.broadcast %16 : f32 to vector<2x128xf32>
    %138 = arith.mulf %72, %137 : vector<2x128xf32>
    %139 = vector.broadcast %17 : f32 to vector<2x128xf32>
    %140 = arith.mulf %78, %139 : vector<2x128xf32>
    %141 = arith.addf %138, %140 : vector<2x128xf32>
    %142 = vector.broadcast %18 : f32 to vector<2x128xf32>
    %143 = arith.mulf %84, %142 : vector<2x128xf32>
    %144 = arith.addf %141, %143 : vector<2x128xf32>
    %145 = vector.broadcast %19 : f32 to vector<2x128xf32>
    %146 = arith.mulf %90, %145 : vector<2x128xf32>
    %147 = arith.addf %144, %146 : vector<2x128xf32>
    %148 = vector.broadcast %42 : f32 to vector<2x128xf32>
    %149 = arith.addf %147, %148 : vector<2x128xf32>
    %c0_124 = arith.constant 0 : index
    %c2_125 = arith.constant 2 : index
    %c0_126 = arith.constant 0 : index
    %c0_127 = arith.constant 0 : index
    %150 = vector.load %arg6[%c0_124, %c2_125, %c0_126, %c0_127] : memref<1x8x2x128xf32, #tpu.memory_space<vmem>>, vector<1x1x2x128xf32>
    %151 = vector.shape_cast %150 : vector<1x1x2x128xf32> to vector<2x128xf32>
    %152 = vector.shape_cast %149 : vector<2x128xf32> to vector<1x1x2x128xf32>
    tpu.vector_store %arg6[%c0_124, %c2_125, %c0_126, %c0_127], %152 {strides = array<i32>} : memref<1x8x2x128xf32, #tpu.memory_space<vmem>>, vector<1x1x2x128xf32>,
    %cst_128 = arith.constant dense<0.000000e+00> : vector<128xf32>
    %153 = vector.multi_reduction <add>, %149, %cst_128 [0] : vector<2x128xf32> to vector<128xf32>
    %154 = vector.shape_cast %153 : vector<128xf32> to vector<1x128xf32>
    %155 = arith.addf %53, %154 : vector<1x128xf32>
    %156 = arith.mulf %149, %149 : vector<2x128xf32>
    %cst_129 = arith.constant dense<0.000000e+00> : vector<128xf32>
    %157 = vector.multi_reduction <add>, %156, %cst_129 [0] : vector<2x128xf32> to vector<128xf32>
    %158 = vector.shape_cast %157 : vector<128xf32> to vector<1x128xf32>
    %159 = arith.addf %61, %158 : vector<1x128xf32>
    %160 = vector.broadcast %20 : f32 to vector<2x128xf32>
    %161 = arith.mulf %72, %160 : vector<2x128xf32>
    %162 = vector.broadcast %21 : f32 to vector<2x128xf32>
    %163 = arith.mulf %78, %162 : vector<2x128xf32>
    %164 = arith.addf %161, %163 : vector<2x128xf32>
    %165 = vector.broadcast %22 : f32 to vector<2x128xf32>
    %166 = arith.mulf %84, %165 : vector<2x128xf32>
    %167 = arith.addf %164, %166 : vector<2x128xf32>
    %168 = vector.broadcast %23 : f32 to vector<2x128xf32>
    %169 = arith.mulf %90, %168 : vector<2x128xf32>
    %170 = arith.addf %167, %169 : vector<2x128xf32>
    %171 = vector.broadcast %43 : f32 to vector<2x128xf32>
    %172 = arith.addf %170, %171 : vector<2x128xf32>
    %c0_130 = arith.constant 0 : index
    %c3_131 = arith.constant 3 : index
    %c0_132 = arith.constant 0 : index
    %c0_133 = arith.constant 0 : index
    %173 = vector.load %arg6[%c0_130, %c3_131, %c0_132, %c0_133] : memref<1x8x2x128xf32, #tpu.memory_space<vmem>>, vector<1x1x2x128xf32>
    %174 = vector.shape_cast %173 : vector<1x1x2x128xf32> to vector<2x128xf32>
    %175 = vector.shape_cast %172 : vector<2x128xf32> to vector<1x1x2x128xf32>
    tpu.vector_store %arg6[%c0_130, %c3_131, %c0_132, %c0_133], %175 {strides = array<i32>} : memref<1x8x2x128xf32, #tpu.memory_space<vmem>>, vector<1x1x2x128xf32>,
    %cst_134 = arith.constant dense<0.000000e+00> : vector<128xf32>
    %176 = vector.multi_reduction <add>, %172, %cst_134 [0] : vector<2x128xf32> to vector<128xf32>
    %177 = vector.shape_cast %176 : vector<128xf32> to vector<1x128xf32>
    %178 = arith.addf %54, %177 : vector<1x128xf32>
    %179 = arith.mulf %172, %172 : vector<2x128xf32>
    %cst_135 = arith.constant dense<0.000000e+00> : vector<128xf32>
    %180 = vector.multi_reduction <add>, %179, %cst_135 [0] : vector<2x128xf32> to vector<128xf32>
    %181 = vector.shape_cast %180 : vector<128xf32> to vector<1x128xf32>
    %182 = arith.addf %62, %181 : vector<1x128xf32>
    %183 = vector.broadcast %24 : f32 to vector<2x128xf32>
    %184 = arith.mulf %72, %183 : vector<2x128xf32>
    %185 = vector.broadcast %25 : f32 to vector<2x128xf32>
    %186 = arith.mulf %78, %185 : vector<2x128xf32>
    %187 = arith.addf %184, %186 : vector<2x128xf32>
    %188 = vector.broadcast %26 : f32 to vector<2x128xf32>
    %189 = arith.mulf %84, %188 : vector<2x128xf32>
    %190 = arith.addf %187, %189 : vector<2x128xf32>
    %191 = vector.broadcast %27 : f32 to vector<2x128xf32>
    %192 = arith.mulf %90, %191 : vector<2x128xf32>
    %193 = arith.addf %190, %192 : vector<2x128xf32>
    %194 = vector.broadcast %44 : f32 to vector<2x128xf32>
    %195 = arith.addf %193, %194 : vector<2x128xf32>
    %c0_136 = arith.constant 0 : index
    %c4_137 = arith.constant 4 : index
    %c0_138 = arith.constant 0 : index
    %c0_139 = arith.constant 0 : index
    %196 = vector.load %arg6[%c0_136, %c4_137, %c0_138, %c0_139] : memref<1x8x2x128xf32, #tpu.memory_space<vmem>>, vector<1x1x2x128xf32>
    %197 = vector.shape_cast %196 : vector<1x1x2x128xf32> to vector<2x128xf32>
    %198 = vector.shape_cast %195 : vector<2x128xf32> to vector<1x1x2x128xf32>
    tpu.vector_store %arg6[%c0_136, %c4_137, %c0_138, %c0_139], %198 {strides = array<i32>} : memref<1x8x2x128xf32, #tpu.memory_space<vmem>>, vector<1x1x2x128xf32>,
    %cst_140 = arith.constant dense<0.000000e+00> : vector<128xf32>
    %199 = vector.multi_reduction <add>, %195, %cst_140 [0] : vector<2x128xf32> to vector<128xf32>
    %200 = vector.shape_cast %199 : vector<128xf32> to vector<1x128xf32>
    %201 = arith.addf %55, %200 : vector<1x128xf32>
    %202 = arith.mulf %195, %195 : vector<2x128xf32>
    %cst_141 = arith.constant dense<0.000000e+00> : vector<128xf32>
    %203 = vector.multi_reduction <add>, %202, %cst_141 [0] : vector<2x128xf32> to vector<128xf32>
    %204 = vector.shape_cast %203 : vector<128xf32> to vector<1x128xf32>
    %205 = arith.addf %63, %204 : vector<1x128xf32>
    %206 = vector.broadcast %28 : f32 to vector<2x128xf32>
    %207 = arith.mulf %72, %206 : vector<2x128xf32>
    %208 = vector.broadcast %29 : f32 to vector<2x128xf32>
    %209 = arith.mulf %78, %208 : vector<2x128xf32>
    %210 = arith.addf %207, %209 : vector<2x128xf32>
    %211 = vector.broadcast %30 : f32 to vector<2x128xf32>
    %212 = arith.mulf %84, %211 : vector<2x128xf32>
    %213 = arith.addf %210, %212 : vector<2x128xf32>
    %214 = vector.broadcast %31 : f32 to vector<2x128xf32>
    %215 = arith.mulf %90, %214 : vector<2x128xf32>
    %216 = arith.addf %213, %215 : vector<2x128xf32>
    %217 = vector.broadcast %45 : f32 to vector<2x128xf32>
    %218 = arith.addf %216, %217 : vector<2x128xf32>
    %c0_142 = arith.constant 0 : index
    %c5_143 = arith.constant 5 : index
    %c0_144 = arith.constant 0 : index
    %c0_145 = arith.constant 0 : index
    %219 = vector.load %arg6[%c0_142, %c5_143, %c0_144, %c0_145] : memref<1x8x2x128xf32, #tpu.memory_space<vmem>>, vector<1x1x2x128xf32>
    %220 = vector.shape_cast %219 : vector<1x1x2x128xf32> to vector<2x128xf32>
    %221 = vector.shape_cast %218 : vector<2x128xf32> to vector<1x1x2x128xf32>
    tpu.vector_store %arg6[%c0_142, %c5_143, %c0_144, %c0_145], %221 {strides = array<i32>} : memref<1x8x2x128xf32, #tpu.memory_space<vmem>>, vector<1x1x2x128xf32>,
    %cst_146 = arith.constant dense<0.000000e+00> : vector<128xf32>
    %222 = vector.multi_reduction <add>, %218, %cst_146 [0] : vector<2x128xf32> to vector<128xf32>
    %223 = vector.shape_cast %222 : vector<128xf32> to vector<1x128xf32>
    %224 = arith.addf %56, %223 : vector<1x128xf32>
    %225 = arith.mulf %218, %218 : vector<2x128xf32>
    %cst_147 = arith.constant dense<0.000000e+00> : vector<128xf32>
    %226 = vector.multi_reduction <add>, %225, %cst_147 [0] : vector<2x128xf32> to vector<128xf32>
    %227 = vector.shape_cast %226 : vector<128xf32> to vector<1x128xf32>
    %228 = arith.addf %64, %227 : vector<1x128xf32>
    %229 = vector.broadcast %32 : f32 to vector<2x128xf32>
    %230 = arith.mulf %72, %229 : vector<2x128xf32>
    %231 = vector.broadcast %33 : f32 to vector<2x128xf32>
    %232 = arith.mulf %78, %231 : vector<2x128xf32>
    %233 = arith.addf %230, %232 : vector<2x128xf32>
    %234 = vector.broadcast %34 : f32 to vector<2x128xf32>
    %235 = arith.mulf %84, %234 : vector<2x128xf32>
    %236 = arith.addf %233, %235 : vector<2x128xf32>
    %237 = vector.broadcast %35 : f32 to vector<2x128xf32>
    %238 = arith.mulf %90, %237 : vector<2x128xf32>
    %239 = arith.addf %236, %238 : vector<2x128xf32>
    %240 = vector.broadcast %46 : f32 to vector<2x128xf32>
    %241 = arith.addf %239, %240 : vector<2x128xf32>
    %c0_148 = arith.constant 0 : index
    %c6_149 = arith.constant 6 : index
    %c0_150 = arith.constant 0 : index
    %c0_151 = arith.constant 0 : index
    %242 = vector.load %arg6[%c0_148, %c6_149, %c0_150, %c0_151] : memref<1x8x2x128xf32, #tpu.memory_space<vmem>>, vector<1x1x2x128xf32>
    %243 = vector.shape_cast %242 : vector<1x1x2x128xf32> to vector<2x128xf32>
    %244 = vector.shape_cast %241 : vector<2x128xf32> to vector<1x1x2x128xf32>
    tpu.vector_store %arg6[%c0_148, %c6_149, %c0_150, %c0_151], %244 {strides = array<i32>} : memref<1x8x2x128xf32, #tpu.memory_space<vmem>>, vector<1x1x2x128xf32>,
    %cst_152 = arith.constant dense<0.000000e+00> : vector<128xf32>
    %245 = vector.multi_reduction <add>, %241, %cst_152 [0] : vector<2x128xf32> to vector<128xf32>
    %246 = vector.shape_cast %245 : vector<128xf32> to vector<1x128xf32>
    %247 = arith.addf %57, %246 : vector<1x128xf32>
    %248 = arith.mulf %241, %241 : vector<2x128xf32>
    %cst_153 = arith.constant dense<0.000000e+00> : vector<128xf32>
    %249 = vector.multi_reduction <add>, %248, %cst_153 [0] : vector<2x128xf32> to vector<128xf32>
    %250 = vector.shape_cast %249 : vector<128xf32> to vector<1x128xf32>
    %251 = arith.addf %65, %250 : vector<1x128xf32>
    %252 = vector.broadcast %36 : f32 to vector<2x128xf32>
    %253 = arith.mulf %72, %252 : vector<2x128xf32>
    %254 = vector.broadcast %37 : f32 to vector<2x128xf32>
    %255 = arith.mulf %78, %254 : vector<2x128xf32>
    %256 = arith.addf %253, %255 : vector<2x128xf32>
    %257 = vector.broadcast %38 : f32 to vector<2x128xf32>
    %258 = arith.mulf %84, %257 : vector<2x128xf32>
    %259 = arith.addf %256, %258 : vector<2x128xf32>
    %260 = vector.broadcast %39 : f32 to vector<2x128xf32>
    %261 = arith.mulf %90, %260 : vector<2x128xf32>
    %262 = arith.addf %259, %261 : vector<2x128xf32>
    %263 = vector.broadcast %47 : f32 to vector<2x128xf32>
    %264 = arith.addf %262, %263 : vector<2x128xf32>
    %c0_154 = arith.constant 0 : index
    %c7_155 = arith.constant 7 : index
    %c0_156 = arith.constant 0 : index
    %c0_157 = arith.constant 0 : index
    %265 = vector.load %arg6[%c0_154, %c7_155, %c0_156, %c0_157] : memref<1x8x2x128xf32, #tpu.memory_space<vmem>>, vector<1x1x2x128xf32>
    %266 = vector.shape_cast %265 : vector<1x1x2x128xf32> to vector<2x128xf32>
    %267 = vector.shape_cast %264 : vector<2x128xf32> to vector<1x1x2x128xf32>
    tpu.vector_store %arg6[%c0_154, %c7_155, %c0_156, %c0_157], %267 {strides = array<i32>} : memref<1x8x2x128xf32, #tpu.memory_space<vmem>>, vector<1x1x2x128xf32>,
    %cst_158 = arith.constant dense<0.000000e+00> : vector<128xf32>
    %268 = vector.multi_reduction <add>, %264, %cst_158 [0] : vector<2x128xf32> to vector<128xf32>
    %269 = vector.shape_cast %268 : vector<128xf32> to vector<1x128xf32>
    %270 = arith.addf %58, %269 : vector<1x128xf32>
    %271 = arith.mulf %264, %264 : vector<2x128xf32>
    %cst_159 = arith.constant dense<0.000000e+00> : vector<128xf32>
    %272 = vector.multi_reduction <add>, %271, %cst_159 [0] : vector<2x128xf32> to vector<128xf32>
    %273 = vector.shape_cast %272 : vector<128xf32> to vector<1x128xf32>
    %274 = arith.addf %66, %273 : vector<1x128xf32>
    %c0_160 = arith.constant 0 : index
    %c0_161 = arith.constant 0 : index
    %c0_162 = arith.constant 0 : index
    %275 = vector.load %arg7[%c0_160, %c0_161, %c0_162] : memref<1x8x128xf32, #tpu.memory_space<vmem>>, vector<1x8x128xf32>
    %276 = vector.shape_cast %275 : vector<1x8x128xf32> to vector<8x128xf32>
    %277 = tpu.concatenate %109, %132, %155, %178, %201, %224, %247, %270 in 0 : vector<1x128xf32>, vector<1x128xf32>, vector<1x128xf32>, vector<1x128xf32>, vector<1x128xf32>, vector<1x128xf32>, vector<1x128xf32>, vector<1x128xf32> -> vector<8x128xf32>
    %278 = arith.addf %276, %277 : vector<8x128xf32>
    %c0_163 = arith.constant 0 : index
    %c0_164 = arith.constant 0 : index
    %c0_165 = arith.constant 0 : index
    %279 = vector.load %arg7[%c0_163, %c0_164, %c0_165] : memref<1x8x128xf32, #tpu.memory_space<vmem>>, vector<1x8x128xf32>
    %280 = vector.shape_cast %279 : vector<1x8x128xf32> to vector<8x128xf32>
    %281 = vector.shape_cast %278 : vector<8x128xf32> to vector<1x8x128xf32>
    tpu.vector_store %arg7[%c0_163, %c0_164, %c0_165], %281 {strides = array<i32>} : memref<1x8x128xf32, #tpu.memory_space<vmem>>, vector<1x8x128xf32>,
    %c0_166 = arith.constant 0 : index
    %c0_167 = arith.constant 0 : index
    %c0_168 = arith.constant 0 : index
    %282 = vector.load %arg8[%c0_166, %c0_167, %c0_168] : memref<1x8x128xf32, #tpu.memory_space<vmem>>, vector<1x8x128xf32>
    %283 = vector.shape_cast %282 : vector<1x8x128xf32> to vector<8x128xf32>
    %284 = tpu.concatenate %113, %136, %159, %182, %205, %228, %251, %274 in 0 : vector<1x128xf32>, vector<1x128xf32>, vector<1x128xf32>, vector<1x128xf32>, vector<1x128xf32>, vector<1x128xf32>, vector<1x128xf32>, vector<1x128xf32> -> vector<8x128xf32>
    %285 = arith.addf %283, %284 : vector<8x128xf32>
    %c0_169 = arith.constant 0 : index
    %c0_170 = arith.constant 0 : index
    %c0_171 = arith.constant 0 : index
    %286 = vector.load %arg8[%c0_169, %c0_170, %c0_171] : memref<1x8x128xf32, #tpu.memory_space<vmem>>, vector<1x8x128xf32>
    %287 = vector.shape_cast %286 : vector<1x8x128xf32> to vector<8x128xf32>
    %288 = vector.shape_cast %285 : vector<8x128xf32> to vector<1x8x128xf32>
    tpu.vector_store %arg8[%c0_169, %c0_170, %c0_171], %288 {strides = array<i32>} : memref<1x8x128xf32, #tpu.memory_space<vmem>>, vector<1x8x128xf32>,
    return
  }
  func.func @transform_0(%arg0: i32, %arg1: i32) -> (i32, i32, i32, i32) {
    %c0_i32 = arith.constant 0 : i32
    %c0_i32_0 = arith.constant 0 : i32
    %c0_i32_1 = arith.constant 0 : i32
    return %arg0, %c0_i32, %arg1, %c0_i32_0 : i32, i32, i32, i32
  }
  func.func @transform_1(%arg0: i32, %arg1: i32) -> (i32, i32) {
    %c0_i32 = arith.constant 0 : i32
    %c0_i32_0 = arith.constant 0 : i32
    %c0_i32_1 = arith.constant 0 : i32
    return %c0_i32, %c0_i32_0 : i32, i32
  }
  func.func @transform_2(%arg0: i32, %arg1: i32) -> (i32, i32) {
    %c0_i32 = arith.constant 0 : i32
    %c0_i32_0 = arith.constant 0 : i32
    %c0_i32_1 = arith.constant 0 : i32
    return %c0_i32, %c0_i32_0 : i32, i32
  }
  func.func @transform_3(%arg0: i32, %arg1: i32) -> i32 {
    %c0_i32 = arith.constant 0 : i32
    %c0_i32_0 = arith.constant 0 : i32
    return %c0_i32 : i32
  }
  func.func @transform_4(%arg0: i32, %arg1: i32) -> (i32, i32, i32, i32) {
    %c0_i32 = arith.constant 0 : i32
    %c0_i32_0 = arith.constant 0 : i32
    %c0_i32_1 = arith.constant 0 : i32
    return %arg0, %c0_i32, %arg1, %c0_i32_0 : i32, i32, i32, i32
  }
  func.func @transform_5(%arg0: i32, %arg1: i32) -> (i32, i32, i32) {
    %c0_i32 = arith.constant 0 : i32
    %c0_i32_0 = arith.constant 0 : i32
    %c0_i32_1 = arith.constant 0 : i32
    return %arg0, %c0_i32, %c0_i32_0 : i32, i32, i32
  }
  func.func @transform_6(%arg0: i32, %arg1: i32) -> (i32, i32, i32) {
    %c0_i32 = arith.constant 0 : i32
    %c0_i32_0 = arith.constant 0 : i32
    %c0_i32_1 = arith.constant 0 : i32
    return %arg0, %c0_i32, %c0_i32_0 : i32, i32, i32
  }
}

</mosaic_0001>

<bundles_post_ra>
// kernel: fis_autoencoder_forward.4
= control target key start
LH: loop header
LB: loop body
LE: loop exit
PB: predicated region body
PF: predicated region fallthrough
CT: control target
= control target key end

     0   :  { %10 = vsyncpa [#allocation3], 0  ;;  %s896_s15 = smov 0   ;;  %s898_s16 = smov 0   ;;  %s1103_s0 = inlined_call_operand.vmem [shape: f32[2,4,2,128], index: 0, kind: input, shape index: {}]   ;;  %s1104_s1 = inlined_call_operand.vmem [shape: f32[8,4], index: 1, kind: input, shape index: {}]   ;;  %s1105_s2 = inlined_call_operand.vmem [shape: f32[2,8,2,128], index: 2, kind: output, shape index: {0}]   ;;  %s1106_s3 = inlined_call_operand.vmem [shape: f32[2,8,128], index: 3, kind: output, shape index: {1}]   ;;  %s1107_s4 = inlined_call_operand.vmem [shape: f32[2,8,128], index: 4, kind: output, shape index: {2}]  }
   0x1   :  { %s900_s17 = smov 0  }
   0x2 LB: > { %s733_s18 = sadd.s32 4294967295, %s868_s17   ;;  %s28_s19 = sadd.s32 1, %s864_s16  ;;  %s868_s17 = sphi %s900_s17, %s16_s17   ;;  %s864_s16 = sphi %s898_s16, %s1109_s16   ;;  %s860_s15 = sphi %s896_s15, %s1108_s15  }
   0x3   : > { %p30_p0 = scmp.ge.s32.totalorder %s28_s19, 2  ;;  %p735_p1 = scmp.ge.s32.totalorder %s868_s17, 1 }
   0x4   : > { %p162_p2 = scmp.lt.s32.totalorder %s868_s17, 3  ;;  %p799_p4 = scmp.eq.s32.totalorder %s733_s18, 0 }
   0x5   : > { %s1111_s19 = smov (%p30_p0, %s28_s19), 0  ;;  %s174_s22 = sshll.u32 %s1104_s1, 4  ;;  %s175_s22 = int_to_ptr.vmem [resolvable:$true] %s174_s22 }
   0x6   : > { %p163_p3 = pnand %p735_p1, %p162_p2  ;;  %s870_s23 = smov [#allocation2]  }
   0x8   : > { %p795_p5 = pneg %p163_p3  ;;  %198 = sbr.rel (%p163_p3) target bundleno = 91 (0x5b), region = 28 }
   0xa   : > { %p796_p6 = pnand %p799_p4, %p795_p5 }
   0xc   : > { %798 = dma.vmem_to_smem (!%p796_p6), %s175_s22, 128, %s870_s23, [#allocation3]  }
   0xd   : > { %855 = dma.done.wait (%p799_p4), [#allocation3], 128  }
   0xe   : > { %857 = vsyncadd (%p799_p4), [#allocation3], 4294967168 }
   0xf   : > { %205 = sfence }
  0x10   : > { %p240_p7 = scmp.lt.s32.totalorder %s860_s15, 1  ;;  %s264_s24 = sld [smem:[#allocation2]]  ;;  %vm321_vm0 = vcmask 1041408   ;;  %vm550_vm1 = vcmask 1040384   ;;  %vm553_vm2 = vcmask 1042432   ;;  %vm555_vm3 = vcmask 1043456  }
  0x11   : > { %s746_s25 = sld [smem:[#allocation2 + $0x1]]  ;;  %vm557_vm4 = vcmask 1044480   ;;  %vm559_vm5 = vcmask 1045504   ;;  %vm561_vm6 = vcmask 1046528  }
  0x12   : > { %s1113_s15 = smov (!%p240_p7, %s860_s15), 1  ;;  %s747_s26 = sld [smem:[#allocation2 + $0x2]] }
  0x13   : > { %s921_s27 = sshll.u32 %s1113_s15, 3  ;;  %s748_s5 = sld [smem:[#allocation2 + $0x3]] }
  0x14   : > { %s247_s30 = scalar_lea.vmem %s1103_s0, %s921_s27  ;;  %s749_s6 = sld [smem:[#allocation2 + $0x80]] }
  0x15   : > { %v927_v0 = vld [vmem:[%s247_s30] sm:$0x3]  ;;  %v929_v1 = vld [vmem:[%s247_s30 + $0x2] sm:$0x3]  ;;  %v931_v3 = vld [vmem:[%s247_s30 + $0x4] sm:$0x3] }
  0x16   : > { %v309_v2 = vstv %s264_s24  ;;  %s750_s7 = sld [smem:[#allocation2 + $0x81]]  ;;  %v936_v10 = vld [vmem:[%s247_s30 + $0x6] sm:$0x3]  ;;  %s790_s10 = sshll.u32 %s1113_s15, 4 }
  0x17   : > { %v310_v4 = vadd.f32 %v309_v2, %v927_v0  ;;  %v311_v5 = vstv %s746_s25  ;;  %s751_s8 = sld [smem:[#allocation2 + $0x82]]  ;;  %s945_s20 = scalar_lea.vmem %s1105_s2, %s790_s10 }
  0x18   : > { %v312_v6 = vadd.f32 %v929_v1, %v311_v5  ;;  %v314_v7 = vstv %s747_s26  ;;  %s752_s9 = sld [smem:[#allocation2 + $0x83]] }
  0x19   : > { %v315_v9 = vadd.f32 %v931_v3, %v314_v7  ;;  %s753_s11 = sld [smem:[#allocation2 + $0x100]]  ;;  %v317_v12 = vstv %s748_s5 }
  0x1a   : > { %v313_v8 = vmax.f32 %v310_v4, %v312_v6  ;;  %s754_s12 = sld [smem:[#allocation2 + $0x101]]  ;;  %v318_v13 = vadd.f32 %v936_v10, %v317_v12  ;;  %v339_v14 = vstv %s749_s6 }
  0x1b   : > { %s940_s13 = sld [smem:[#allocation2 + $0x102]]  ;;  %v340_v15 = vadd.f32 %v339_v14, %v927_v0 }
  0x1c   : > { %v316_v11 = vmax.f32 %v313_v8, %v315_v9  ;;  %v341_v16 = vstv %s750_s7  ;;  %s756_s15 = sld [smem:[#allocation2 + $0x103]] }
  0x1d   : > { %v342_v18 = vadd.f32 %v929_v1, %v341_v16  ;;  %v344_v19 = vstv %s751_s8  ;;  %s949_s21 = sld [smem:[#allocation2 + $0x180]] }
  0x1e   : > { %v319_v17 = vmax.f32 %v316_v11, %v318_v13  ;;  %v345_v20 = vadd.f32 %v931_v3, %v344_v19  ;;  %v347_v21 = vstv %s752_s9  ;;  %s952_s22 = sld [smem:[#allocation2 + $0x181]] }
  0x1f   : > { %v343_v24 = vmax.f32 %v340_v15, %v342_v18  ;;  %v348_v25 = vadd.f32 %v936_v10, %v347_v21  ;;  %s957_s23 = sld [smem:[#allocation2 + $0x182]]  ;;  %v369_v27 = vstv %s753_s11 }
  0x20   : > { %320 = vst [vmem:[%s945_s20] sm:$0x3] %v319_v17  ;;  %v322_v22 = vsel %vm321_vm0, %v319_v17, 0.0  ;;  %v330_v23 = vmul.f32 %v319_v17, %v319_v17  ;;  %v371_v28 = vstv %s754_s12  ;;  %s959_s24 = sld [smem:[#allocation2 + $0x183]]  ;;  %v370_v31 = vadd.f32 %v369_v27, %v927_v0 }
  0x21   : > { %v323_v26 = vrot.slane %v322_v22, 4  ;;  %v346_v30 = vmax.f32 %v343_v24, %v345_v20  ;;  %v372_v32 = vadd.f32 %v929_v1, %v371_v28  ;;  %v374_v35 = vstv %s940_s13  ;;  %s969_s25 = sld [smem:[#allocation2 + $0x200]] }
  0x22   : > { %v331_v29 = vsel %vm321_vm0, %v330_v23, 0.0  ;;  %v377_v36 = vstv %s756_s15  ;;  %v375_v39 = vadd.f32 %v931_v3, %v374_v35  ;;  %s974_s26 = sld [smem:[#allocation2 + $0x201]] }
  0x23   : > { %v324_v33 = vadd.f32 %v323_v26, %v322_v22  ;;  %v332_v34 = vrot.slane %v331_v29, 4  ;;  %v349_v37 = vmax.f32 %v346_v30, %v348_v25  ;;  %v373_v38 = vmax.f32 %v370_v31, %v372_v32  ;;  %s983_s28 = sld [smem:[#allocation2 + $0x202]] }
  0x24   : > { %v378_v40 = vadd.f32 %v936_v10, %v377_v36  ;;  %v399_v42 = vstv %s949_s21  ;;  %v401_v43 = vstv %s952_s22  ;;  %s985_s29 = sld [smem:[#allocation2 + $0x203]]  ;;  %s259_s21 = scalar_lea.vmem %s1106_s3, %s921_s27 }
  0x25   : > { %v333_v41 = vadd.f32 %v332_v34, %v331_v29  ;;  %780 = vst [vmem:[%s945_s20 + $0x2] sm:$0x3] %v349_v37  ;;  %v352_v44 = vsel %vm321_vm0, %v349_v37, 0.0  ;;  %v360_v45 = vmul.f32 %v349_v37, %v349_v37  ;;  %v376_v46 = vmax.f32 %v373_v38, %v375_v39  ;;  %s989_s30 = sld [smem:[#allocation2 + $0x280]] }
  0x26   : > { %v400_v47 = vadd.f32 %v399_v42, %v927_v0  ;;  %v325_v48 = vrot.slane %v324_v33, 2  ;;  %v353_v49 = vrot.slane %v352_v44, 4  ;;  %v402_v50 = vadd.f32 %v929_v1, %v401_v43  ;;  %s991_s5 = sld [smem:[#allocation2 + $0x281]] }
  0x27   : > { %v361_v51 = vsel %vm321_vm0, %v360_v45, 0.0  ;;  %v379_v52 = vmax.f32 %v376_v46, %v378_v40  ;;  %v404_v53 = vstv %s957_s23  ;;  %v334_v54 = vrot.slane %v333_v41, 2  ;;  %s995_s6 = sld [smem:[#allocation2 + $0x282]] }
  0x28   : > { %v354_v55 = vadd.f32 %v353_v49, %v352_v44  ;;  %v362_v56 = vrot.slane %v361_v51, 4  ;;  %v407_v57 = vstv %s959_s24  ;;  %v403_v60 = vmax.f32 %v400_v47, %v402_v50  ;;  %s998_s7 = sld [smem:[#allocation2 + $0x283]]  ;;  %s263_s24 = scalar_lea.vmem %s1107_s4, %s921_s27 }
  0x29   : > { %781 = vst [vmem:[%s945_s20 + $0x4] sm:$0x3] %v379_v52  ;;  %v382_v58 = vsel %vm321_vm0, %v379_v52, 0.0  ;;  %v390_v59 = vmul.f32 %v379_v52, %v379_v52  ;;  %v405_v61 = vadd.f32 %v931_v3, %v404_v53  ;;  %v326_v62 = vadd.f32 %v325_v48, %v324_v33  ;;  %s1003_s8 = sld [smem:[#allocation2 + $0x300]] }
  0x2a   : > { %v355_v63 = vrot.slane %v354_v55, 2  ;;  %v363_v2 = vadd.f32 %v362_v56, %v361_v51  ;;  %v383_v4 = vrot.slane %v382_v58, 4  ;;  %v408_v7 = vadd.f32 %v936_v10, %v407_v57  ;;  %s1007_s9 = sld [smem:[#allocation2 + $0x301]] }
  0x2b   : > { %v391_v5 = vsel %vm321_vm0, %v390_v59, 0.0  ;;  %v406_v6 = vmax.f32 %v403_v60, %v405_v61  ;;  %v335_v8 = vadd.f32 %v334_v54, %v333_v41  ;;  %v429_v15 = vstv %s969_s25  ;;  %s1013_s10 = sld [smem:[#allocation2 + $0x302]] }
  0x2c   : > { %v356_v9 = vadd.f32 %v355_v63, %v354_v55  ;;  %v364_v11 = vrot.slane %v363_v2, 2  ;;  %v392_v12 = vrot.slane %v391_v5, 4  ;;  %v384_v13 = vadd.f32 %v383_v4, %v382_v58  ;;  %s1021_s11 = sld [smem:[#allocation2 + $0x303]] }
  0x2d   : > { %v409_v14 = vmax.f32 %v406_v6, %v408_v7  ;;  %v431_v16 = vstv %s974_s26  ;;  %v327_v17 = vrot.slane %v326_v62, 1  ;;  %v430_v20 = vadd.f32 %v429_v15, %v927_v0  ;;  %s1030_s12 = sld [smem:[#allocation2 + $0x380]] }
  0x2e   : > { %v357_v18 = vrot.slane %v356_v9, 1  ;;  %v393_v19 = vadd.f32 %v392_v12, %v391_v5  ;;  %v385_v21 = vrot.slane %v384_v13, 2  ;;  %v432_v24 = vadd.f32 %v929_v1, %v431_v16  ;;  %s1038_s13 = sld [smem:[#allocation2 + $0x381]] }
  0x2f   : > { %782 = vst [vmem:[%s945_s20 + $0x6] sm:$0x3] %v409_v14  ;;  %v412_v22 = vsel %vm321_vm0, %v409_v14, 0.0  ;;  %v420_v23 = vmul.f32 %v409_v14, %v409_v14  ;;  %v336_v25 = vrot.slane %v335_v8, 1  ;;  %v1005_v26 = vadd.f32 %v364_v11, %v363_v2  ;;  %s1042_s14 = sld [smem:[#allocation2 + $0x382]] }
  0x30   : > { %v394_v27 = vrot.slane %v393_v19, 2  ;;  %v413_v28 = vrot.slane %v412_v22, 4  ;;  %v433_v30 = vmax.f32 %v430_v20, %v432_v24  ;;  %v434_v31 = vstv %s983_s28  ;;  %s1051_s18 = sld [smem:[#allocation2 + $0x383]] }
  0x31   : > { %v421_v29 = vsel %vm321_vm0, %v420_v23, 0.0  ;;  %v328_v32 = vadd.f32 %v327_v17, %v326_v62  ;;  %v358_v33 = vadd.f32 %v357_v18, %v356_v9  ;;  %v386_v34 = vadd.f32 %v385_v21, %v384_v13 }
  0x32   : > { %v422_v35 = vrot.slane %v421_v29, 4  ;;  %v435_v36 = vadd.f32 %v931_v3, %v434_v31  ;;  %v437_v37 = vstv %s985_s29  ;;  %v1015_v38 = vadd.f32 %v336_v25, %v335_v8 }
  0x33   : > { %v1017_v39 = vadd.f32 %v394_v27, %v393_v19  ;;  %v438_v40 = vadd.f32 %v936_v10, %v437_v37  ;;  %v459_v41 = vstv %s989_s30  ;;  %v366_v42 = vrot.slane %v1005_v26, 1 }
  0x34   : > { %v414_v43 = vadd.f32 %v413_v28, %v412_v22  ;;  %v436_v44 = vmax.f32 %v433_v30, %v435_v36  ;;  %v460_v45 = vadd.f32 %v459_v41, %v927_v0  ;;  %v1026_v46 = vsel %vm550_vm1, %v328_v32, %v358_v33 }
  0x35   : > { %v387_v47 = vrot.slane %v386_v34, 1  ;;  %v461_v48 = vstv %s991_s5  ;;  %v464_v49 = vstv %s995_s6  ;;  %v423_v50 = vadd.f32 %v422_v35, %v421_v29 }
  0x36   : > { %v439_v51 = vmax.f32 %v436_v44, %v438_v40  ;;  %v462_v52 = vadd.f32 %v929_v1, %v461_v48  ;;  %v465_v53 = vadd.f32 %v931_v3, %v464_v49  ;;  %v396_v54 = vrot.slane %v1017_v39, 1 }
  0x37   : > { %v467_v55 = vstv %s998_s7  ;;  %v489_v56 = vstv %s1003_s8  ;;  %v491_v57 = vstv %s1007_s9  ;;  %v415_v58 = vrot.slane %v414_v43, 2 }
  0x38   : > { %783 = vst [vmem:[%s945_s20 + $0x8] sm:$0x3] %v439_v51  ;;  %v442_v59 = vsel %vm321_vm0, %v439_v51, 0.0  ;;  %v450_v60 = vmul.f32 %v439_v51, %v439_v51  ;;  %v463_v61 = vmax.f32 %v460_v45, %v462_v52  ;;  %v388_v62 = vadd.f32 %v387_v47, %v386_v34 }
  0x39   : > { %v443_v63 = vrot.slane %v442_v59, 4  ;;  %v468_v2 = vadd.f32 %v936_v10, %v467_v55  ;;  %v490_v4 = vadd.f32 %v489_v56, %v927_v0  ;;  %v424_v5 = vrot.slane %v423_v50, 2 }
  0x3a   : > { %v451_v6 = vsel %vm321_vm0, %v450_v60, 0.0  ;;  %v466_v7 = vmax.f32 %v463_v61, %v465_v53  ;;  %v492_v8 = vadd.f32 %v929_v1, %v491_v57  ;;  %v494_v12 = vstv %s1013_s10 }
  0x3b   : > { %v444_v9 = vadd.f32 %v443_v63, %v442_v59  ;;  %v452_v11 = vrot.slane %v451_v6, 4  ;;  %v497_v13 = vstv %s1021_s11  ;;  %v416_v14 = vadd.f32 %v415_v58, %v414_v43 }
  0x3c   : > { %v469_v15 = vmax.f32 %v466_v7, %v468_v2  ;;  %v493_v16 = vmax.f32 %v490_v4, %v492_v8  ;;  %v495_v17 = vadd.f32 %v931_v3, %v494_v12  ;;  %v498_v20 = vadd.f32 %v936_v10, %v497_v13 }
  0x3d   : > { %v445_v18 = vrot.slane %v444_v9, 2  ;;  %v453_v19 = vadd.f32 %v452_v11, %v451_v6  ;;  %v519_v21 = vstv %s1030_s12  ;;  %v425_v27 = vadd.f32 %v424_v5, %v423_v50 }
  0x3e   : > { %784 = vst [vmem:[%s945_s20 + $0xa] sm:$0x3] %v469_v15  ;;  %v472_v22 = vsel %vm321_vm0, %v469_v15, 0.0  ;;  %v480_v23 = vmul.f32 %v469_v15, %v469_v15  ;;  %v496_v24 = vmax.f32 %v493_v16, %v495_v17  ;;  %v520_v25 = vadd.f32 %v519_v21, %v927_v0 }
  0x3f   : > { %v454_v28 = vrot.slane %v453_v19, 2  ;;  %v473_v29 = vrot.slane %v472_v22, 4  ;;  %v521_v30 = vstv %s1038_s13  ;;  %v524_v34 = vstv %s1042_s14 }
  0x40   : > { %v481_v31 = vsel %vm321_vm0, %v480_v23, 0.0  ;;  %v499_v32 = vmax.f32 %v496_v24, %v498_v20  ;;  %v522_v33 = vadd.f32 %v929_v1, %v521_v30  ;;  %v417_v35 = vrot.slane %v416_v14, 1 }
  0x41   : > { %v446_v36 = vadd.f32 %v445_v18, %v444_v9  ;;  %v474_v37 = vadd.f32 %v473_v29, %v472_v22  ;;  %v482_v40 = vrot.slane %v481_v31, 4  ;;  %v525_v44 = vadd.f32 %v931_v3, %v524_v34 }
  0x42   : > { %785 = vst [vmem:[%s945_s20 + $0xc] sm:$0x3] %v499_v32  ;;  %v502_v41 = vsel %vm321_vm0, %v499_v32, 0.0  ;;  %v510_v43 = vmul.f32 %v499_v32, %v499_v32  ;;  %v523_v0 = vmax.f32 %v520_v25, %v522_v33  ;;  %v426_v45 = vrot.slane %v425_v27, 1 }
  0x43   : > { %v455_v47 = vadd.f32 %v454_v28, %v453_v19  ;;  %v475_v48 = vrot.slane %v474_v37, 2  ;;  %v483_v49 = vadd.f32 %v482_v40, %v481_v31  ;;  %v503_v50 = vrot.slane %v502_v41, 4 }
  0x44   : > { %v511_v1 = vsel %vm321_vm0, %v510_v43, 0.0  ;;  %v526_v51 = vmax.f32 %v523_v0, %v525_v44  ;;  %v527_v52 = vstv %s1051_s18  ;;  %v447_v53 = vrot.slane %v446_v36, 1 }
  0x45   : > { %v476_v55 = vadd.f32 %v475_v48, %v474_v37  ;;  %v484_v56 = vrot.slane %v483_v49, 2  ;;  %v512_v57 = vrot.slane %v511_v1, 4  ;;  %v367_v58 = vadd.f32 %v366_v42, %v1005_v26 }
  0x46   : > { %v418_v59 = vadd.f32 %v417_v35, %v416_v14  ;;  %v504_v3 = vadd.f32 %v503_v50, %v502_v41  ;;  %v528_v60 = vadd.f32 %v936_v10, %v527_v52  ;;  %v552_v2 = vsel %vm321_vm0, %v1026_v46, %v388_v62 }
  0x47   : > { %v485_v61 = vadd.f32 %v484_v56, %v483_v49  ;;  %v513_v63 = vadd.f32 %v512_v57, %v511_v1  ;;  %v397_v4 = vadd.f32 %v396_v54, %v1017_v39  ;;  %v456_v5 = vrot.slane %v455_v47, 1 }
  0x48   : > { %v505_v6 = vrot.slane %v504_v3, 2  ;;  %v529_v7 = vmax.f32 %v526_v51, %v528_v60  ;;  %v427_v8 = vadd.f32 %v426_v45, %v425_v27  ;;  %v448_v26 = vadd.f32 %v447_v53, %v446_v36 }
  0x49   : > { %v477_v42 = vrot.slane %v476_v55, 1  ;;  %v514_v9 = vrot.slane %v513_v63, 2  ;;  %v554_v13 = vsel %vm553_vm2, %v552_v2, %v418_v59  ;;  %v486_v46 = vrot.slane %v485_v61, 1 }
  0x4a   : > { %v506_v11 = vadd.f32 %v505_v6, %v504_v3  ;;  %786 = vst [vmem:[%s945_s20 + $0xe] sm:$0x3] %v529_v7  ;;  %v532_v10 = vsel %vm321_vm0, %v529_v7, 0.0  ;;  %v540_v12 = vmul.f32 %v529_v7, %v529_v7  ;;  %v457_v15 = vadd.f32 %v456_v5, %v455_v47 }
  0x4b   : > { %v515_v62 = vadd.f32 %v514_v9, %v513_v63  ;;  %v533_v14 = vrot.slane %v532_v10, 4  ;;  %v566_v16 = vsel %vm550_vm1, %v1015_v38, %v367_v58  ;;  %v478_v17 = vadd.f32 %v477_v42, %v476_v55 }
  0x4c   : > { %v507_v39 = vrot.slane %v506_v11, 1  ;;  %v541_v54 = vsel %vm321_vm0, %v540_v12, 0.0  ;;  %v567_v20 = vsel %vm321_vm0, %v566_v16, %v397_v4  ;;  %v556_v21 = vsel %vm555_vm3, %v554_v13, %v448_v26 }
  0x4d   : > { %v534_v18 = vadd.f32 %v533_v14, %v532_v10  ;;  %v542_v19 = vrot.slane %v541_v54, 4  ;;  %v516_v22 = vrot.slane %v515_v62, 1  ;;  %v568_v23 = vsel %vm553_vm2, %v567_v20, %v427_v8 }
  0x4e   : > { %v487_v27 = vadd.f32 %v486_v46, %v485_v61  ;;  %v508_v28 = vadd.f32 %v507_v39, %v506_v11  ;;  %v569_v29 = vsel %vm555_vm3, %v568_v23, %v457_v15  ;;  %v558_v31 = vsel %vm557_vm4, %v556_v21, %v478_v17 }
  0x4f   : > { %v535_v24 = vrot.slane %v534_v18, 2  ;;  %v543_v25 = vadd.f32 %v542_v19, %v541_v54  ;;  %v517_v32 = vadd.f32 %v516_v22, %v515_v62 }
  0x50   : > { %v570_v35 = vsel %vm557_vm4, %v569_v29, %v487_v27  ;;  %v560_v36 = vsel %vm559_vm5, %v558_v31, %v508_v28 }
  0x51   : > { %v536_v30 = vadd.f32 %v535_v24, %v534_v18  ;;  %v544_v38 = vrot.slane %v543_v25, 2  ;;  %v571_v41 = vsel %vm559_vm5, %v570_v35, %v517_v32 }
  0x53   : > { %v537_v33 = vrot.slane %v536_v30, 1  ;;  %v545_v34 = vadd.f32 %v544_v38, %v543_v25 }
  0x55   : > { %v538_v37 = vadd.f32 %v537_v33, %v536_v30  ;;  %v546_v40 = vrot.slane %v545_v34, 1 }
  0x57   : > { %v562_v43 = vsel %vm561_vm6, %v560_v36, %v538_v37  ;;  %v547_v0 = vadd.f32 %v546_v40, %v545_v34 }
  0x58   : > { %564 = vst [vmem:[%s259_s21] sm:$0xff] %v562_v43 }
  0x59   : > { %v572_v44 = vsel %vm561_vm6, %v571_v41, %v547_v0 }
  0x5a   : > { %574 = vst [vmem:[%s263_s24] sm:$0xff] %v572_v44 }
  0x5b PF: > { %s16_s17 = sadd.s32 1, %s868_s17   ;;  %s1108_s15 = smov %s864_s16 }
  0x5c   : > { %p13_p8 = scmp.ge.s32.totalorder %s16_s17, 4   ;;  %s1109_s16 = smov %s1111_s19 }
  0x5e   :  { %15 = sbr.rel (!%p13_p8) target bundleno = 2 (0x2), region = 101 }
  0x63   :  { %630 = vsyncpa [#allocation3], 1 }
  0x64   :  { %632 = vsyncpa [#allocation3 + $0x1], 1 }

// kernel: fis_autoencoder_forward.7
= control target key start
LH: loop header
LB: loop body
LE: loop exit
PB: predicated region body
PF: predicated region fallthrough
CT: control target
= control target key end

     0   :  { %9 = vsyncpa [#allocation3], 0  ;;  %s1050_s0 = inlined_call_operand.vmem [shape: f32[2,8,2,128], index: 0, kind: input, shape index: {}]   ;;  %s1051_s1 = inlined_call_operand.vmem [shape: f32[2,8], index: 1, kind: input, shape index: {}]   ;;  %s1052_s2 = inlined_call_operand.vmem [shape: f32[4,8], index: 2, kind: input, shape index: {}]   ;;  %s1053_s3 = inlined_call_operand.vmem [shape: f32[4], index: 3, kind: input, shape index: {}]   ;;  %s1054_s4 = inlined_call_operand.vmem [shape: f32[2,4,2,128], index: 4, kind: output, shape index: {}]  }
   0x1   :  { %10 = vsyncpa [#allocation5], 0  ;;  %s835_s15 = smov 0   ;;  %s837_s16 = smov 0  }
   0x2   :  { %s839_s17 = smov 0  }
   0x3 LB: > { %s174_s20 = sshll.u32 %s1052_s2, 4  ;;  %s597_s21 = sadd.s32 4294967295, %s805_s17   ;;  %s805_s17 = sphi %s839_s17, %s16_s17   ;;  %s801_s16 = sphi %s837_s16, %s1058_s16   ;;  %s797_s15 = sphi %s835_s15, %s1057_s15   ;;  %s175_s20 = int_to_ptr.vmem [resolvable:$true] %s174_s20 }
   0x4   : > { %p599_p0 = scmp.ge.s32.totalorder %s805_s17, 1  ;;  %p152_p1 = scmp.lt.s32.totalorder %s805_s17, 3 }
   0x5   : > { %p856_p2 = scmp.eq.s32.totalorder %s597_s21, 0  ;;  %s28_s24 = sadd.s32 1, %s801_s16 }
   0x6   : > { %p860_p3 = pnand %p599_p0, %p152_p1  ;;  %s164_s27 = sshll.u32 %s1051_s1, 4  ;;  %s165_s27 = int_to_ptr.vmem [resolvable:$true] %s164_s27 }
   0x7   : > { %p30_p6 = scmp.ge.s32.totalorder %s28_s24, 2  ;;  %s184_s30 = sshll.u32 %s1053_s3, 4  ;;  %s185_s30 = int_to_ptr.vmem [resolvable:$true] %s184_s30 }
   0x8   : > { %p687_p4 = pneg %p860_p3  ;;  %s807_s5 = smov [#allocation4]  }
   0x9   : > { %s1060_s24 = smov (%p30_p6, %s28_s24), 0  ;;  %s808_s6 = smov [#allocation2]  }
   0xa   : > { %p688_p5 = pnand %p856_p2, %p687_p4  ;;  %s809_s7 = smov [#allocation6]  }
   0xb   : > { %208 = sbr.rel (%p860_p3) target bundleno = 91 (0x5b), region = 36 }
   0xc   : > { %693 = dma.vmem_to_smem (!%p688_p5), %s175_s20, 64, %s807_s5, [#allocation5]  }
   0xd   : > { %690 = dma.vmem_to_smem (!%p688_p5), %s165_s27, 32, %s808_s6, [#allocation3]  }
   0xe   : > { %696 = dma.vmem_to_smem (!%p688_p5), %s185_s30, 16, %s809_s7, [#allocation5]  }
  0x10   : > { %788 = dma.done.wait (%p856_p2), [#allocation3], 32  }
  0x11   : > { %790 = vsyncadd (%p856_p2), [#allocation3], 4294967264 }
  0x12   : > { %792 = dma.done.wait (%p856_p2), [#allocation5], 80  }
  0x13   : > { %794 = vsyncadd (%p856_p2), [#allocation5], 4294967216 }
  0x14   : > { %225 = sfence }
  0x15   : > { %p252_p7 = scmp.lt.s32.totalorder %s797_s15, 1  ;;  %s268_s8 = sld [smem:[#allocation2]] }
  0x16   : > { %s612_s9 = sld [smem:[#allocation2 + $0x1]] }
  0x17   : > { %s1062_s15 = smov (!%p252_p7, %s797_s15), 1  ;;  %s613_s11 = sld [smem:[#allocation2 + $0x2]] }
  0x18   : > { %s673_s10 = sshll.u32 %s1062_s15, 4  ;;  %s614_s12 = sld [smem:[#allocation2 + $0x3]] }
  0x19   : > { %s892_s13 = sld [smem:[#allocation2 + $0x4]]  ;;  %s897_s19 = scalar_lea.vmem %s1050_s0, %s673_s10 }
  0x1a   : > { %s899_s20 = sld [smem:[#allocation2 + $0x5]]  ;;  %v320_v0 = vld [vmem:[%s897_s19] sm:$0x3]  ;;  %v661_v2 = vld [vmem:[%s897_s19 + $0x2] sm:$0x3] }
  0x1b   : > { %s901_s21 = sld [smem:[#allocation2 + $0x6]]  ;;  %v321_v1 = vstv %s268_s8  ;;  %v662_v4 = vld [vmem:[%s897_s19 + $0x4] sm:$0x3]  ;;  %v663_v7 = vld [vmem:[%s897_s19 + $0x6] sm:$0x3] }
  0x1c   : > { %s903_s22 = sld [smem:[#allocation2 + $0x7]]  ;;  %v328_v3 = vstv %s612_s9  ;;  %v322_v6 = vmul.f32 %v321_v1, %v320_v0  ;;  %v664_v11 = vld [vmem:[%s897_s19 + $0x8] sm:$0x3]  ;;  %v665_v15 = vld [vmem:[%s897_s19 + $0xa] sm:$0x3] }
  0x1d   : > { %s619_s23 = sld [smem:[#allocation2 + $0x80]]  ;;  %v335_v5 = vstv %s613_s11  ;;  %v329_v9 = vmul.f32 %v661_v2, %v328_v3  ;;  %v666_v25 = vld [vmem:[%s897_s19 + $0xc] sm:$0x3]  ;;  %v667_v31 = vld [vmem:[%s897_s19 + $0xe] sm:$0x3] }
  0x1e   : > { %s620_s25 = sld [smem:[#allocation2 + $0x81]]  ;;  %v342_v8 = vstv %s614_s12  ;;  %v336_v10 = vmul.f32 %v662_v4, %v335_v5 }
  0x1f   : > { %s621_s26 = sld [smem:[#allocation2 + $0x82]]  ;;  %v349_v12 = vstv %s892_s13  ;;  %v343_v14 = vmul.f32 %v663_v7, %v342_v8 }
  0x20   : > { %s622_s27 = sld [smem:[#allocation2 + $0x83]]  ;;  %v356_v16 = vstv %s899_s20  ;;  %v350_v21 = vmul.f32 %v664_v11, %v349_v12 }
  0x21   : > { %s909_s28 = sld [smem:[#allocation2 + $0x84]]  ;;  %v357_v24 = vmul.f32 %v665_v15, %v356_v16  ;;  %v363_v26 = vstv %s901_s21 }
  0x22   : > { %s911_s29 = sld [smem:[#allocation2 + $0x85]]  ;;  %v370_v32 = vstv %s903_s22  ;;  %v364_v35 = vmul.f32 %v666_v25, %v363_v26 }
  0x23   : > { %s915_s30 = sld [smem:[#allocation2 + $0x86]]  ;;  %v323_v13 = vstv %s619_s23  ;;  %v371_v40 = vmul.f32 %v667_v31, %v370_v32 }
  0x24   : > { %s919_s5 = sld [smem:[#allocation2 + $0x87]]  ;;  %v324_v17 = vadd.f32 %v323_v13, %v322_v6  ;;  %v330_v18 = vstv %s620_s25 }
  0x25   : > { %s921_s6 = sld [smem:[#allocation4]]  ;;  %v331_v19 = vadd.f32 %v330_v18, %v329_v9  ;;  %v337_v20 = vstv %s621_s26 }
  0x26   : > { %s923_s7 = sld [smem:[#allocation4 + $0x1]]  ;;  %v338_v22 = vadd.f32 %v337_v20, %v336_v10  ;;  %v344_v23 = vstv %s622_s27  ;;  %v930_v29 = vmax.f32 %v324_v17, 0.0 }
  0x27   : > { %s628_s8 = sld [smem:[#allocation4 + $0x2]]  ;;  %v345_v27 = vadd.f32 %v344_v23, %v343_v14  ;;  %v351_v28 = vstv %s909_s28  ;;  %v937_v33 = vmax.f32 %v331_v19, 0.0 }
  0x28   : > { %s928_s9 = sld [smem:[#allocation4 + $0x3]]  ;;  %v358_v30 = vstv %s911_s29  ;;  %v352_v34 = vadd.f32 %v351_v28, %v350_v21  ;;  %v941_v36 = vmax.f32 %v338_v22, 0.0 }
  0x29   : > { %s935_s10 = sld [smem:[#allocation4 + $0x4]]  ;;  %v359_v37 = vadd.f32 %v358_v30, %v357_v24  ;;  %v365_v38 = vstv %s915_s30  ;;  %v946_v39 = vmax.f32 %v345_v27, 0.0  ;;  %s674_s30 = sshll.u32 %s1062_s15, 3 }
  0x2a   : > { %s939_s11 = sld [smem:[#allocation4 + $0x5]]  ;;  %v372_v42 = vstv %s919_s5  ;;  %v956_v45 = vmax.f32 %v352_v34, 0.0  ;;  %v366_v46 = vadd.f32 %v365_v38, %v364_v35 }
  0x2b   : > { %s944_s12 = sld [smem:[#allocation4 + $0x6]]  ;;  %v375_v41 = vstv %s921_s6  ;;  %v959_v49 = vmax.f32 %v359_v37, 0.0  ;;  %v373_v52 = vadd.f32 %v372_v42, %v371_v40 }
  0x2c   : > { %s949_s13 = sld [smem:[#allocation4 + $0x7]]  ;;  %v376_v43 = vmul.f32 %v375_v41, %v930_v29  ;;  %v377_v44 = vstv %s923_s7  ;;  %v966_v57 = vmax.f32 %v366_v46, 0.0 }
  0x2d   : > { %s954_s14 = sld [smem:[#allocation6]]  ;;  %v378_v47 = vmul.f32 %v377_v44, %v937_v33  ;;  %v380_v48 = vstv %s628_s8  ;;  %v972_v61 = vmax.f32 %v373_v52, 0.0 }
  0x2e   : > { %v381_v50 = vmul.f32 %v380_v48, %v941_v36  ;;  %v383_v51 = vstv %s928_s9  ;;  %s634_s18 = sld [smem:[#allocation4 + $0x80]] }
  0x2f   : > { %v379_v53 = vadd.f32 %v378_v47, %v376_v43  ;;  %v384_v54 = vmul.f32 %v383_v51, %v946_v39  ;;  %v386_v55 = vstv %s935_s10  ;;  %s635_s19 = sld [smem:[#allocation4 + $0x81]]  ;;  %s1001_s10 = scalar_lea.vmem %s1054_s4, %s674_s30 }
  0x30   : > { %v389_v56 = vstv %s939_s11  ;;  %s636_s20 = sld [smem:[#allocation4 + $0x82]]  ;;  %v387_v59 = vmul.f32 %v386_v55, %v956_v45 }
  0x31   : > { %v382_v58 = vadd.f32 %v381_v50, %v379_v53  ;;  %s637_s21 = sld [smem:[#allocation4 + $0x83]]  ;;  %v392_v60 = vstv %s944_s12  ;;  %v390_v63 = vmul.f32 %v389_v56, %v959_v49 }
  0x32   : > { %s970_s22 = sld [smem:[#allocation4 + $0x84]]  ;;  %v395_v0 = vstv %s949_s13  ;;  %v393_v3 = vmul.f32 %v392_v60, %v966_v57 }
  0x33   : > { %v385_v62 = vadd.f32 %v384_v54, %v382_v58  ;;  %s975_s23 = sld [smem:[#allocation4 + $0x85]]  ;;  %v396_v9 = vmul.f32 %v395_v0, %v972_v61  ;;  %v398_v17 = vstv %s954_s14 }
  0x34   : > { %s978_s25 = sld [smem:[#allocation4 + $0x86]]  ;;  %v401_v1 = vstv %s634_s18 }
  0x35   : > { %v388_v2 = vadd.f32 %v387_v59, %v385_v62  ;;  %s981_s26 = sld [smem:[#allocation4 + $0x87]]  ;;  %v402_v4 = vmul.f32 %v401_v1, %v930_v29  ;;  %v403_v5 = vstv %s635_s19 }
  0x36   : > { %s984_s27 = sld [smem:[#allocation6 + $0x1]]  ;;  %v404_v6 = vmul.f32 %v403_v5, %v937_v33  ;;  %v406_v7 = vstv %s636_s20 }
  0x37   : > { %v391_v8 = vadd.f32 %v390_v63, %v388_v2  ;;  %v407_v10 = vmul.f32 %v406_v7, %v941_v36  ;;  %v409_v11 = vstv %s637_s21  ;;  %s642_s28 = sld [smem:[#allocation4 + $0x100]] }
  0x38   : > { %v405_v12 = vadd.f32 %v404_v6, %v402_v4  ;;  %v410_v13 = vmul.f32 %v409_v11, %v946_v39  ;;  %v412_v14 = vstv %s970_s22  ;;  %s643_s29 = sld [smem:[#allocation4 + $0x101]] }
  0x39   : > { %v394_v15 = vadd.f32 %v393_v3, %v391_v8  ;;  %v415_v16 = vstv %s975_s23  ;;  %s644_s5 = sld [smem:[#allocation4 + $0x102]]  ;;  %v413_v19 = vmul.f32 %v412_v14, %v956_v45 }
  0x3a   : > { %v408_v18 = vadd.f32 %v407_v10, %v405_v12  ;;  %s645_s6 = sld [smem:[#allocation4 + $0x103]]  ;;  %v418_v21 = vstv %s978_s25  ;;  %v416_v23 = vmul.f32 %v415_v16, %v959_v49 }
  0x3b   : > { %v397_v20 = vadd.f32 %v396_v9, %v394_v15  ;;  %s996_s7 = sld [smem:[#allocation4 + $0x104]]  ;;  %v421_v25 = vstv %s981_s26  ;;  %v419_v28 = vmul.f32 %v418_v21, %v966_v57 }
  0x3c   : > { %v411_v22 = vadd.f32 %v410_v13, %v408_v18  ;;  %s1004_s15 = sld [smem:[#allocation4 + $0x105]]  ;;  %v422_v37 = vmul.f32 %v421_v25, %v972_v61  ;;  %v424_v47 = vstv %s984_s27 }
  0x3d   : > { %v399_v24 = vadd.f32 %v398_v17, %v397_v20  ;;  %s1007_s11 = sld [smem:[#allocation4 + $0x106]]  ;;  %v428_v26 = vstv %s642_s28 }
  0x3e   : > { %v414_v27 = vadd.f32 %v413_v19, %v411_v22  ;;  %s1010_s12 = sld [smem:[#allocation4 + $0x107]]  ;;  %v429_v30 = vmul.f32 %v428_v26, %v930_v29  ;;  %v430_v31 = vstv %s643_s29 }
  0x3f   : > { %400 = vst [vmem:[%s1001_s10] sm:$0x3] %v399_v24  ;;  %s1014_s13 = sld [smem:[#allocation6 + $0x2]]  ;;  %v431_v32 = vmul.f32 %v430_v31, %v937_v33  ;;  %v433_v34 = vstv %s644_s5 }
  0x40   : > { %v417_v35 = vadd.f32 %v416_v23, %v414_v27  ;;  %v434_v38 = vmul.f32 %v433_v34, %v941_v36  ;;  %v436_v40 = vstv %s645_s6  ;;  %s650_s14 = sld [smem:[#allocation4 + $0x180]] }
  0x41   : > { %v432_v41 = vadd.f32 %v431_v32, %v429_v30  ;;  %v437_v42 = vmul.f32 %v436_v40, %v946_v39  ;;  %v439_v43 = vstv %s996_s7  ;;  %s651_s18 = sld [smem:[#allocation4 + $0x181]] }
  0x42   : > { %v420_v44 = vadd.f32 %v419_v28, %v417_v35  ;;  %v442_v46 = vstv %s1004_s15  ;;  %s652_s19 = sld [smem:[#allocation4 + $0x182]]  ;;  %v440_v50 = vmul.f32 %v439_v43, %v956_v45 }
  0x43   : > { %v435_v48 = vadd.f32 %v434_v38, %v432_v41  ;;  %s653_s20 = sld [smem:[#allocation4 + $0x183]]  ;;  %v445_v52 = vstv %s1007_s11  ;;  %v443_v54 = vmul.f32 %v442_v46, %v959_v49 }
  0x44   : > { %v423_v51 = vadd.f32 %v422_v37, %v420_v44  ;;  %s654_s21 = sld [smem:[#allocation4 + $0x184]]  ;;  %v448_v56 = vstv %s1010_s12  ;;  %v446_v60 = vmul.f32 %v445_v52, %v966_v57 }
  0x45   : > { %v438_v53 = vadd.f32 %v437_v42, %v435_v48  ;;  %s655_s22 = sld [smem:[#allocation4 + $0x185]]  ;;  %v449_v3 = vmul.f32 %v448_v56, %v972_v61  ;;  %v451_v11 = vstv %s1014_s13 }
  0x46   : > { %v425_v55 = vadd.f32 %v424_v47, %v423_v51  ;;  %s656_s23 = sld [smem:[#allocation4 + $0x186]]  ;;  %v455_v58 = vstv %s650_s14 }
  0x47   : > { %v441_v59 = vadd.f32 %v440_v50, %v438_v53  ;;  %s657_s25 = sld [smem:[#allocation4 + $0x187]]  ;;  %v456_v62 = vmul.f32 %v455_v58, %v930_v29  ;;  %v457_v63 = vstv %s651_s18 }
  0x48   : > { %668 = vst [vmem:[%s1001_s10 + $0x2] sm:$0x3] %v425_v55  ;;  %v458_v0 = vmul.f32 %v457_v63, %v937_v33  ;;  %v460_v1 = vstv %s652_s19  ;;  %s660_s26 = sld [smem:[#allocation6 + $0x3]] }
  0x49   : > { %v444_v2 = vadd.f32 %v443_v54, %v441_v59  ;;  %v461_v4 = vmul.f32 %v460_v1, %v941_v36  ;;  %v463_v5 = vstv %s653_s20 }
  0x4a   : > { %v459_v6 = vadd.f32 %v458_v0, %v456_v62  ;;  %v464_v7 = vmul.f32 %v463_v5, %v946_v39  ;;  %v466_v8 = vstv %s654_s21 }
  0x4b   : > { %v447_v9 = vadd.f32 %v446_v60, %v444_v2  ;;  %v469_v10 = vstv %s655_s22  ;;  %v467_v12 = vmul.f32 %v466_v8, %v956_v45 }
  0x4c   : > { %v462_v29 = vadd.f32 %v461_v4, %v459_v6  ;;  %v472_v33 = vstv %s656_s23  ;;  %v470_v15 = vmul.f32 %v469_v10, %v959_v49 }
  0x4d   : > { %v450_v13 = vadd.f32 %v449_v3, %v447_v9  ;;  %v475_v16 = vstv %s657_s25  ;;  %v473_v39 = vmul.f32 %v472_v33, %v966_v57 }
  0x4e   : > { %v465_v14 = vadd.f32 %v464_v7, %v462_v29  ;;  %v476_v19 = vmul.f32 %v475_v16, %v972_v61  ;;  %v478_v21 = vstv %s660_s26 }
  0x4f   : > { %v452_v36 = vadd.f32 %v451_v11, %v450_v13 }
  0x50   : > { %v468_v17 = vadd.f32 %v467_v12, %v465_v14 }
  0x51   : > { %669 = vst [vmem:[%s1001_s10 + $0x4] sm:$0x3] %v452_v36 }
  0x52   : > { %v471_v18 = vadd.f32 %v470_v15, %v468_v17 }
  0x54   : > { %v474_v20 = vadd.f32 %v473_v39, %v471_v18 }
  0x56   : > { %v477_v22 = vadd.f32 %v476_v19, %v474_v20 }
  0x58   : > { %v479_v45 = vadd.f32 %v478_v21, %v477_v22 }
  0x5a   : > { %670 = vst [vmem:[%s1001_s10 + $0x6] sm:$0x3] %v479_v45 }
  0x5b PF: > { %s16_s17 = sadd.s32 1, %s805_s17   ;;  %s1057_s15 = smov %s801_s16 }
  0x5c   : > { %p13_p8 = scmp.ge.s32.totalorder %s16_s17, 4   ;;  %s1058_s16 = smov %s1060_s24 }
  0x5e   :  { %15 = sbr.rel (!%p13_p8) target bundleno = 3 (0x3), region = 89 }
  0x63   :  { %509 = vsyncpa [#allocation3], 1 }
  0x64   :  { %511 = vsyncpa [#allocation3 + $0x1], 1 }
  0x65   :  { %512 = vsyncpa [#allocation5], 1 }

// kernel: fis_autoencoder_forward.5
= control target key start
LH: loop header
LB: loop body
LE: loop exit
PB: predicated region body
PF: predicated region fallthrough
CT: control target
= control target key end

     0   :  { %11 = vsyncpa [#allocation3], 0  ;;  %s1227_s0 = inlined_call_operand.vmem [shape: f32[2,8,2,128], index: 0, kind: input, shape index: {}]   ;;  %s1228_s1 = inlined_call_operand.vmem [shape: f32[2,8], index: 1, kind: input, shape index: {}]   ;;  %s1229_s2 = inlined_call_operand.vmem [shape: f32[4,8], index: 2, kind: input, shape index: {}]   ;;  %s1230_s3 = inlined_call_operand.vmem [shape: f32[2,4,2,128], index: 3, kind: output, shape index: {0}]   ;;  %s1231_s4 = inlined_call_operand.vmem [shape: f32[2,4,128], index: 4, kind: output, shape index: {1}]   ;;  %s1232_s5 = inlined_call_operand.vmem [shape: f32[2,4,128], index: 5, kind: output, shape index: {2}]  }
   0x1   :  { %12 = vsyncpa [#allocation5], 0  ;;  %s979_s18 = smov 0   ;;  %s981_s19 = smov 0  }
   0x2   :  { %s983_s20 = smov 0  }
   0x3 LB: > { %s763_s21 = sadd.s32 4294967295, %s944_s20   ;;  %s30_s22 = sadd.s32 1, %s940_s19  ;;  %s944_s20 = sphi %s983_s20, %s18_s20   ;;  %s940_s19 = sphi %s981_s19, %s1235_s19   ;;  %s936_s18 = sphi %s979_s18, %s1234_s18  }
   0x4   : > { %p32_p0 = scmp.ge.s32.totalorder %s30_s22, 2  ;;  %p765_p1 = scmp.ge.s32.totalorder %s944_s20, 1 }
   0x5   : > { %p185_p2 = scmp.lt.s32.totalorder %s944_s20, 3  ;;  %p998_p4 = scmp.eq.s32.totalorder %s763_s21, 0 }
   0x6   : > { %s1237_s22 = smov (%p32_p0, %s30_s22), 0  ;;  %s197_s26 = sshll.u32 %s1228_s1, 4  ;;  %s198_s26 = int_to_ptr.vmem [resolvable:$true] %s197_s26 }
   0x7   : > { %p186_p3 = pnand %p765_p1, %p185_p2  ;;  %s207_s29 = sshll.u32 %s1229_s2, 4  ;;  %s208_s29 = int_to_ptr.vmem [resolvable:$true] %s207_s29 }
   0x8   : > { %s946_s30 = smov [#allocation2]   ;;  %s947_s6 = smov [#allocation4]  }
   0x9   : > { %p846_p5 = pneg %p186_p3 }
   0xa   : > { %231 = sbr.rel (%p186_p3) target bundleno = 105 (0x69), region = 32 }
   0xb   : > { %p847_p6 = pnand %p998_p4, %p846_p5 }
   0xd   : > { %849 = dma.vmem_to_smem (!%p847_p6), %s198_s26, 32, %s946_s30, [#allocation3]  }
   0xe   : > { %852 = dma.vmem_to_smem (!%p847_p6), %s208_s29, 64, %s947_s6, [#allocation5]  }
   0xf   : > { %927 = dma.done.wait (%p998_p4), [#allocation3], 32  }
  0x10   : > { %929 = vsyncadd (%p998_p4), [#allocation3], 4294967264 }
  0x11   : > { %931 = dma.done.wait (%p998_p4), [#allocation5], 64  }
  0x12   : > { %933 = vsyncadd (%p998_p4), [#allocation5], 4294967232 }
  0x13   : > { %243 = sfence }
  0x14   : > { %p280_p7 = scmp.lt.s32.totalorder %s936_s18, 1  ;;  %s304_s7 = sld [smem:[#allocation2]]  ;;  %v948_v0 = vmov 0.0   ;;  %vm437_vm0 = vcmask 1041408   ;;  %vm582_vm1 = vcmask 1040384   ;;  %vm585_vm2 = vcmask 1042432  }
  0x15   : > { %s778_s9 = sld [smem:[#allocation2 + $0x1]] }
  0x16   : > { %s1239_s18 = smov (!%p280_p7, %s936_s18), 1  ;;  %s779_s13 = sld [smem:[#allocation2 + $0x2]] }
  0x17   : > { %s776_s8 = sshll.u32 %s1239_s18, 2  ;;  %s836_s14 = sshll.u32 %s1239_s18, 4 }
  0x18   : > { %s1024_s12 = scalar_lea.vmem %s1231_s4, %s776_s8  ;;  %s1031_s17 = scalar_lea.vmem %s1232_s5, %s776_s8 }
  0x19   : > { %356 = vst [vmem:[%s1024_s12] sm:$0xf] %v948_v0  ;;  %s780_s21 = sld [smem:[#allocation2 + $0x3]]  ;;  %s1039_s26 = scalar_lea.vmem %s1227_s0, %s836_s14 }
  0x1a   : > { %357 = vst [vmem:[%s1031_s17] sm:$0xf] %v948_v0  ;;  %s1034_s23 = sld [smem:[#allocation2 + $0x4]]  ;;  %v358_v1 = vld [vmem:[%s1039_s26] sm:$0x3]  ;;  %v359_v2 = vstv %s304_s7  ;;  %v824_v3 = vld [vmem:[%s1039_s26 + $0x2] sm:$0x3] }
  0x1b   : > { %s1041_s27 = sld [smem:[#allocation2 + $0x5]]  ;;  %v366_v4 = vstv %s778_s9  ;;  %v825_v5 = vld [vmem:[%s1039_s26 + $0x4] sm:$0x3]  ;;  %v360_v7 = vmul.f32 %v359_v2, %v358_v1  ;;  %v826_v8 = vld [vmem:[%s1039_s26 + $0x6] sm:$0x3] }
  0x1c   : > { %s1043_s28 = sld [smem:[#allocation2 + $0x6]]  ;;  %v373_v6 = vstv %s779_s13  ;;  %v367_v10 = vmul.f32 %v824_v3, %v366_v4  ;;  %v827_v12 = vld [vmem:[%s1039_s26 + $0x8] sm:$0x3]  ;;  %v828_v18 = vld [vmem:[%s1039_s26 + $0xa] sm:$0x3] }
  0x1d   : > { %s1045_s29 = sld [smem:[#allocation2 + $0x7]]  ;;  %v374_v11 = vmul.f32 %v825_v5, %v373_v6  ;;  %v829_v25 = vld [vmem:[%s1039_s26 + $0xc] sm:$0x3]  ;;  %v830_v30 = vld [vmem:[%s1039_s26 + $0xe] sm:$0x3] }
  0x1e   : > { %s785_s30 = sld [smem:[#allocation2 + $0x80]] }
  0x1f   : > { %s786_s6 = sld [smem:[#allocation2 + $0x81]]  ;;  %v380_v9 = vstv %s780_s21 }
  0x20   : > { %s787_s8 = sld [smem:[#allocation2 + $0x82]]  ;;  %v387_v13 = vstv %s1034_s23  ;;  %v381_v15 = vmul.f32 %v826_v8, %v380_v9 }
  0x21   : > { %s788_s10 = sld [smem:[#allocation2 + $0x83]]  ;;  %v394_v19 = vstv %s1041_s27  ;;  %v388_v22 = vmul.f32 %v827_v12, %v387_v13 }
  0x22   : > { %s1051_s11 = sld [smem:[#allocation2 + $0x84]]  ;;  %v401_v26 = vstv %s1043_s28  ;;  %v395_v29 = vmul.f32 %v828_v18, %v394_v19 }
  0x23   : > { %s1053_s14 = sld [smem:[#allocation2 + $0x85]]  ;;  %v408_v31 = vstv %s1045_s29  ;;  %v402_v36 = vmul.f32 %v829_v25, %v401_v26 }
  0x24   : > { %s1057_s7 = sld [smem:[#allocation2 + $0x86]]  ;;  %v361_v14 = vstv %s785_s30  ;;  %v409_v39 = vmul.f32 %v830_v30, %v408_v31 }
  0x25   : > { %s1059_s9 = sld [smem:[#allocation2 + $0x87]]  ;;  %v362_v16 = vadd.f32 %v361_v14, %v360_v7  ;;  %v368_v17 = vstv %s786_s6 }
  0x26   : > { %s1063_s13 = sld [smem:[#allocation4]]  ;;  %v369_v20 = vadd.f32 %v368_v17, %v367_v10  ;;  %v375_v21 = vstv %s787_s8 }
  0x27   : > { %s1065_s15 = sld [smem:[#allocation4 + $0x1]]  ;;  %v376_v23 = vadd.f32 %v375_v21, %v374_v11  ;;  %v382_v24 = vstv %s788_s10  ;;  %v1074_v32 = vmax.f32 %v362_v16, 0.0 }
  0x28   : > { %s1069_s16 = sld [smem:[#allocation4 + $0x2]]  ;;  %v383_v27 = vadd.f32 %v382_v24, %v381_v15  ;;  %v389_v28 = vstv %s1051_s11  ;;  %v1079_v34 = vmax.f32 %v369_v20, 0.0 }
  0x29   : > { %s795_s21 = sld [smem:[#allocation4 + $0x3]]  ;;  %v396_v33 = vstv %s1053_s14  ;;  %v390_v35 = vadd.f32 %v389_v28, %v388_v22  ;;  %v1083_v37 = vmax.f32 %v376_v23, 0.0 }
  0x2a   : > { %s1077_s23 = sld [smem:[#allocation4 + $0x4]]  ;;  %v403_v38 = vstv %s1057_s7  ;;  %v1088_v40 = vmax.f32 %v383_v27, 0.0  ;;  %v397_v41 = vadd.f32 %v396_v33, %v395_v29 }
  0x2b   : > { %s1081_s24 = sld [smem:[#allocation4 + $0x5]]  ;;  %v410_v42 = vstv %s1059_s9  ;;  %v1096_v46 = vmax.f32 %v390_v35, 0.0  ;;  %v404_v47 = vadd.f32 %v403_v38, %v402_v36  ;;  %s837_s9 = sshll.u32 %s1239_s18, 3 }
  0x2c   : > { %s1086_s25 = sld [smem:[#allocation4 + $0x6]]  ;;  %v413_v43 = vstv %s1063_s13  ;;  %v411_v50 = vadd.f32 %v410_v42, %v409_v39  ;;  %v1101_v53 = vmax.f32 %v397_v41, 0.0  ;;  %s1141_s18 = scalar_lea.vmem %s1230_s3, %s837_s9 }
  0x2d   : > { %s1092_s26 = sld [smem:[#allocation4 + $0x7]]  ;;  %v414_v44 = vadd.f32 %v413_v43, %v1074_v32  ;;  %v415_v45 = vstv %s1065_s15  ;;  %v1106_v58 = vmax.f32 %v404_v47, 0.0 }
  0x2e   : > { %v416_v48 = vadd.f32 %v415_v45, %v1079_v34  ;;  %v418_v49 = vstv %s1069_s16  ;;  %s800_s27 = sld [smem:[#allocation4 + $0x80]]  ;;  %v1111_v61 = vmax.f32 %v411_v50, 0.0 }
  0x2f   : > { %v419_v51 = vadd.f32 %v418_v49, %v1083_v37  ;;  %v421_v52 = vstv %s795_s21  ;;  %s801_s28 = sld [smem:[#allocation4 + $0x81]] }
  0x30   : > { %v417_v54 = vmax.f32 %v414_v44, %v416_v48  ;;  %v422_v55 = vadd.f32 %v421_v52, %v1088_v40  ;;  %v424_v56 = vstv %s1077_s23  ;;  %s802_s29 = sld [smem:[#allocation4 + $0x82]] }
  0x31   : > { %v427_v57 = vstv %s1081_s24  ;;  %s803_s30 = sld [smem:[#allocation4 + $0x83]]  ;;  %v425_v60 = vadd.f32 %v424_v56, %v1096_v46 }
  0x32   : > { %v420_v59 = vmax.f32 %v417_v54, %v419_v51  ;;  %s1109_s6 = sld [smem:[#allocation4 + $0x84]]  ;;  %v430_v62 = vstv %s1086_s25  ;;  %v428_v0 = vadd.f32 %v427_v57, %v1101_v53 }
  0x33   : > { %s1114_s8 = sld [smem:[#allocation4 + $0x85]]  ;;  %v433_v1 = vstv %s1092_s26  ;;  %v431_v6 = vadd.f32 %v430_v62, %v1106_v58 }
  0x34   : > { %v423_v63 = vmax.f32 %v420_v59, %v422_v55  ;;  %s1118_s10 = sld [smem:[#allocation4 + $0x86]]  ;;  %v455_v2 = vstv %s800_s27  ;;  %v434_v9 = vadd.f32 %v433_v1, %v1111_v61 }
  0x35   : > { %s1120_s11 = sld [smem:[#allocation4 + $0x87]]  ;;  %v456_v3 = vadd.f32 %v455_v2, %v1074_v32  ;;  %v457_v4 = vstv %s801_s28 }
  0x36   : > { %v426_v5 = vmax.f32 %v423_v63, %v425_v60  ;;  %v458_v7 = vadd.f32 %v457_v4, %v1079_v34  ;;  %v460_v8 = vstv %s802_s29  ;;  %s808_s14 = sld [smem:[#allocation4 + $0x100]] }
  0x37   : > { %v461_v10 = vadd.f32 %v460_v8, %v1083_v37  ;;  %v463_v11 = vstv %s803_s30  ;;  %s809_s7 = sld [smem:[#allocation4 + $0x101]] }
  0x38   : > { %v429_v12 = vmax.f32 %v426_v5, %v428_v0  ;;  %v459_v13 = vmax.f32 %v456_v3, %v458_v7  ;;  %v464_v14 = vadd.f32 %v463_v11, %v1088_v40  ;;  %v466_v15 = vstv %s1109_s6  ;;  %s1130_s13 = sld [smem:[#allocation4 + $0x102]] }
  0x39   : > { %v469_v16 = vstv %s1114_s8  ;;  %s1133_s15 = sld [smem:[#allocation4 + $0x103]]  ;;  %v467_v19 = vadd.f32 %v466_v15, %v1096_v46 }
  0x3a   : > { %v432_v17 = vmax.f32 %v429_v12, %v431_v6  ;;  %v462_v18 = vmax.f32 %v459_v13, %v461_v10  ;;  %s1136_s16 = sld [smem:[#allocation4 + $0x104]]  ;;  %v472_v20 = vstv %s1118_s10  ;;  %v470_v23 = vadd.f32 %v469_v16, %v1101_v53 }
  0x3b   : > { %s1144_s24 = sld [smem:[#allocation4 + $0x105]]  ;;  %v475_v25 = vstv %s1120_s11  ;;  %v473_v29 = vadd.f32 %v472_v20, %v1106_v58 }
  0x3c   : > { %v435_v21 = vmax.f32 %v432_v17, %v434_v9  ;;  %v465_v22 = vmax.f32 %v462_v18, %v464_v14  ;;  %s1147_s25 = sld [smem:[#allocation4 + $0x106]]  ;;  %v497_v24 = vstv %s808_s14  ;;  %v476_v36 = vadd.f32 %v475_v25, %v1111_v61 }
  0x3d   : > { %s1150_s26 = sld [smem:[#allocation4 + $0x107]]  ;;  %v498_v26 = vadd.f32 %v497_v24, %v1074_v32  ;;  %v499_v27 = vstv %s809_s7 }
  0x3e   : > { %436 = vst [vmem:[%s1141_s18] sm:$0x3] %v435_v21  ;;  %v468_v28 = vmax.f32 %v465_v22, %v467_v19  ;;  %v500_v30 = vadd.f32 %v499_v27, %v1079_v34  ;;  %s1156_s27 = sld [smem:[#allocation4 + $0x180]]  ;;  %v502_v31 = vstv %s1130_s13  ;;  %v446_v41 = vmul.f32 %v435_v21, %v435_v21 }
  0x3f   : > { %v505_v33 = vstv %s1133_s15  ;;  %s1160_s28 = sld [smem:[#allocation4 + $0x181]]  ;;  %v503_v39 = vadd.f32 %v502_v31, %v1083_v37  ;;  %v438_v49 = vsel %vm437_vm0, %v435_v21, 0.0 }
  0x40   : > { %v471_v35 = vmax.f32 %v468_v28, %v470_v23  ;;  %v501_v38 = vmax.f32 %v498_v26, %v500_v30  ;;  %s1164_s29 = sld [smem:[#allocation4 + $0x182]]  ;;  %v506_v42 = vadd.f32 %v505_v33, %v1088_v40  ;;  %v508_v43 = vstv %s1136_s16 }
  0x41   : > { %v509_v47 = vadd.f32 %v508_v43, %v1096_v46  ;;  %v511_v48 = vstv %s1144_s24  ;;  %s1170_s30 = sld [smem:[#allocation4 + $0x183]]  ;;  %v447_v56 = vsel %vm437_vm0, %v446_v41, 0.0  ;;  %v439_v1 = vrot.slane %v438_v49, 4 }
  0x42   : > { %v474_v44 = vmax.f32 %v471_v35, %v473_v29  ;;  %v504_v45 = vmax.f32 %v501_v38, %v503_v39  ;;  %v514_v50 = vstv %s1147_s25  ;;  %s1174_s6 = sld [smem:[#allocation4 + $0x184]]  ;;  %v512_v54 = vadd.f32 %v511_v48, %v1101_v53 }
  0x43   : > { %v517_v55 = vstv %s1150_s26  ;;  %s1178_s8 = sld [smem:[#allocation4 + $0x185]]  ;;  %v515_v57 = vadd.f32 %v514_v50, %v1106_v58  ;;  %v448_v9 = vrot.slane %v447_v56, 4  ;;  %v440_v14 = vadd.f32 %v439_v1, %v438_v49 }
  0x44   : > { %v477_v51 = vmax.f32 %v474_v44, %v476_v36  ;;  %v507_v52 = vmax.f32 %v504_v45, %v506_v42  ;;  %s1182_s10 = sld [smem:[#allocation4 + $0x186]]  ;;  %v539_v59 = vstv %s1156_s27  ;;  %v518_v3 = vadd.f32 %v517_v55, %v1111_v61 }
  0x45   : > { %v540_v0 = vadd.f32 %v539_v59, %v1074_v32  ;;  %s1189_s11 = sld [smem:[#allocation4 + $0x187]]  ;;  %v541_v4 = vstv %s1160_s28  ;;  %v449_v21 = vadd.f32 %v448_v9, %v447_v56  ;;  %v441_v27 = vrot.slane %v440_v14, 2 }
  0x46   : > { %831 = vst [vmem:[%s1141_s18 + $0x2] sm:$0x3] %v477_v51  ;;  %v480_v60 = vsel %vm437_vm0, %v477_v51, 0.0  ;;  %v488_v62 = vmul.f32 %v477_v51, %v477_v51  ;;  %v510_v63 = vmax.f32 %v507_v52, %v509_v47  ;;  %v542_v7 = vadd.f32 %v541_v4, %v1079_v34 }
  0x47   : > { %v481_v2 = vrot.slane %v480_v60, 4  ;;  %v544_v8 = vstv %s1164_s29  ;;  %v547_v13 = vstv %s1170_s30  ;;  %v450_v33 = vrot.slane %v449_v21, 2 }
  0x48   : > { %v489_v5 = vsel %vm437_vm0, %v488_v62, 0.0  ;;  %v513_v6 = vmax.f32 %v510_v63, %v512_v54  ;;  %v543_v11 = vmax.f32 %v540_v0, %v542_v7  ;;  %v545_v12 = vadd.f32 %v544_v8, %v1083_v37 }
  0x49   : > { %v490_v10 = vrot.slane %v489_v5, 4  ;;  %v482_v15 = vadd.f32 %v481_v2, %v480_v60  ;;  %v548_v16 = vadd.f32 %v547_v13, %v1088_v40  ;;  %v550_v17 = vstv %s1174_s6 }
  0x4a   : > { %v516_v32 = vmax.f32 %v513_v6, %v515_v57  ;;  %v546_v19 = vmax.f32 %v543_v11, %v545_v12  ;;  %v551_v34 = vadd.f32 %v550_v17, %v1096_v46  ;;  %v553_v20 = vstv %s1178_s8  ;;  %v581_v17 = vld [vmem:[%s1024_s12] sm:$0xf] }
  0x4b   : > { %v491_v22 = vadd.f32 %v490_v10, %v489_v5  ;;  %v556_v23 = vstv %s1182_s10  ;;  %v554_v26 = vadd.f32 %v553_v20, %v1101_v53  ;;  %v483_v28 = vrot.slane %v482_v15, 2 }
  0x4c   : > { %v519_v18 = vmax.f32 %v516_v32, %v518_v3  ;;  %v549_v37 = vmax.f32 %v546_v19, %v548_v16  ;;  %v559_v29 = vstv %s1189_s11  ;;  %v557_v46 = vadd.f32 %v556_v23, %v1106_v58 }
  0x4d   : > { %v492_v35 = vrot.slane %v491_v22, 2  ;;  %v560_v41 = vadd.f32 %v559_v29, %v1111_v61  ;;  %v442_v42 = vadd.f32 %v441_v27, %v440_v14  ;;  %v484_v43 = vadd.f32 %v483_v28, %v482_v15 }
  0x4e   : > { %832 = vst [vmem:[%s1141_s18 + $0x4] sm:$0x3] %v519_v18  ;;  %v522_v24 = vsel %vm437_vm0, %v519_v18, 0.0  ;;  %v530_v25 = vmul.f32 %v519_v18, %v519_v18  ;;  %v552_v31 = vmax.f32 %v549_v37, %v551_v34  ;;  %v451_v47 = vadd.f32 %v450_v33, %v449_v21  ;;  %v589_v21 = vld [vmem:[%s1031_s17] sm:$0xf] }
  0x4f   : > { %v523_v40 = vrot.slane %v522_v24, 4  ;;  %v493_v48 = vadd.f32 %v492_v35, %v491_v22  ;;  %v443_v52 = vrot.slane %v442_v42, 1  ;;  %v485_v58 = vrot.slane %v484_v43, 1 }
  0x50   : > { %v531_v30 = vsel %vm437_vm0, %v530_v25, 0.0  ;;  %v555_v39 = vmax.f32 %v552_v31, %v554_v26  ;;  %v452_v57 = vrot.slane %v451_v47, 1 }
  0x51   : > { %v524_v36 = vadd.f32 %v523_v40, %v522_v24  ;;  %v532_v38 = vrot.slane %v531_v30, 4  ;;  %v494_v59 = vrot.slane %v493_v48, 1  ;;  %v444_v63 = vadd.f32 %v443_v52, %v442_v42 }
  0x52   : > { %v558_v45 = vmax.f32 %v555_v39, %v557_v46  ;;  %v486_v0 = vadd.f32 %v485_v58, %v484_v43  ;;  %v453_v6 = vadd.f32 %v452_v57, %v451_v47 }
  0x53   : > { %v525_v53 = vrot.slane %v524_v36, 2  ;;  %v533_v44 = vadd.f32 %v532_v38, %v531_v30  ;;  %v495_v7 = vadd.f32 %v494_v59, %v493_v48 }
  0x54   : > { %v561_v51 = vmax.f32 %v558_v45, %v560_v41  ;;  %v583_v32 = vsel %vm582_vm1, %v444_v63, %v486_v0 }
  0x55   : > { %v534_v49 = vrot.slane %v533_v44, 2  ;;  %v526_v50 = vadd.f32 %v525_v53, %v524_v36  ;;  %v590_v14 = vsel %vm582_vm1, %v453_v6, %v495_v7 }
  0x56   : > { %833 = vst [vmem:[%s1141_s18 + $0x6] sm:$0x3] %v561_v51  ;;  %v564_v55 = vsel %vm437_vm0, %v561_v51, 0.0  ;;  %v572_v56 = vmul.f32 %v561_v51, %v561_v51 }
  0x57   : > { %v535_v54 = vadd.f32 %v534_v49, %v533_v44  ;;  %v565_v61 = vrot.slane %v564_v55, 4  ;;  %v527_v60 = vrot.slane %v526_v50, 1 }
  0x58   : > { %v573_v62 = vsel %vm437_vm0, %v572_v56, 0.0 }
  0x59   : > { %v566_v1 = vadd.f32 %v565_v61, %v564_v55  ;;  %v574_v2 = vrot.slane %v573_v62, 4  ;;  %v536_v3 = vrot.slane %v535_v54, 1  ;;  %v528_v8 = vadd.f32 %v527_v60, %v526_v50 }
  0x5b   : > { %v567_v4 = vrot.slane %v566_v1, 2  ;;  %v575_v5 = vadd.f32 %v574_v2, %v573_v62  ;;  %v537_v11 = vadd.f32 %v536_v3, %v535_v54  ;;  %v584_v15 = vsel %vm437_vm0, %v583_v32, %v528_v8 }
  0x5d   : > { %v568_v9 = vadd.f32 %v567_v4, %v566_v1  ;;  %v576_v10 = vrot.slane %v575_v5, 2  ;;  %v591_v19 = vsel %vm437_vm0, %v590_v14, %v537_v11 }
  0x5f   : > { %v569_v12 = vrot.slane %v568_v9, 1  ;;  %v577_v13 = vadd.f32 %v576_v10, %v575_v5 }
  0x61   : > { %v570_v16 = vadd.f32 %v569_v12, %v568_v9  ;;  %v578_v18 = vrot.slane %v577_v13, 1 }
  0x63   : > { %v586_v34 = vsel %vm585_vm2, %v584_v15, %v570_v16  ;;  %v579_v20 = vadd.f32 %v578_v18, %v577_v13 }
  0x64   : > { %v587_v22 = vadd.f32 %v586_v34, %v581_v17 }
  0x65   : > { %v592_v23 = vsel %vm585_vm2, %v591_v19, %v579_v20 }
  0x66   : > { %588 = vst [vmem:[%s1024_s12] sm:$0xf] %v587_v22  ;;  %v593_v24 = vadd.f32 %v592_v23, %v589_v21 }
  0x68   : > { %594 = vst [vmem:[%s1031_s17] sm:$0xf] %v593_v24 }
  0x69 PF: > { %s18_s20 = sadd.s32 1, %s944_s20   ;;  %s1234_s18 = smov %s940_s19 }
  0x6a   : > { %p15_p8 = scmp.ge.s32.totalorder %s18_s20, 4   ;;  %s1235_s19 = smov %s1237_s22 }
  0x6c   :  { %17 = sbr.rel (!%p15_p8) target bundleno = 3 (0x3), region = 109 }
  0x71   :  { %650 = vsyncpa [#allocation3], 1 }
  0x72   :  { %652 = vsyncpa [#allocation3 + $0x1], 1 }
  0x73   :  { %653 = vsyncpa [#allocation5], 1 }

// kernel: fis_autoencoder_forward.6
= control target key start
LH: loop header
LB: loop body
LE: loop exit
PB: predicated region body
PF: predicated region fallthrough
CT: control target
= control target key end

     0   :  { %12 = vsyncpa [#allocation3], 0  ;;  %s1390_s0 = inlined_call_operand.vmem [shape: f32[2,4,2,128], index: 0, kind: input, shape index: {}]   ;;  %s1391_s1 = inlined_call_operand.vmem [shape: f32[2,4], index: 1, kind: input, shape index: {}]   ;;  %s1392_s2 = inlined_call_operand.vmem [shape: f32[8,4], index: 2, kind: input, shape index: {}]   ;;  %s1393_s3 = inlined_call_operand.vmem [shape: f32[8], index: 3, kind: input, shape index: {}]   ;;  %s1394_s4 = inlined_call_operand.vmem [shape: f32[2,8,2,128], index: 4, kind: output, shape index: {0}]   ;;  %s1395_s5 = inlined_call_operand.vmem [shape: f32[2,8,128], index: 5, kind: output, shape index: {1}]   ;;  %s1396_s6 = inlined_call_operand.vmem [shape: f32[2,8,128], index: 6, kind: output, shape index: {2}]  }
   0x1   :  { %13 = vsyncpa [#allocation5], 0  ;;  %s1126_s21 = smov 0   ;;  %s1128_s22 = smov 0  }
   0x2   :  { %s1130_s23 = smov 0  }
   0x3 LB: > { %s229_s26 = sshll.u32 %s1392_s2, 4  ;;  %s879_s27 = sadd.s32 4294967295, %s1086_s23   ;;  %s1086_s23 = sphi %s1130_s23, %s19_s23   ;;  %s1082_s22 = sphi %s1128_s22, %s1400_s22   ;;  %s1078_s21 = sphi %s1126_s21, %s1399_s21   ;;  %s230_s26 = int_to_ptr.vmem [resolvable:$true] %s229_s26 }
   0x4   : > { %p881_p0 = scmp.ge.s32.totalorder %s1086_s23, 1  ;;  %p207_p1 = scmp.lt.s32.totalorder %s1086_s23, 3 }
   0x5   : > { %p1147_p2 = scmp.eq.s32.totalorder %s879_s27, 0  ;;  %s31_s30 = sadd.s32 1, %s1082_s22 }
   0x6   : > { %p1151_p3 = pnand %p881_p0, %p207_p1  ;;  %s219_s9 = sshll.u32 %s1391_s1, 4  ;;  %s220_s9 = int_to_ptr.vmem [resolvable:$true] %s219_s9 }
   0x7   : > { %p33_p6 = scmp.ge.s32.totalorder %s31_s30, 2  ;;  %s239_s12 = sshll.u32 %s1393_s3, 4  ;;  %s240_s12 = int_to_ptr.vmem [resolvable:$true] %s239_s12 }
   0x8   : > { %p967_p4 = pneg %p1151_p3  ;;  %s1088_s13 = smov [#allocation4]  }
   0x9   : > { %s1402_s30 = smov (%p33_p6, %s31_s30), 0  ;;  %s1089_s14 = smov [#allocation2]  }
   0xa   : > { %p968_p5 = pnand %p1147_p2, %p967_p4  ;;  %s1090_s15 = smov [#allocation6]  }
   0xb   : > { %263 = sbr.rel (%p1151_p3) target bundleno = 108 (0x6c), region = 36 }
   0xc   : > { %973 = dma.vmem_to_smem (!%p968_p5), %s230_s26, 128, %s1088_s13, [#allocation5]  }
   0xd   : > { %970 = dma.vmem_to_smem (!%p968_p5), %s220_s9, 32, %s1089_s14, [#allocation3]  }
   0xe   : > { %976 = dma.vmem_to_smem (!%p968_p5), %s240_s12, 16, %s1090_s15, [#allocation5]  }
  0x10   : > { %1069 = dma.done.wait (%p1147_p2), [#allocation3], 32  }
  0x11   : > { %1071 = vsyncadd (%p1147_p2), [#allocation3], 4294967264 }
  0x12   : > { %1073 = dma.done.wait (%p1147_p2), [#allocation5], 144  }
  0x13   : > { %1075 = vsyncadd (%p1147_p2), [#allocation5], 4294967152 }
  0x14   : > { %280 = sfence }
  0x15   : > { %p319_p7 = scmp.lt.s32.totalorder %s1078_s21, 1  ;;  %s343_s16 = sld [smem:[#allocation2]]  ;;  %vm434_vm0 = vcmask 1041408   ;;  %vm677_vm1 = vcmask 1040384   ;;  %vm680_vm2 = vcmask 1042432   ;;  %vm682_vm3 = vcmask 1043456  }
  0x16   : > { %s896_s17 = sld [smem:[#allocation2 + $0x1]]  ;;  %vm684_vm4 = vcmask 1044480   ;;  %vm686_vm5 = vcmask 1045504   ;;  %vm688_vm6 = vcmask 1046528  }
  0x17   : > { %s1404_s21 = smov (!%p319_p7, %s1078_s21), 1  ;;  %s897_s18 = sld [smem:[#allocation2 + $0x2]] }
  0x18   : > { %s1183_s19 = sshll.u32 %s1404_s21, 3  ;;  %s898_s26 = sld [smem:[#allocation2 + $0x3]] }
  0x19   : > { %s326_s25 = scalar_lea.vmem %s1390_s0, %s1183_s19  ;;  %s899_s27 = sld [smem:[#allocation2 + $0x80]] }
  0x1a   : > { %v397_v0 = vld [vmem:[%s326_s25] sm:$0x3]  ;;  %s900_s28 = sld [smem:[#allocation2 + $0x81]]  ;;  %v941_v2 = vld [vmem:[%s326_s25 + $0x2] sm:$0x3]  ;;  %s954_s24 = sshll.u32 %s1404_s21, 4 }
  0x1b   : > { %v398_v1 = vstv %s343_s16  ;;  %s901_s29 = sld [smem:[#allocation2 + $0x82]]  ;;  %v942_v4 = vld [vmem:[%s326_s25 + $0x4] sm:$0x3]  ;;  %v943_v7 = vld [vmem:[%s326_s25 + $0x6] sm:$0x3]  ;;  %s1215_s21 = scalar_lea.vmem %s1394_s4, %s954_s24 }
  0x1c   : > { %v404_v3 = vstv %s896_s17  ;;  %s902_s7 = sld [smem:[#allocation2 + $0x83]]  ;;  %v399_v6 = vmul.f32 %v398_v1, %v397_v0 }
  0x1d   : > { %v410_v5 = vstv %s897_s18  ;;  %v405_v8 = vmul.f32 %v941_v2, %v404_v3  ;;  %s351_s8 = sld [smem:[#allocation4]] }
  0x1e   : > { %v411_v9 = vmul.f32 %v942_v4, %v410_v5  ;;  %v416_v10 = vstv %s898_s26  ;;  %s903_s9 = sld [smem:[#allocation4 + $0x1]] }
  0x1f   : > { %v400_v11 = vstv %s899_s27  ;;  %v417_v12 = vmul.f32 %v943_v7, %v416_v10  ;;  %s904_s10 = sld [smem:[#allocation4 + $0x2]] }
  0x20   : > { %v1189_v13 = vadd.f32 %v400_v11, %v399_v6  ;;  %v406_v14 = vstv %s900_s28  ;;  %s905_s11 = sld [smem:[#allocation4 + $0x3]] }
  0x21   : > { %v1191_v15 = vadd.f32 %v406_v14, %v405_v8  ;;  %v412_v16 = vstv %s901_s29  ;;  %s1193_s12 = sld [smem:[#allocation6]] }
  0x22   : > { %v1195_v17 = vadd.f32 %v412_v16, %v411_v9  ;;  %v418_v18 = vstv %s902_s7  ;;  %s906_s13 = sld [smem:[#allocation4 + $0x80]] }
  0x23   : > { %v1197_v19 = vadd.f32 %v418_v18, %v417_v12  ;;  %v420_v20 = vstv %s351_s8  ;;  %s907_s14 = sld [smem:[#allocation4 + $0x81]] }
  0x24   : > { %v421_v21 = vmul.f32 %v420_v20, %v1189_v13  ;;  %v422_v22 = vstv %s903_s9  ;;  %s908_s15 = sld [smem:[#allocation4 + $0x82]] }
  0x25   : > { %v423_v23 = vmul.f32 %v422_v22, %v1191_v15  ;;  %v425_v24 = vstv %s904_s10  ;;  %s909_s16 = sld [smem:[#allocation4 + $0x83]] }
  0x26   : > { %v426_v25 = vmul.f32 %v425_v24, %v1195_v17  ;;  %v428_v26 = vstv %s905_s11  ;;  %s1202_s17 = sld [smem:[#allocation6 + $0x1]] }
  0x27   : > { %v424_v27 = vadd.f32 %v423_v23, %v421_v21  ;;  %v429_v28 = vmul.f32 %v428_v26, %v1197_v19  ;;  %s910_s18 = sld [smem:[#allocation4 + $0x100]]  ;;  %v431_v33 = vstv %s1193_s12 }
  0x28   : > { %v452_v29 = vstv %s906_s13  ;;  %s911_s20 = sld [smem:[#allocation4 + $0x101]] }
  0x29   : > { %v427_v30 = vadd.f32 %v426_v25, %v424_v27  ;;  %v453_v31 = vmul.f32 %v452_v29, %v1189_v13  ;;  %v454_v32 = vstv %s907_s14  ;;  %s912_s25 = sld [smem:[#allocation4 + $0x102]] }
  0x2a   : > { %v455_v34 = vmul.f32 %v454_v32, %v1191_v15  ;;  %v457_v35 = vstv %s908_s15  ;;  %s913_s26 = sld [smem:[#allocation4 + $0x103]] }
  0x2b   : > { %v430_v36 = vadd.f32 %v429_v28, %v427_v30  ;;  %v458_v37 = vmul.f32 %v457_v35, %v1195_v17  ;;  %v460_v38 = vstv %s909_s16  ;;  %s1210_s27 = sld [smem:[#allocation6 + $0x2]] }
  0x2c   : > { %v456_v39 = vadd.f32 %v455_v34, %v453_v31  ;;  %v461_v40 = vmul.f32 %v460_v38, %v1197_v19  ;;  %s914_s7 = sld [smem:[#allocation4 + $0x180]]  ;;  %v463_v44 = vstv %s1202_s17 }
  0x2d   : > { %v432_v41 = vadd.f32 %v431_v33, %v430_v36  ;;  %v484_v42 = vstv %s910_s18  ;;  %s1218_s8 = sld [smem:[#allocation4 + $0x181]] }
  0x2e   : > { %v459_v43 = vadd.f32 %v458_v37, %v456_v39  ;;  %v485_v45 = vmul.f32 %v484_v42, %v1189_v13  ;;  %v486_v46 = vstv %s911_s20  ;;  %s1222_s9 = sld [smem:[#allocation4 + $0x182]] }
  0x2f   : > { %433 = vst [vmem:[%s1215_s21] sm:$0x3] %v432_v41  ;;  %v435_v47 = vsel %vm434_vm0, %v432_v41, 0.0  ;;  %v443_v48 = vmul.f32 %v432_v41, %v432_v41  ;;  %v487_v49 = vmul.f32 %v486_v46, %v1191_v15  ;;  %v489_v50 = vstv %s912_s25  ;;  %s1228_s10 = sld [smem:[#allocation4 + $0x183]] }
  0x30   : > { %v436_v51 = vrot.slane %v435_v47, 4  ;;  %v462_v52 = vadd.f32 %v461_v40, %v459_v43  ;;  %v490_v53 = vmul.f32 %v489_v50, %v1195_v17  ;;  %v492_v54 = vstv %s913_s26  ;;  %s1233_s11 = sld [smem:[#allocation6 + $0x3]] }
  0x31   : > { %v444_v55 = vsel %vm434_vm0, %v443_v48, 0.0  ;;  %v488_v56 = vadd.f32 %v487_v49, %v485_v45  ;;  %v493_v57 = vmul.f32 %v492_v54, %v1197_v19  ;;  %v495_v63 = vstv %s1210_s27  ;;  %s1239_s12 = sld [smem:[#allocation4 + $0x200]] }
  0x32   : > { %v437_v58 = vadd.f32 %v436_v51, %v435_v47  ;;  %v445_v59 = vrot.slane %v444_v55, 4  ;;  %v464_v60 = vadd.f32 %v463_v44, %v462_v52  ;;  %v516_v61 = vstv %s914_s7  ;;  %s1243_s13 = sld [smem:[#allocation4 + $0x201]] }
  0x33   : > { %v491_v62 = vadd.f32 %v490_v53, %v488_v56  ;;  %v517_v0 = vmul.f32 %v516_v61, %v1189_v13  ;;  %v518_v1 = vstv %s1218_s8  ;;  %s1247_s14 = sld [smem:[#allocation4 + $0x202]] }
  0x34   : > { %v438_v2 = vrot.slane %v437_v58, 2  ;;  %v446_v3 = vadd.f32 %v445_v59, %v444_v55  ;;  %944 = vst [vmem:[%s1215_s21 + $0x2] sm:$0x3] %v464_v60  ;;  %v467_v4 = vsel %vm434_vm0, %v464_v60, 0.0  ;;  %v475_v5 = vmul.f32 %v464_v60, %v464_v60  ;;  %s1250_s15 = sld [smem:[#allocation4 + $0x203]] }
  0x35   : > { %v468_v6 = vrot.slane %v467_v4, 4  ;;  %v494_v7 = vadd.f32 %v493_v57, %v491_v62  ;;  %v519_v8 = vmul.f32 %v518_v1, %v1191_v15  ;;  %v521_v9 = vstv %s1222_s9  ;;  %s1254_s16 = sld [smem:[#allocation6 + $0x4]] }
  0x36   : > { %v447_v10 = vrot.slane %v446_v3, 2  ;;  %v476_v11 = vsel %vm434_vm0, %v475_v5, 0.0  ;;  %v522_v12 = vmul.f32 %v521_v9, %v1195_v17  ;;  %v439_v21 = vadd.f32 %v438_v2, %v437_v58  ;;  %s1259_s17 = sld [smem:[#allocation4 + $0x280]] }
  0x37   : > { %v469_v14 = vadd.f32 %v468_v6, %v467_v4  ;;  %v477_v16 = vrot.slane %v476_v11, 4  ;;  %v496_v18 = vadd.f32 %v495_v63, %v494_v7  ;;  %v520_v20 = vadd.f32 %v519_v8, %v517_v0  ;;  %s1262_s18 = sld [smem:[#allocation4 + $0x281]] }
  0x38   : > { %v448_v22 = vadd.f32 %v447_v10, %v446_v3  ;;  %v524_v23 = vstv %s1228_s10  ;;  %v527_v33 = vstv %s1233_s11  ;;  %v548_v37 = vstv %s1239_s12  ;;  %s1264_s20 = sld [smem:[#allocation4 + $0x282]] }
  0x39   : > { %v470_v24 = vrot.slane %v469_v14, 2  ;;  %v478_v25 = vadd.f32 %v477_v16, %v476_v11  ;;  %945 = vst [vmem:[%s1215_s21 + $0x4] sm:$0x3] %v496_v18  ;;  %v499_v26 = vsel %vm434_vm0, %v496_v18, 0.0  ;;  %v507_v27 = vmul.f32 %v496_v18, %v496_v18  ;;  %s1269_s24 = sld [smem:[#allocation4 + $0x283]] }
  0x3a   : > { %v500_v28 = vrot.slane %v499_v26, 4  ;;  %v523_v29 = vadd.f32 %v522_v12, %v520_v20  ;;  %v525_v32 = vmul.f32 %v524_v23, %v1197_v19  ;;  %v440_v38 = vrot.slane %v439_v21, 1  ;;  %s1272_s25 = sld [smem:[#allocation4 + $0x300]] }
  0x3b   : > { %v471_v30 = vadd.f32 %v470_v24, %v469_v14  ;;  %v508_v31 = vsel %vm434_vm0, %v507_v27, 0.0  ;;  %v479_v34 = vrot.slane %v478_v25, 2  ;;  %v449_v39 = vrot.slane %v448_v22, 1  ;;  %s1277_s26 = sld [smem:[#allocation4 + $0x301]] }
  0x3c   : > { %v501_v35 = vadd.f32 %v500_v28, %v499_v26  ;;  %v509_v36 = vrot.slane %v508_v31, 4  ;;  %v526_v40 = vadd.f32 %v525_v32, %v523_v29  ;;  %v549_v42 = vmul.f32 %v548_v37, %v1189_v13  ;;  %s1282_s27 = sld [smem:[#allocation4 + $0x302]] }
  0x3d   : > { %v472_v41 = vrot.slane %v471_v30, 1  ;;  %v550_v43 = vstv %s1243_s13  ;;  %v553_v44 = vstv %s1247_s14  ;;  %v1274_v48 = vadd.f32 %v479_v34, %v478_v25  ;;  %s1286_s28 = sld [smem:[#allocation6 + $0x5]]  ;;  %s338_s14 = scalar_lea.vmem %s1395_s5, %s1183_s19 }
  0x3e   : > { %v502_v45 = vrot.slane %v501_v35, 2  ;;  %v528_v46 = vadd.f32 %v527_v33, %v526_v40  ;;  %v551_v47 = vmul.f32 %v550_v43, %v1191_v15  ;;  %v510_v49 = vadd.f32 %v509_v36, %v508_v31  ;;  %s1292_s29 = sld [smem:[#allocation4 + $0x303]] }
  0x3f   : > { %v556_v50 = vstv %s1250_s15  ;;  %v441_v51 = vadd.f32 %v440_v38, %v439_v21  ;;  %v554_v54 = vmul.f32 %v553_v44, %v1195_v17  ;;  %v1284_v55 = vadd.f32 %v449_v39, %v448_v22  ;;  %s1297_s7 = sld [smem:[#allocation6 + $0x6]] }
  0x40   : > { %946 = vst [vmem:[%s1215_s21 + $0x6] sm:$0x3] %v528_v46  ;;  %v531_v52 = vsel %vm434_vm0, %v528_v46, 0.0  ;;  %v539_v53 = vmul.f32 %v528_v46, %v528_v46  ;;  %v473_v56 = vadd.f32 %v472_v41, %v471_v30  ;;  %v552_v58 = vadd.f32 %v551_v47, %v549_v42  ;;  %s1304_s8 = sld [smem:[#allocation4 + $0x380]] }
  0x41   : > { %v532_v57 = vrot.slane %v531_v52, 4  ;;  %v503_v59 = vadd.f32 %v502_v45, %v501_v35  ;;  %v557_v61 = vmul.f32 %v556_v50, %v1197_v19  ;;  %v580_v62 = vstv %s1259_s17  ;;  %s1308_s9 = sld [smem:[#allocation4 + $0x381]]  ;;  %s342_s17 = scalar_lea.vmem %s1396_s6, %s1183_s19 }
  0x42   : > { %v540_v60 = vsel %vm434_vm0, %v539_v53, 0.0  ;;  %v481_v63 = vrot.slane %v1274_v48, 1  ;;  %v511_v0 = vrot.slane %v510_v49, 2  ;;  %v555_v3 = vadd.f32 %v554_v54, %v552_v58  ;;  %s1320_s10 = sld [smem:[#allocation4 + $0x382]] }
  0x43   : > { %v533_v1 = vadd.f32 %v532_v57, %v531_v52  ;;  %v541_v2 = vrot.slane %v540_v60, 4  ;;  %v581_v4 = vmul.f32 %v580_v62, %v1189_v13  ;;  %v582_v5 = vstv %s1262_s18  ;;  %s1328_s11 = sld [smem:[#allocation4 + $0x383]] }
  0x44   : > { %v585_v6 = vstv %s1264_s20  ;;  %v1300_v7 = vsel %vm677_vm1, %v441_v51, %v473_v56  ;;  %v559_v9 = vstv %s1254_s16  ;;  %v583_v10 = vmul.f32 %v582_v5, %v1191_v15  ;;  %s1339_s12 = sld [smem:[#allocation6 + $0x7]] }
  0x45   : > { %v534_v8 = vrot.slane %v533_v1, 2  ;;  %v504_v11 = vrot.slane %v503_v59, 1  ;;  %v558_v12 = vadd.f32 %v557_v61, %v555_v3  ;;  %v586_v14 = vmul.f32 %v585_v6, %v1195_v17 }
  0x46   : > { %v588_v16 = vstv %s1269_s24  ;;  %v542_v20 = vadd.f32 %v541_v2, %v540_v60  ;;  %v584_v21 = vadd.f32 %v583_v10, %v581_v4  ;;  %v612_v24 = vstv %s1272_s25 }
  0x47   : > { %v1310_v18 = vadd.f32 %v534_v8, %v533_v1  ;;  %v589_v22 = vmul.f32 %v588_v16, %v1197_v19  ;;  %v560_v23 = vadd.f32 %v559_v9, %v558_v12  ;;  %v614_v25 = vstv %s1277_s26 }
  0x48   : > { %v617_v26 = vstv %s1282_s27  ;;  %v1316_v27 = vadd.f32 %v511_v0, %v510_v49  ;;  %v587_v28 = vadd.f32 %v586_v14, %v584_v21  ;;  %v591_v29 = vstv %s1286_s28 }
  0x49   : > { %v613_v30 = vmul.f32 %v612_v24, %v1189_v13  ;;  %947 = vst [vmem:[%s1215_s21 + $0x8] sm:$0x3] %v560_v23  ;;  %v563_v31 = vsel %vm434_vm0, %v560_v23, 0.0  ;;  %v571_v32 = vmul.f32 %v560_v23, %v560_v23  ;;  %v615_v33 = vmul.f32 %v614_v25, %v1191_v15 }
  0x4a   : > { %v618_v34 = vmul.f32 %v617_v26, %v1195_v17  ;;  %v1326_v35 = vadd.f32 %v504_v11, %v503_v59  ;;  %v543_v36 = vrot.slane %v542_v20, 2  ;;  %v564_v37 = vrot.slane %v563_v31, 4 }
  0x4b   : > { %v590_v38 = vadd.f32 %v589_v22, %v587_v28  ;;  %v536_v39 = vrot.slane %v1310_v18, 1  ;;  %v572_v40 = vsel %vm434_vm0, %v571_v32, 0.0  ;;  %v616_v41 = vadd.f32 %v615_v33, %v613_v30 }
  0x4c   : > { %v620_v42 = vstv %s1292_s29  ;;  %v565_v43 = vadd.f32 %v564_v37, %v563_v31  ;;  %v573_v44 = vrot.slane %v572_v40, 4  ;;  %v623_v46 = vstv %s1297_s7 }
  0x4d   : > { %v592_v45 = vadd.f32 %v591_v29, %v590_v38  ;;  %v619_v47 = vadd.f32 %v618_v34, %v616_v41  ;;  %v621_v49 = vmul.f32 %v620_v42, %v1197_v19  ;;  %v644_v50 = vstv %s1304_s8 }
  0x4e   : > { %v646_v51 = vstv %s1308_s9  ;;  %v566_v52 = vrot.slane %v565_v43, 2  ;;  %v574_v53 = vadd.f32 %v573_v44, %v572_v40  ;;  %v645_v59 = vmul.f32 %v644_v50, %v1189_v13 }
  0x4f   : > { %948 = vst [vmem:[%s1215_s21 + $0xa] sm:$0x3] %v592_v45  ;;  %v595_v54 = vsel %vm434_vm0, %v592_v45, 0.0  ;;  %v603_v56 = vmul.f32 %v592_v45, %v592_v45  ;;  %v622_v58 = vadd.f32 %v621_v49, %v619_v47  ;;  %v647_v60 = vmul.f32 %v646_v51, %v1191_v15 }
  0x50   : > { %v596_v57 = vrot.slane %v595_v54, 4  ;;  %v544_v61 = vadd.f32 %v543_v36, %v542_v20  ;;  %v575_v62 = vrot.slane %v574_v53, 2  ;;  %v649_v1 = vstv %s1320_s10 }
  0x51   : > { %v604_v0 = vsel %vm434_vm0, %v603_v56, 0.0  ;;  %v624_v4 = vadd.f32 %v623_v46, %v622_v58  ;;  %v648_v5 = vadd.f32 %v647_v60, %v645_v59  ;;  %v567_v6 = vadd.f32 %v566_v52, %v565_v43 }
  0x52   : > { %v597_v2 = vadd.f32 %v596_v57, %v595_v54  ;;  %v605_v3 = vrot.slane %v604_v0, 4  ;;  %v576_v8 = vadd.f32 %v575_v62, %v574_v53  ;;  %v650_v9 = vmul.f32 %v649_v1, %v1195_v17 }
  0x53   : > { %v652_v10 = vstv %s1328_s11  ;;  %949 = vst [vmem:[%s1215_s21 + $0xc] sm:$0x3] %v624_v4  ;;  %v627_v15 = vsel %vm434_vm0, %v624_v4, 0.0  ;;  %v635_v12 = vmul.f32 %v624_v4, %v624_v4  ;;  %v513_v14 = vrot.slane %v1316_v27, 1 }
  0x54   : > { %v598_v11 = vrot.slane %v597_v2, 2  ;;  %v606_v13 = vadd.f32 %v605_v3, %v604_v0  ;;  %v545_v16 = vrot.slane %v544_v61, 1  ;;  %v628_v20 = vrot.slane %v627_v15, 4 }
  0x55   : > { %v651_v21 = vadd.f32 %v650_v9, %v648_v5  ;;  %v636_v24 = vsel %vm434_vm0, %v635_v12, 0.0  ;;  %v653_v25 = vmul.f32 %v652_v10, %v1197_v19  ;;  %v568_v17 = vrot.slane %v567_v6, 1 }
  0x56   : > { %v599_v22 = vadd.f32 %v598_v11, %v597_v2  ;;  %v607_v23 = vrot.slane %v606_v13, 2  ;;  %v629_v26 = vadd.f32 %v628_v20, %v627_v15  ;;  %v637_v28 = vrot.slane %v636_v24, 4 }
  0x57   : > { %v655_v29 = vstv %s1339_s12  ;;  %v537_v30 = vadd.f32 %v536_v39, %v1310_v18  ;;  %v577_v31 = vrot.slane %v576_v8, 1  ;;  %v654_v33 = vadd.f32 %v653_v25, %v651_v21 }
  0x58   : > { %v608_v32 = vadd.f32 %v607_v23, %v606_v13  ;;  %v630_v34 = vrot.slane %v629_v26, 2  ;;  %v638_v36 = vadd.f32 %v637_v28, %v636_v24  ;;  %v679_v37 = vsel %vm434_vm0, %v1300_v7, %v1326_v35 }
  0x59   : > { %v482_v19 = vadd.f32 %v481_v63, %v1274_v48  ;;  %v514_v38 = vadd.f32 %v513_v14, %v1316_v27  ;;  %v600_v40 = vrot.slane %v599_v22, 1  ;;  %v656_v41 = vadd.f32 %v655_v29, %v654_v33 }
  0x5a   : > { %v546_v18 = vadd.f32 %v545_v16, %v544_v61  ;;  %v569_v39 = vadd.f32 %v568_v17, %v567_v6  ;;  %v631_v42 = vadd.f32 %v630_v34, %v629_v26  ;;  %v639_v43 = vrot.slane %v638_v36, 2 }
  0x5b   : > { %950 = vst [vmem:[%s1215_s21 + $0xe] sm:$0x3] %v656_v41  ;;  %v659_v44 = vsel %vm434_vm0, %v656_v41, 0.0  ;;  %v667_v45 = vmul.f32 %v656_v41, %v656_v41  ;;  %v681_v46 = vsel %vm680_vm2, %v679_v37, %v537_v30  ;;  %v578_v7 = vadd.f32 %v577_v31, %v576_v8 }
  0x5c   : > { %v609_v35 = vrot.slane %v608_v32, 1  ;;  %v640_v47 = vadd.f32 %v639_v43, %v638_v36  ;;  %v660_v49 = vrot.slane %v659_v44, 4  ;;  %v601_v48 = vadd.f32 %v600_v40, %v599_v22 }
  0x5d   : > { %v632_v63 = vrot.slane %v631_v42, 1  ;;  %v668_v27 = vsel %vm434_vm0, %v667_v45, 0.0  ;;  %v693_v50 = vsel %vm677_vm1, %v1284_v55, %v482_v19  ;;  %v683_v53 = vsel %vm682_vm3, %v681_v46, %v569_v39 }
  0x5e   : > { %v661_v51 = vadd.f32 %v660_v49, %v659_v44  ;;  %v669_v52 = vrot.slane %v668_v27, 4  ;;  %v641_v54 = vrot.slane %v640_v47, 1  ;;  %v694_v56 = vsel %vm434_vm0, %v693_v50, %v514_v38 }
  0x5f   : > { %v610_v59 = vadd.f32 %v609_v35, %v608_v32  ;;  %v633_v60 = vadd.f32 %v632_v63, %v631_v42  ;;  %v685_v61 = vsel %vm684_vm4, %v683_v53, %v601_v48  ;;  %v695_v62 = vsel %vm680_vm2, %v694_v56, %v546_v18 }
  0x60   : > { %v662_v57 = vrot.slane %v661_v51, 2  ;;  %v670_v58 = vadd.f32 %v669_v52, %v668_v27  ;;  %v696_v1 = vsel %vm682_vm3, %v695_v62, %v578_v7  ;;  %v642_v2 = vadd.f32 %v641_v54, %v640_v47 }
  0x61   : > { %v697_v5 = vsel %vm684_vm4, %v696_v1, %v610_v59  ;;  %v687_v6 = vsel %vm686_vm5, %v685_v61, %v633_v60 }
  0x62   : > { %v663_v0 = vadd.f32 %v662_v57, %v661_v51  ;;  %v671_v55 = vrot.slane %v670_v58, 2  ;;  %v698_v10 = vsel %vm686_vm5, %v697_v5, %v642_v2 }
  0x64   : > { %v664_v3 = vrot.slane %v663_v0, 1  ;;  %v672_v4 = vadd.f32 %v671_v55, %v670_v58 }
  0x66   : > { %v665_v8 = vadd.f32 %v664_v3, %v663_v0  ;;  %v673_v9 = vrot.slane %v672_v4, 1 }
  0x68   : > { %v689_v11 = vsel %vm688_vm6, %v687_v6, %v665_v8  ;;  %v674_v13 = vadd.f32 %v673_v9, %v672_v4 }
  0x69   : > { %691 = vst [vmem:[%s338_s14] sm:$0xff] %v689_v11 }
  0x6a   : > { %v699_v15 = vsel %vm688_vm6, %v698_v10, %v674_v13 }
  0x6b   : > { %701 = vst [vmem:[%s342_s17] sm:$0xff] %v699_v15 }
  0x6c PF: > { %s19_s23 = sadd.s32 1, %s1086_s23   ;;  %s1399_s21 = smov %s1082_s22 }
  0x6d   : > { %p16_p8 = scmp.ge.s32.totalorder %s19_s23, 4   ;;  %s1400_s22 = smov %s1402_s30 }
  0x6f   :  { %18 = sbr.rel (!%p16_p8) target bundleno = 3 (0x3), region = 117 }
  0x74   :  { %757 = vsyncpa [#allocation3], 1 }
  0x75   :  { %759 = vsyncpa [#allocation3 + $0x1], 1 }
  0x76   :  { %760 = vsyncpa [#allocation5], 1 }

</bundles_post_ra>
